<compile_context>
chip_gen: v7x
topology: tpu7x:2x2x1
jax: 0.10.0
libtpu: 0.0.40
codegen_flags: <defaults>
</compile_context>

<pallas_src>
import jax
import jax.numpy as jnp
from jax import lax
from jax.experimental import pallas as pl
from jax.experimental.pallas import tpu as pltpu

LN_EPS = 1e-5
NEG_INF = -1e30


def _layernorm(y, gamma, beta):
    mu = jnp.mean(y, axis=-1, keepdims=True)
    var = jnp.mean((y - mu) ** 2, axis=-1, keepdims=True)
    return (y - mu) * lax.rsqrt(var + LN_EPS) * gamma + beta


def fused_decoder_kernel(policy_ref, board_ref,
                         wqv_ref, wk_ref, wo_ref, w1_ref, w2_ref,
                         vp_ref, vf_ref, out_ref):
    """One batch element; all n_layers applied sequentially with weights resident in VMEM.

    vp_ref[l] rows: 0=bk 1=bo 2=g1 3=be1 4=bf2 5=g2 6=be2      (each (1, Dp) slice)
    vf_ref[l] rows: 0=bqv (= [bq*scale | bv])  1=bf1           (each (1, Dff) slice)
    wqv already has the 1/sqrt(Dp) attention scale folded into its Q half.
    """
    x = policy_ref[0]        # (L, Dp)   query + value source (updated each layer)
    ctx = board_ref[0]       # (L, Dm)   key source (fixed)
    L, Dp = x.shape
    n_layers = wqv_ref.shape[0]

    # Causal mask, computed once and reused for every layer.
    row = lax.broadcasted_iota(jnp.int32, (L, L), 0)
    col = lax.broadcasted_iota(jnp.int32, (L, L), 1)
    causal = col > row

    for l in range(n_layers):
        vp = vp_ref[l]       # (7, Dp)
        vf = vf_ref[l]       # (2, Dff)

        # --- cross attention (single head: head_dim == d_policy) ---
        qv = jnp.dot(x, wqv_ref[l], preferred_element_type=jnp.float32) + vf[0:1]
        q = qv[:, :Dp]       # already scaled by 1/sqrt(Dp)
        v = qv[:, Dp:]
        k = jnp.dot(ctx, wk_ref[l], preferred_element_type=jnp.float32) + vp[0:1]

        # q @ k^T without materializing a transpose of k.
        scores = lax.dot_general(q, k, (((1,), (1,)), ((), ())),
                                 preferred_element_type=jnp.float32)
        scores = jnp.where(causal, NEG_INF, scores)

        m = jnp.max(scores, axis=-1, keepdims=True)
        e = jnp.exp(scores - m)
        p = e * pl.reciprocal(jnp.sum(e, axis=-1, keepdims=True), approx=True)

        attn = jnp.dot(p, v, preferred_element_type=jnp.float32)
        attn = jnp.dot(attn, wo_ref[l], preferred_element_type=jnp.float32) + vp[1:2]

        # --- Add & Norm 1 ---
        y = _layernorm(x + attn, vp[2:3], vp[3:4])

        # --- Feed-forward ---
        h = jnp.maximum(
            jnp.dot(y, w1_ref[l], preferred_element_type=jnp.float32) + vf[1:2], 0.0)
        ff = jnp.dot(h, w2_ref[l], preferred_element_type=jnp.float32) + vp[4:5]

        # --- Add & Norm 2 ---
        x = _layernorm(y + ff, vp[5:6], vp[6:7])

    out_ref[0] = x


def policy_refiner_decoder(policy_embeddings, board_embeddings, layer_params):
    B, L, Dp = policy_embeddings.shape
    Dm = board_embeddings.shape[-1]
    n_layers = len(layer_params)
    Dff = layer_params[0]["w1"].shape[1]
    assert Dff == 2 * Dp, "PolicyRefinerDecoder uses d_ff = 2 * d_policy"

    # ---- pack / pre-fold parameters (trace-time, tiny) ----
    scale = 1.0 / jnp.sqrt(jnp.float32(Dp))
    wqv = jnp.stack([jnp.concatenate([p["wq"] * scale, p["wv"]], axis=1)
                     for p in layer_params])                       # (nl, Dp, 2Dp)
    wk = jnp.stack([p["wk"] for p in layer_params])                # (nl, Dm, Dp)
    wo = jnp.stack([p["wo"] for p in layer_params])                # (nl, Dp, Dp)
    w1 = jnp.stack([p["w1"] for p in layer_params])                # (nl, Dp, Dff)
    w2 = jnp.stack([p["w2"] for p in layer_params])                # (nl, Dff, Dp)
    vp = jnp.stack([jnp.concatenate([p["bk"], p["bo"], p["g1"], p["be1"],
                                     p["bf2"], p["g2"], p["be2"]], axis=0)
                    for p in layer_params])                        # (nl, 7, Dp)
    vf = jnp.stack([jnp.concatenate(
        [jnp.concatenate([p["bq"] * scale, p["bv"]], axis=1), p["bf1"]], axis=0)
                    for p in layer_params])                        # (nl, 2, Dff)

    def full(shape):
        nd = len(shape)
        return pl.BlockSpec(shape, lambda b, _nd=nd: (0,) * _nd)

    return pl.pallas_call(
        fused_decoder_kernel,
        out_shape=jax.ShapeDtypeStruct((B, L, Dp), jnp.float32),
        grid=(B,),
        in_specs=[
            pl.BlockSpec((1, L, Dp), lambda b: (b, 0, 0)),   # policy (query/value source)
            pl.BlockSpec((1, L, Dm), lambda b: (b, 0, 0)),   # board  (key source)
            full((n_layers, Dp, 2 * Dp)),                    # fused Wq|Wv
            full((n_layers, Dm, Dp)),                        # Wk
            full((n_layers, Dp, Dp)),                        # Wo
            full((n_layers, Dp, Dff)),                       # FF linear1
            full((n_layers, Dff, Dp)),                       # FF linear2
            full((n_layers, 7, Dp)),                         # packed Dp-wide vectors
            full((n_layers, 2, Dff)),                        # packed Dff-wide vectors
        ],
        out_specs=pl.BlockSpec((1, L, Dp), lambda b: (b, 0, 0)),
        compiler_params=pltpu.CompilerParams(dimension_semantics=("parallel",)),
    )(policy_embeddings, board_embeddings, wqv, wk, wo, w1, w2, vp, vf)


# ----------------------- deterministic parameter init -----------------------
def init_layer_params(key, d_policy, d_model, d_ff):
    ks = jax.random.split(key, 12)
    s = 0.05
    return dict(
        wq=jax.random.normal(ks[0], (d_policy, d_policy), jnp.float32) * s,
        bq=jax.random.normal(ks[1], (1, d_policy), jnp.float32) * s,
        wk=jax.random.normal(ks[2], (d_model, d_policy), jnp.float32) * s,
        bk=jax.random.normal(ks[3], (1, d_policy), jnp.float32) * s,
        wv=jax.random.normal(ks[4], (d_policy, d_policy), jnp.float32) * s,
        bv=jax.random.normal(ks[5], (1, d_policy), jnp.float32) * s,
        wo=jax.random.normal(ks[6], (d_policy, d_policy), jnp.float32) * s,
        bo=jax.random.normal(ks[7], (1, d_policy), jnp.float32) * s,
        g1=jnp.ones((1, d_policy), jnp.float32),
        be1=jnp.zeros((1, d_policy), jnp.float32),
        w1=jax.random.normal(ks[8], (d_policy, d_ff), jnp.float32) * s,
        bf1=jax.random.normal(ks[9], (1, d_ff), jnp.float32) * s,
        w2=jax.random.normal(ks[10], (d_ff, d_policy), jnp.float32) * s,
        bf2=jax.random.normal(ks[11], (1, d_policy), jnp.float32) * s,
        g2=jnp.ones((1, d_policy), jnp.float32),
        be2=jnp.zeros((1, d_policy), jnp.float32),
    )


# ----------------------- pure-JAX reference (sanity) -----------------------
def ref_layer(x, ctx, p):
    B, L, Dp = x.shape
    q = x @ p["wq"] + p["bq"]
    k = ctx @ p["wk"] + p["bk"]
    v = x @ p["wv"] + p["bv"]
    scores = jnp.einsum("bqd,bkd->bqk", q, k) / jnp.sqrt(jnp.float32(Dp))
    mask = jnp.triu(jnp.ones((L, L), bool), 1)
    scores = jnp.where(mask[None], NEG_INF, scores)
    attn = jax.nn.softmax(scores, axis=-1) @ v
    attn = attn @ p["wo"] + p["bo"]

    def ln(y, g, b):
        mu = y.mean(-1, keepdims=True)
        var = ((y - mu) ** 2).mean(-1, keepdims=True)
        return (y - mu) / jnp.sqrt(var + LN_EPS) * g + b

    y = ln(x + attn, p["g1"], p["be1"])
    ff = jnp.maximum(y @ p["w1"] + p["bf1"], 0.0) @ p["w2"] + p["bf2"]
    return ln(y + ff, p["g2"], p["be2"])


def ref_decoder(policy, board, layer_params):
    x = policy
    for p in layer_params:
        x = ref_layer(x, board, p)
    return x


if __name__ == "__main__":
    jax.config.update("jax_default_matmul_precision", "highest")

    B, L = 2, 8
    d_policy, d_model = 32, 64
    n_layers = 4
    d_ff = 2 * d_policy  # PolicyRefinerDecoder sets d_ff = 2 * d_policy

    key = jax.random.PRNGKey(0)
    k_pol, k_brd, k_par = jax.random.split(key, 3)
    policy_embeddings = jax.random.normal(k_pol, (B, L, d_policy), jnp.float32)
    board_embeddings = jax.random.normal(k_brd, (B, L, d_model), jnp.float32)

    layer_params = [
        init_layer_params(jax.random.fold_in(k_par, i), d_policy, d_model, d_ff)
        for i in range(n_layers)
    ]

    out = policy_refiner_decoder(policy_embeddings, board_embeddings, layer_params)
    out = jax.block_until_ready(out)

    ref = ref_decoder(policy_embeddings, board_embeddings, layer_params)
    assert out.shape == (B, L, d_policy)
    assert jnp.allclose(out, ref, atol=2e-3, rtol=2e-3), (
        float(jnp.max(jnp.abs(out - ref))))

    print("KERNEL_OK")
</pallas_src>

<mosaic_0001>
module attributes {stable_mosaic.version = 11 : i64} {
  func.func @fused_decoder_kernel(%arg0: i32, %arg1: memref<1x8x32xf32, #tpu.memory_space<vmem>>, %arg2: memref<1x8x64xf32, #tpu.memory_space<vmem>>, %arg3: memref<4x32x64xf32, #tpu.memory_space<vmem>>, %arg4: memref<4x64x32xf32, #tpu.memory_space<vmem>>, %arg5: memref<4x32x32xf32, #tpu.memory_space<vmem>>, %arg6: memref<4x32x64xf32, #tpu.memory_space<vmem>>, %arg7: memref<4x64x32xf32, #tpu.memory_space<vmem>>, %arg8: memref<4x7x32xf32, #tpu.memory_space<vmem>>, %arg9: memref<4x2x64xf32, #tpu.memory_space<vmem>>, %arg10: memref<1x8x32xf32, #tpu.memory_space<vmem>>) attributes {dimension_semantics = [#tpu.dimension_semantics<parallel>], iteration_bounds = array<i64: 2>, scalar_prefetch = 0 : i64, scratch_operands = 0 : i64, tpu.core_type = #tpu.core_type<tc>, window_params = [{transform_indices = @transform_0, window_bounds = array<i64: 1, 8, 32>}, {transform_indices = @transform_1, window_bounds = array<i64: 1, 8, 64>}, {pipeline_mode = #tpu.pipeline_mode<synchronous>, transform_indices = @transform_2, window_bounds = array<i64: 4, 32, 64>}, {pipeline_mode = #tpu.pipeline_mode<synchronous>, transform_indices = @transform_3, window_bounds = array<i64: 4, 64, 32>}, {pipeline_mode = #tpu.pipeline_mode<synchronous>, transform_indices = @transform_4, window_bounds = array<i64: 4, 32, 32>}, {pipeline_mode = #tpu.pipeline_mode<synchronous>, transform_indices = @transform_5, window_bounds = array<i64: 4, 32, 64>}, {pipeline_mode = #tpu.pipeline_mode<synchronous>, transform_indices = @transform_6, window_bounds = array<i64: 4, 64, 32>}, {pipeline_mode = #tpu.pipeline_mode<synchronous>, transform_indices = @transform_7, window_bounds = array<i64: 4, 7, 32>}, {pipeline_mode = #tpu.pipeline_mode<synchronous>, transform_indices = @transform_8, window_bounds = array<i64: 4, 2, 64>}, {transform_indices = @transform_9, window_bounds = array<i64: 1, 8, 32>}]} {
    %c0 = arith.constant 0 : index
    %c0_0 = arith.constant 0 : index
    %c0_1 = arith.constant 0 : index
    %0 = vector.load %arg1[%c0, %c0_0, %c0_1] : memref<1x8x32xf32, #tpu.memory_space<vmem>>, vector<1x8x32xf32>
    %1 = vector.shape_cast %0 : vector<1x8x32xf32> to vector<8x32xf32>
    %c0_2 = arith.constant 0 : index
    %c0_3 = arith.constant 0 : index
    %c0_4 = arith.constant 0 : index
    %2 = vector.load %arg2[%c0_2, %c0_3, %c0_4] : memref<1x8x64xf32, #tpu.memory_space<vmem>>, vector<1x8x64xf32>
    %3 = vector.shape_cast %2 : vector<1x8x64xf32> to vector<8x64xf32>
    %4 = tpu.iota {dimensions = array<i32: 0>} : vector<8x8xi32>
    %5 = tpu.iota {dimensions = array<i32: 1>} : vector<8x8xi32>
    %6 = arith.cmpi sgt, %5, %4 : vector<8x8xi32>
    %c0_5 = arith.constant 0 : index
    %c0_6 = arith.constant 0 : index
    %c0_7 = arith.constant 0 : index
    %7 = vector.load %arg8[%c0_5, %c0_6, %c0_7] : memref<4x7x32xf32, #tpu.memory_space<vmem>>, vector<1x7x32xf32>
    %8 = vector.shape_cast %7 : vector<1x7x32xf32> to vector<7x32xf32>
    %c0_8 = arith.constant 0 : index
    %c0_9 = arith.constant 0 : index
    %c0_10 = arith.constant 0 : index
    %9 = vector.load %arg9[%c0_8, %c0_9, %c0_10] : memref<4x2x64xf32, #tpu.memory_space<vmem>>, vector<1x2x64xf32>
    %10 = vector.shape_cast %9 : vector<1x2x64xf32> to vector<2x64xf32>
    %c0_11 = arith.constant 0 : index
    %c0_12 = arith.constant 0 : index
    %c0_13 = arith.constant 0 : index
    %11 = vector.load %arg3[%c0_11, %c0_12, %c0_13] : memref<4x32x64xf32, #tpu.memory_space<vmem>>, vector<1x32x64xf32>
    %12 = vector.shape_cast %11 : vector<1x32x64xf32> to vector<32x64xf32>
    %cst = arith.constant dense<0.000000e+00> : vector<8x64xf32>
    %13 = tpu.matmul %1, %12, %cst {dimension_numbers = #tpu.dot_dimension_numbers<[1], [0], [0], [1], [0, 0, 1, 1], [], []>, precision = #tpu.contract_precision<fp32>} : vector<8x32xf32>, vector<32x64xf32>, vector<8x64xf32> -> vector<8x64xf32>
    %14 = vector.extract_strided_slice %10 {offsets = [0, 0], sizes = [1, 64], strides = [1, 1]} : vector<2x64xf32> to vector<1x64xf32>
    %15 = vector.broadcast %14 : vector<1x64xf32> to vector<8x64xf32>
    %16 = arith.addf %13, %15 : vector<8x64xf32>
    %17 = vector.extract_strided_slice %16 {offsets = [0, 0], sizes = [8, 32], strides = [1, 1]} : vector<8x64xf32> to vector<8x32xf32>
    %18 = vector.extract_strided_slice %16 {offsets = [0, 32], sizes = [8, 32], strides = [1, 1]} : vector<8x64xf32> to vector<8x32xf32>
    %c0_14 = arith.constant 0 : index
    %c0_15 = arith.constant 0 : index
    %c0_16 = arith.constant 0 : index
    %19 = vector.load %arg4[%c0_14, %c0_15, %c0_16] : memref<4x64x32xf32, #tpu.memory_space<vmem>>, vector<1x64x32xf32>
    %20 = vector.shape_cast %19 : vector<1x64x32xf32> to vector<64x32xf32>
    %cst_17 = arith.constant dense<0.000000e+00> : vector<8x32xf32>
    %21 = tpu.matmul %3, %20, %cst_17 {dimension_numbers = #tpu.dot_dimension_numbers<[1], [0], [0], [1], [0, 0, 1, 1], [], []>, precision = #tpu.contract_precision<fp32>} : vector<8x64xf32>, vector<64x32xf32>, vector<8x32xf32> -> vector<8x32xf32>
    %22 = vector.extract_strided_slice %8 {offsets = [0, 0], sizes = [1, 32], strides = [1, 1]} : vector<7x32xf32> to vector<1x32xf32>
    %23 = vector.broadcast %22 : vector<1x32xf32> to vector<8x32xf32>
    %24 = arith.addf %21, %23 : vector<8x32xf32>
    %cst_18 = arith.constant dense<0.000000e+00> : vector<8x8xf32>
    %25 = tpu.matmul %17, %24, %cst_18 {dimension_numbers = #tpu.dot_dimension_numbers<[1], [1], [0], [0], [0, 0, 1, 0], [], []>, precision = #tpu.contract_precision<fp32>} : vector<8x32xf32>, vector<8x32xf32>, vector<8x8xf32> -> vector<8x8xf32>
    %cst_19 = arith.constant -1.000000e+30 : f32
    %26 = vector.broadcast %cst_19 : f32 to vector<8x8xf32>
    %27 = arith.select %6, %26, %25 : vector<8x8xi1>, vector<8x8xf32>
    %cst_20 = arith.constant dense<0xFF800000> : vector<8xf32>
    %28 = vector.multi_reduction <maximumf>, %27, %cst_20 [1] : vector<8x8xf32> to vector<8xf32>
    %29 = vector.shape_cast %28 : vector<8xf32> to vector<8x1xf32>
    %30 = vector.broadcast %29 : vector<8x1xf32> to vector<8x8xf32>
    %31 = arith.subf %27, %30 : vector<8x8xf32>
    %32 = math.exp %31 : vector<8x8xf32>
    %cst_21 = arith.constant dense<0.000000e+00> : vector<8xf32>
    %33 = vector.multi_reduction <add>, %32, %cst_21 [1] : vector<8x8xf32> to vector<8xf32>
    %34 = vector.shape_cast %33 : vector<8xf32> to vector<8x1xf32>
    %35 = tpu.reciprocal %34 {approx = true} : vector<8x1xf32> -> vector<8x1xf32>
    %36 = vector.broadcast %35 : vector<8x1xf32> to vector<8x8xf32>
    %37 = arith.mulf %32, %36 : vector<8x8xf32>
    %cst_22 = arith.constant dense<0.000000e+00> : vector<8x32xf32>
    %38 = tpu.matmul %37, %18, %cst_22 {dimension_numbers = #tpu.dot_dimension_numbers<[1], [0], [0], [1], [0, 0, 1, 1], [], []>, precision = #tpu.contract_precision<fp32>} : vector<8x8xf32>, vector<8x32xf32>, vector<8x32xf32> -> vector<8x32xf32>
    %c0_23 = arith.constant 0 : index
    %c0_24 = arith.constant 0 : index
    %c0_25 = arith.constant 0 : index
    %39 = vector.load %arg5[%c0_23, %c0_24, %c0_25] : memref<4x32x32xf32, #tpu.memory_space<vmem>>, vector<1x32x32xf32>
    %40 = vector.shape_cast %39 : vector<1x32x32xf32> to vector<32x32xf32>
    %cst_26 = arith.constant dense<0.000000e+00> : vector<8x32xf32>
    %41 = tpu.matmul %38, %40, %cst_26 {dimension_numbers = #tpu.dot_dimension_numbers<[1], [0], [0], [1], [0, 0, 1, 1], [], []>, precision = #tpu.contract_precision<fp32>} : vector<8x32xf32>, vector<32x32xf32>, vector<8x32xf32> -> vector<8x32xf32>
    %42 = vector.extract_strided_slice %8 {offsets = [1, 0], sizes = [1, 32], strides = [1, 1]} : vector<7x32xf32> to vector<1x32xf32>
    %43 = vector.broadcast %42 : vector<1x32xf32> to vector<8x32xf32>
    %44 = arith.addf %41, %43 : vector<8x32xf32>
    %45 = arith.addf %1, %44 : vector<8x32xf32>
    %46 = vector.extract_strided_slice %8 {offsets = [2, 0], sizes = [1, 32], strides = [1, 1]} : vector<7x32xf32> to vector<1x32xf32>
    %47 = vector.extract_strided_slice %8 {offsets = [3, 0], sizes = [1, 32], strides = [1, 1]} : vector<7x32xf32> to vector<1x32xf32>
    %cst_27 = arith.constant dense<0.000000e+00> : vector<8xf32>
    %48 = vector.multi_reduction <add>, %45, %cst_27 [1] : vector<8x32xf32> to vector<8xf32>
    %49 = vector.shape_cast %48 : vector<8xf32> to vector<8x1xf32>
    %cst_28 = arith.constant 3.200000e+01 : f32
    %50 = vector.broadcast %cst_28 : f32 to vector<8x1xf32>
    %51 = arith.divf %49, %50 : vector<8x1xf32>
    %52 = vector.broadcast %51 : vector<8x1xf32> to vector<8x32xf32>
    %53 = arith.subf %45, %52 : vector<8x32xf32>
    %54 = arith.mulf %53, %53 : vector<8x32xf32>
    %cst_29 = arith.constant dense<0.000000e+00> : vector<8xf32>
    %55 = vector.multi_reduction <add>, %54, %cst_29 [1] : vector<8x32xf32> to vector<8xf32>
    %56 = vector.shape_cast %55 : vector<8xf32> to vector<8x1xf32>
    %cst_30 = arith.constant 3.200000e+01 : f32
    %57 = vector.broadcast %cst_30 : f32 to vector<8x1xf32>
    %58 = arith.divf %56, %57 : vector<8x1xf32>
    %59 = vector.broadcast %51 : vector<8x1xf32> to vector<8x32xf32>
    %60 = arith.subf %45, %59 : vector<8x32xf32>
    %cst_31 = arith.constant 9.99999974E-6 : f32
    %61 = vector.broadcast %cst_31 : f32 to vector<8x1xf32>
    %62 = arith.addf %58, %61 : vector<8x1xf32>
    %63 = math.rsqrt %62 : vector<8x1xf32>
    %64 = vector.broadcast %63 : vector<8x1xf32> to vector<8x32xf32>
    %65 = arith.mulf %60, %64 : vector<8x32xf32>
    %66 = vector.broadcast %46 : vector<1x32xf32> to vector<8x32xf32>
    %67 = arith.mulf %65, %66 : vector<8x32xf32>
    %68 = vector.broadcast %47 : vector<1x32xf32> to vector<8x32xf32>
    %69 = arith.addf %67, %68 : vector<8x32xf32>
    %c0_32 = arith.constant 0 : index
    %c0_33 = arith.constant 0 : index
    %c0_34 = arith.constant 0 : index
    %70 = vector.load %arg6[%c0_32, %c0_33, %c0_34] : memref<4x32x64xf32, #tpu.memory_space<vmem>>, vector<1x32x64xf32>
    %71 = vector.shape_cast %70 : vector<1x32x64xf32> to vector<32x64xf32>
    %cst_35 = arith.constant dense<0.000000e+00> : vector<8x64xf32>
    %72 = tpu.matmul %69, %71, %cst_35 {dimension_numbers = #tpu.dot_dimension_numbers<[1], [0], [0], [1], [0, 0, 1, 1], [], []>, precision = #tpu.contract_precision<fp32>} : vector<8x32xf32>, vector<32x64xf32>, vector<8x64xf32> -> vector<8x64xf32>
    %73 = vector.extract_strided_slice %10 {offsets = [1, 0], sizes = [1, 64], strides = [1, 1]} : vector<2x64xf32> to vector<1x64xf32>
    %74 = vector.broadcast %73 : vector<1x64xf32> to vector<8x64xf32>
    %75 = arith.addf %72, %74 : vector<8x64xf32>
    %cst_36 = arith.constant 0.000000e+00 : f32
    %76 = vector.broadcast %cst_36 : f32 to vector<8x64xf32>
    %77 = arith.maximumf %75, %76 : vector<8x64xf32>
    %c0_37 = arith.constant 0 : index
    %c0_38 = arith.constant 0 : index
    %c0_39 = arith.constant 0 : index
    %78 = vector.load %arg7[%c0_37, %c0_38, %c0_39] : memref<4x64x32xf32, #tpu.memory_space<vmem>>, vector<1x64x32xf32>
    %79 = vector.shape_cast %78 : vector<1x64x32xf32> to vector<64x32xf32>
    %cst_40 = arith.constant dense<0.000000e+00> : vector<8x32xf32>
    %80 = tpu.matmul %77, %79, %cst_40 {dimension_numbers = #tpu.dot_dimension_numbers<[1], [0], [0], [1], [0, 0, 1, 1], [], []>, precision = #tpu.contract_precision<fp32>} : vector<8x64xf32>, vector<64x32xf32>, vector<8x32xf32> -> vector<8x32xf32>
    %81 = vector.extract_strided_slice %8 {offsets = [4, 0], sizes = [1, 32], strides = [1, 1]} : vector<7x32xf32> to vector<1x32xf32>
    %82 = vector.broadcast %81 : vector<1x32xf32> to vector<8x32xf32>
    %83 = arith.addf %80, %82 : vector<8x32xf32>
    %84 = arith.addf %69, %83 : vector<8x32xf32>
    %85 = vector.extract_strided_slice %8 {offsets = [5, 0], sizes = [1, 32], strides = [1, 1]} : vector<7x32xf32> to vector<1x32xf32>
    %86 = vector.extract_strided_slice %8 {offsets = [6, 0], sizes = [1, 32], strides = [1, 1]} : vector<7x32xf32> to vector<1x32xf32>
    %cst_41 = arith.constant dense<0.000000e+00> : vector<8xf32>
    %87 = vector.multi_reduction <add>, %84, %cst_41 [1] : vector<8x32xf32> to vector<8xf32>
    %88 = vector.shape_cast %87 : vector<8xf32> to vector<8x1xf32>
    %cst_42 = arith.constant 3.200000e+01 : f32
    %89 = vector.broadcast %cst_42 : f32 to vector<8x1xf32>
    %90 = arith.divf %88, %89 : vector<8x1xf32>
    %91 = vector.broadcast %90 : vector<8x1xf32> to vector<8x32xf32>
    %92 = arith.subf %84, %91 : vector<8x32xf32>
    %93 = arith.mulf %92, %92 : vector<8x32xf32>
    %cst_43 = arith.constant dense<0.000000e+00> : vector<8xf32>
    %94 = vector.multi_reduction <add>, %93, %cst_43 [1] : vector<8x32xf32> to vector<8xf32>
    %95 = vector.shape_cast %94 : vector<8xf32> to vector<8x1xf32>
    %cst_44 = arith.constant 3.200000e+01 : f32
    %96 = vector.broadcast %cst_44 : f32 to vector<8x1xf32>
    %97 = arith.divf %95, %96 : vector<8x1xf32>
    %98 = vector.broadcast %90 : vector<8x1xf32> to vector<8x32xf32>
    %99 = arith.subf %84, %98 : vector<8x32xf32>
    %cst_45 = arith.constant 9.99999974E-6 : f32
    %100 = vector.broadcast %cst_45 : f32 to vector<8x1xf32>
    %101 = arith.addf %97, %100 : vector<8x1xf32>
    %102 = math.rsqrt %101 : vector<8x1xf32>
    %103 = vector.broadcast %102 : vector<8x1xf32> to vector<8x32xf32>
    %104 = arith.mulf %99, %103 : vector<8x32xf32>
    %105 = vector.broadcast %85 : vector<1x32xf32> to vector<8x32xf32>
    %106 = arith.mulf %104, %105 : vector<8x32xf32>
    %107 = vector.broadcast %86 : vector<1x32xf32> to vector<8x32xf32>
    %108 = arith.addf %106, %107 : vector<8x32xf32>
    %c1 = arith.constant 1 : index
    %c0_46 = arith.constant 0 : index
    %c0_47 = arith.constant 0 : index
    %109 = vector.load %arg8[%c1, %c0_46, %c0_47] : memref<4x7x32xf32, #tpu.memory_space<vmem>>, vector<1x7x32xf32>
    %110 = vector.shape_cast %109 : vector<1x7x32xf32> to vector<7x32xf32>
    %c1_48 = arith.constant 1 : index
    %c0_49 = arith.constant 0 : index
    %c0_50 = arith.constant 0 : index
    %111 = vector.load %arg9[%c1_48, %c0_49, %c0_50] : memref<4x2x64xf32, #tpu.memory_space<vmem>>, vector<1x2x64xf32>
    %112 = vector.shape_cast %111 : vector<1x2x64xf32> to vector<2x64xf32>
    %c1_51 = arith.constant 1 : index
    %c0_52 = arith.constant 0 : index
    %c0_53 = arith.constant 0 : index
    %113 = vector.load %arg3[%c1_51, %c0_52, %c0_53] : memref<4x32x64xf32, #tpu.memory_space<vmem>>, vector<1x32x64xf32>
    %114 = vector.shape_cast %113 : vector<1x32x64xf32> to vector<32x64xf32>
    %cst_54 = arith.constant dense<0.000000e+00> : vector<8x64xf32>
    %115 = tpu.matmul %108, %114, %cst_54 {dimension_numbers = #tpu.dot_dimension_numbers<[1], [0], [0], [1], [0, 0, 1, 1], [], []>, precision = #tpu.contract_precision<fp32>} : vector<8x32xf32>, vector<32x64xf32>, vector<8x64xf32> -> vector<8x64xf32>
    %116 = vector.extract_strided_slice %112 {offsets = [0, 0], sizes = [1, 64], strides = [1, 1]} : vector<2x64xf32> to vector<1x64xf32>
    %117 = vector.broadcast %116 : vector<1x64xf32> to vector<8x64xf32>
    %118 = arith.addf %115, %117 : vector<8x64xf32>
    %119 = vector.extract_strided_slice %118 {offsets = [0, 0], sizes = [8, 32], strides = [1, 1]} : vector<8x64xf32> to vector<8x32xf32>
    %120 = vector.extract_strided_slice %118 {offsets = [0, 32], sizes = [8, 32], strides = [1, 1]} : vector<8x64xf32> to vector<8x32xf32>
    %c1_55 = arith.constant 1 : index
    %c0_56 = arith.constant 0 : index
    %c0_57 = arith.constant 0 : index
    %121 = vector.load %arg4[%c1_55, %c0_56, %c0_57] : memref<4x64x32xf32, #tpu.memory_space<vmem>>, vector<1x64x32xf32>
    %122 = vector.shape_cast %121 : vector<1x64x32xf32> to vector<64x32xf32>
    %cst_58 = arith.constant dense<0.000000e+00> : vector<8x32xf32>
    %123 = tpu.matmul %3, %122, %cst_58 {dimension_numbers = #tpu.dot_dimension_numbers<[1], [0], [0], [1], [0, 0, 1, 1], [], []>, precision = #tpu.contract_precision<fp32>} : vector<8x64xf32>, vector<64x32xf32>, vector<8x32xf32> -> vector<8x32xf32>
    %124 = vector.extract_strided_slice %110 {offsets = [0, 0], sizes = [1, 32], strides = [1, 1]} : vector<7x32xf32> to vector<1x32xf32>
    %125 = vector.broadcast %124 : vector<1x32xf32> to vector<8x32xf32>
    %126 = arith.addf %123, %125 : vector<8x32xf32>
    %cst_59 = arith.constant dense<0.000000e+00> : vector<8x8xf32>
    %127 = tpu.matmul %119, %126, %cst_59 {dimension_numbers = #tpu.dot_dimension_numbers<[1], [1], [0], [0], [0, 0, 1, 0], [], []>, precision = #tpu.contract_precision<fp32>} : vector<8x32xf32>, vector<8x32xf32>, vector<8x8xf32> -> vector<8x8xf32>
    %cst_60 = arith.constant -1.000000e+30 : f32
    %128 = vector.broadcast %cst_60 : f32 to vector<8x8xf32>
    %129 = arith.select %6, %128, %127 : vector<8x8xi1>, vector<8x8xf32>
    %cst_61 = arith.constant dense<0xFF800000> : vector<8xf32>
    %130 = vector.multi_reduction <maximumf>, %129, %cst_61 [1] : vector<8x8xf32> to vector<8xf32>
    %131 = vector.shape_cast %130 : vector<8xf32> to vector<8x1xf32>
    %132 = vector.broadcast %131 : vector<8x1xf32> to vector<8x8xf32>
    %133 = arith.subf %129, %132 : vector<8x8xf32>
    %134 = math.exp %133 : vector<8x8xf32>
    %cst_62 = arith.constant dense<0.000000e+00> : vector<8xf32>
    %135 = vector.multi_reduction <add>, %134, %cst_62 [1] : vector<8x8xf32> to vector<8xf32>
    %136 = vector.shape_cast %135 : vector<8xf32> to vector<8x1xf32>
    %137 = tpu.reciprocal %136 {approx = true} : vector<8x1xf32> -> vector<8x1xf32>
    %138 = vector.broadcast %137 : vector<8x1xf32> to vector<8x8xf32>
    %139 = arith.mulf %134, %138 : vector<8x8xf32>
    %cst_63 = arith.constant dense<0.000000e+00> : vector<8x32xf32>
    %140 = tpu.matmul %139, %120, %cst_63 {dimension_numbers = #tpu.dot_dimension_numbers<[1], [0], [0], [1], [0, 0, 1, 1], [], []>, precision = #tpu.contract_precision<fp32>} : vector<8x8xf32>, vector<8x32xf32>, vector<8x32xf32> -> vector<8x32xf32>
    %c1_64 = arith.constant 1 : index
    %c0_65 = arith.constant 0 : index
    %c0_66 = arith.constant 0 : index
    %141 = vector.load %arg5[%c1_64, %c0_65, %c0_66] : memref<4x32x32xf32, #tpu.memory_space<vmem>>, vector<1x32x32xf32>
    %142 = vector.shape_cast %141 : vector<1x32x32xf32> to vector<32x32xf32>
    %cst_67 = arith.constant dense<0.000000e+00> : vector<8x32xf32>
    %143 = tpu.matmul %140, %142, %cst_67 {dimension_numbers = #tpu.dot_dimension_numbers<[1], [0], [0], [1], [0, 0, 1, 1], [], []>, precision = #tpu.contract_precision<fp32>} : vector<8x32xf32>, vector<32x32xf32>, vector<8x32xf32> -> vector<8x32xf32>
    %144 = vector.extract_strided_slice %110 {offsets = [1, 0], sizes = [1, 32], strides = [1, 1]} : vector<7x32xf32> to vector<1x32xf32>
    %145 = vector.broadcast %144 : vector<1x32xf32> to vector<8x32xf32>
    %146 = arith.addf %143, %145 : vector<8x32xf32>
    %147 = arith.addf %108, %146 : vector<8x32xf32>
    %148 = vector.extract_strided_slice %110 {offsets = [2, 0], sizes = [1, 32], strides = [1, 1]} : vector<7x32xf32> to vector<1x32xf32>
    %149 = vector.extract_strided_slice %110 {offsets = [3, 0], sizes = [1, 32], strides = [1, 1]} : vector<7x32xf32> to vector<1x32xf32>
    %cst_68 = arith.constant dense<0.000000e+00> : vector<8xf32>
    %150 = vector.multi_reduction <add>, %147, %cst_68 [1] : vector<8x32xf32> to vector<8xf32>
    %151 = vector.shape_cast %150 : vector<8xf32> to vector<8x1xf32>
    %cst_69 = arith.constant 3.200000e+01 : f32
    %152 = vector.broadcast %cst_69 : f32 to vector<8x1xf32>
    %153 = arith.divf %151, %152 : vector<8x1xf32>
    %154 = vector.broadcast %153 : vector<8x1xf32> to vector<8x32xf32>
    %155 = arith.subf %147, %154 : vector<8x32xf32>
    %156 = arith.mulf %155, %155 : vector<8x32xf32>
    %cst_70 = arith.constant dense<0.000000e+00> : vector<8xf32>
    %157 = vector.multi_reduction <add>, %156, %cst_70 [1] : vector<8x32xf32> to vector<8xf32>
    %158 = vector.shape_cast %157 : vector<8xf32> to vector<8x1xf32>
    %cst_71 = arith.constant 3.200000e+01 : f32
    %159 = vector.broadcast %cst_71 : f32 to vector<8x1xf32>
    %160 = arith.divf %158, %159 : vector<8x1xf32>
    %161 = vector.broadcast %153 : vector<8x1xf32> to vector<8x32xf32>
    %162 = arith.subf %147, %161 : vector<8x32xf32>
    %cst_72 = arith.constant 9.99999974E-6 : f32
    %163 = vector.broadcast %cst_72 : f32 to vector<8x1xf32>
    %164 = arith.addf %160, %163 : vector<8x1xf32>
    %165 = math.rsqrt %164 : vector<8x1xf32>
    %166 = vector.broadcast %165 : vector<8x1xf32> to vector<8x32xf32>
    %167 = arith.mulf %162, %166 : vector<8x32xf32>
    %168 = vector.broadcast %148 : vector<1x32xf32> to vector<8x32xf32>
    %169 = arith.mulf %167, %168 : vector<8x32xf32>
    %170 = vector.broadcast %149 : vector<1x32xf32> to vector<8x32xf32>
    %171 = arith.addf %169, %170 : vector<8x32xf32>
    %c1_73 = arith.constant 1 : index
    %c0_74 = arith.constant 0 : index
    %c0_75 = arith.constant 0 : index
    %172 = vector.load %arg6[%c1_73, %c0_74, %c0_75] : memref<4x32x64xf32, #tpu.memory_space<vmem>>, vector<1x32x64xf32>
    %173 = vector.shape_cast %172 : vector<1x32x64xf32> to vector<32x64xf32>
    %cst_76 = arith.constant dense<0.000000e+00> : vector<8x64xf32>
    %174 = tpu.matmul %171, %173, %cst_76 {dimension_numbers = #tpu.dot_dimension_numbers<[1], [0], [0], [1], [0, 0, 1, 1], [], []>, precision = #tpu.contract_precision<fp32>} : vector<8x32xf32>, vector<32x64xf32>, vector<8x64xf32> -> vector<8x64xf32>
    %175 = vector.extract_strided_slice %112 {offsets = [1, 0], sizes = [1, 64], strides = [1, 1]} : vector<2x64xf32> to vector<1x64xf32>
    %176 = vector.broadcast %175 : vector<1x64xf32> to vector<8x64xf32>
    %177 = arith.addf %174, %176 : vector<8x64xf32>
    %cst_77 = arith.constant 0.000000e+00 : f32
    %178 = vector.broadcast %cst_77 : f32 to vector<8x64xf32>
    %179 = arith.maximumf %177, %178 : vector<8x64xf32>
    %c1_78 = arith.constant 1 : index
    %c0_79 = arith.constant 0 : index
    %c0_80 = arith.constant 0 : index
    %180 = vector.load %arg7[%c1_78, %c0_79, %c0_80] : memref<4x64x32xf32, #tpu.memory_space<vmem>>, vector<1x64x32xf32>
    %181 = vector.shape_cast %180 : vector<1x64x32xf32> to vector<64x32xf32>
    %cst_81 = arith.constant dense<0.000000e+00> : vector<8x32xf32>
    %182 = tpu.matmul %179, %181, %cst_81 {dimension_numbers = #tpu.dot_dimension_numbers<[1], [0], [0], [1], [0, 0, 1, 1], [], []>, precision = #tpu.contract_precision<fp32>} : vector<8x64xf32>, vector<64x32xf32>, vector<8x32xf32> -> vector<8x32xf32>
    %183 = vector.extract_strided_slice %110 {offsets = [4, 0], sizes = [1, 32], strides = [1, 1]} : vector<7x32xf32> to vector<1x32xf32>
    %184 = vector.broadcast %183 : vector<1x32xf32> to vector<8x32xf32>
    %185 = arith.addf %182, %184 : vector<8x32xf32>
    %186 = arith.addf %171, %185 : vector<8x32xf32>
    %187 = vector.extract_strided_slice %110 {offsets = [5, 0], sizes = [1, 32], strides = [1, 1]} : vector<7x32xf32> to vector<1x32xf32>
    %188 = vector.extract_strided_slice %110 {offsets = [6, 0], sizes = [1, 32], strides = [1, 1]} : vector<7x32xf32> to vector<1x32xf32>
    %cst_82 = arith.constant dense<0.000000e+00> : vector<8xf32>
    %189 = vector.multi_reduction <add>, %186, %cst_82 [1] : vector<8x32xf32> to vector<8xf32>
    %190 = vector.shape_cast %189 : vector<8xf32> to vector<8x1xf32>
    %cst_83 = arith.constant 3.200000e+01 : f32
    %191 = vector.broadcast %cst_83 : f32 to vector<8x1xf32>
    %192 = arith.divf %190, %191 : vector<8x1xf32>
    %193 = vector.broadcast %192 : vector<8x1xf32> to vector<8x32xf32>
    %194 = arith.subf %186, %193 : vector<8x32xf32>
    %195 = arith.mulf %194, %194 : vector<8x32xf32>
    %cst_84 = arith.constant dense<0.000000e+00> : vector<8xf32>
    %196 = vector.multi_reduction <add>, %195, %cst_84 [1] : vector<8x32xf32> to vector<8xf32>
    %197 = vector.shape_cast %196 : vector<8xf32> to vector<8x1xf32>
    %cst_85 = arith.constant 3.200000e+01 : f32
    %198 = vector.broadcast %cst_85 : f32 to vector<8x1xf32>
    %199 = arith.divf %197, %198 : vector<8x1xf32>
    %200 = vector.broadcast %192 : vector<8x1xf32> to vector<8x32xf32>
    %201 = arith.subf %186, %200 : vector<8x32xf32>
    %cst_86 = arith.constant 9.99999974E-6 : f32
    %202 = vector.broadcast %cst_86 : f32 to vector<8x1xf32>
    %203 = arith.addf %199, %202 : vector<8x1xf32>
    %204 = math.rsqrt %203 : vector<8x1xf32>
    %205 = vector.broadcast %204 : vector<8x1xf32> to vector<8x32xf32>
    %206 = arith.mulf %201, %205 : vector<8x32xf32>
    %207 = vector.broadcast %187 : vector<1x32xf32> to vector<8x32xf32>
    %208 = arith.mulf %206, %207 : vector<8x32xf32>
    %209 = vector.broadcast %188 : vector<1x32xf32> to vector<8x32xf32>
    %210 = arith.addf %208, %209 : vector<8x32xf32>
    %c2 = arith.constant 2 : index
    %c0_87 = arith.constant 0 : index
    %c0_88 = arith.constant 0 : index
    %211 = vector.load %arg8[%c2, %c0_87, %c0_88] : memref<4x7x32xf32, #tpu.memory_space<vmem>>, vector<1x7x32xf32>
    %212 = vector.shape_cast %211 : vector<1x7x32xf32> to vector<7x32xf32>
    %c2_89 = arith.constant 2 : index
    %c0_90 = arith.constant 0 : index
    %c0_91 = arith.constant 0 : index
    %213 = vector.load %arg9[%c2_89, %c0_90, %c0_91] : memref<4x2x64xf32, #tpu.memory_space<vmem>>, vector<1x2x64xf32>
    %214 = vector.shape_cast %213 : vector<1x2x64xf32> to vector<2x64xf32>
    %c2_92 = arith.constant 2 : index
    %c0_93 = arith.constant 0 : index
    %c0_94 = arith.constant 0 : index
    %215 = vector.load %arg3[%c2_92, %c0_93, %c0_94] : memref<4x32x64xf32, #tpu.memory_space<vmem>>, vector<1x32x64xf32>
    %216 = vector.shape_cast %215 : vector<1x32x64xf32> to vector<32x64xf32>
    %cst_95 = arith.constant dense<0.000000e+00> : vector<8x64xf32>
    %217 = tpu.matmul %210, %216, %cst_95 {dimension_numbers = #tpu.dot_dimension_numbers<[1], [0], [0], [1], [0, 0, 1, 1], [], []>, precision = #tpu.contract_precision<fp32>} : vector<8x32xf32>, vector<32x64xf32>, vector<8x64xf32> -> vector<8x64xf32>
    %218 = vector.extract_strided_slice %214 {offsets = [0, 0], sizes = [1, 64], strides = [1, 1]} : vector<2x64xf32> to vector<1x64xf32>
    %219 = vector.broadcast %218 : vector<1x64xf32> to vector<8x64xf32>
    %220 = arith.addf %217, %219 : vector<8x64xf32>
    %221 = vector.extract_strided_slice %220 {offsets = [0, 0], sizes = [8, 32], strides = [1, 1]} : vector<8x64xf32> to vector<8x32xf32>
    %222 = vector.extract_strided_slice %220 {offsets = [0, 32], sizes = [8, 32], strides = [1, 1]} : vector<8x64xf32> to vector<8x32xf32>
    %c2_96 = arith.constant 2 : index
    %c0_97 = arith.constant 0 : index
    %c0_98 = arith.constant 0 : index
    %223 = vector.load %arg4[%c2_96, %c0_97, %c0_98] : memref<4x64x32xf32, #tpu.memory_space<vmem>>, vector<1x64x32xf32>
    %224 = vector.shape_cast %223 : vector<1x64x32xf32> to vector<64x32xf32>
    %cst_99 = arith.constant dense<0.000000e+00> : vector<8x32xf32>
    %225 = tpu.matmul %3, %224, %cst_99 {dimension_numbers = #tpu.dot_dimension_numbers<[1], [0], [0], [1], [0, 0, 1, 1], [], []>, precision = #tpu.contract_precision<fp32>} : vector<8x64xf32>, vector<64x32xf32>, vector<8x32xf32> -> vector<8x32xf32>
    %226 = vector.extract_strided_slice %212 {offsets = [0, 0], sizes = [1, 32], strides = [1, 1]} : vector<7x32xf32> to vector<1x32xf32>
    %227 = vector.broadcast %226 : vector<1x32xf32> to vector<8x32xf32>
    %228 = arith.addf %225, %227 : vector<8x32xf32>
    %cst_100 = arith.constant dense<0.000000e+00> : vector<8x8xf32>
    %229 = tpu.matmul %221, %228, %cst_100 {dimension_numbers = #tpu.dot_dimension_numbers<[1], [1], [0], [0], [0, 0, 1, 0], [], []>, precision = #tpu.contract_precision<fp32>} : vector<8x32xf32>, vector<8x32xf32>, vector<8x8xf32> -> vector<8x8xf32>
    %cst_101 = arith.constant -1.000000e+30 : f32
    %230 = vector.broadcast %cst_101 : f32 to vector<8x8xf32>
    %231 = arith.select %6, %230, %229 : vector<8x8xi1>, vector<8x8xf32>
    %cst_102 = arith.constant dense<0xFF800000> : vector<8xf32>
    %232 = vector.multi_reduction <maximumf>, %231, %cst_102 [1] : vector<8x8xf32> to vector<8xf32>
    %233 = vector.shape_cast %232 : vector<8xf32> to vector<8x1xf32>
    %234 = vector.broadcast %233 : vector<8x1xf32> to vector<8x8xf32>
    %235 = arith.subf %231, %234 : vector<8x8xf32>
    %236 = math.exp %235 : vector<8x8xf32>
    %cst_103 = arith.constant dense<0.000000e+00> : vector<8xf32>
    %237 = vector.multi_reduction <add>, %236, %cst_103 [1] : vector<8x8xf32> to vector<8xf32>
    %238 = vector.shape_cast %237 : vector<8xf32> to vector<8x1xf32>
    %239 = tpu.reciprocal %238 {approx = true} : vector<8x1xf32> -> vector<8x1xf32>
    %240 = vector.broadcast %239 : vector<8x1xf32> to vector<8x8xf32>
    %241 = arith.mulf %236, %240 : vector<8x8xf32>
    %cst_104 = arith.constant dense<0.000000e+00> : vector<8x32xf32>
    %242 = tpu.matmul %241, %222, %cst_104 {dimension_numbers = #tpu.dot_dimension_numbers<[1], [0], [0], [1], [0, 0, 1, 1], [], []>, precision = #tpu.contract_precision<fp32>} : vector<8x8xf32>, vector<8x32xf32>, vector<8x32xf32> -> vector<8x32xf32>
    %c2_105 = arith.constant 2 : index
    %c0_106 = arith.constant 0 : index
    %c0_107 = arith.constant 0 : index
    %243 = vector.load %arg5[%c2_105, %c0_106, %c0_107] : memref<4x32x32xf32, #tpu.memory_space<vmem>>, vector<1x32x32xf32>
    %244 = vector.shape_cast %243 : vector<1x32x32xf32> to vector<32x32xf32>
    %cst_108 = arith.constant dense<0.000000e+00> : vector<8x32xf32>
    %245 = tpu.matmul %242, %244, %cst_108 {dimension_numbers = #tpu.dot_dimension_numbers<[1], [0], [0], [1], [0, 0, 1, 1], [], []>, precision = #tpu.contract_precision<fp32>} : vector<8x32xf32>, vector<32x32xf32>, vector<8x32xf32> -> vector<8x32xf32>
    %246 = vector.extract_strided_slice %212 {offsets = [1, 0], sizes = [1, 32], strides = [1, 1]} : vector<7x32xf32> to vector<1x32xf32>
    %247 = vector.broadcast %246 : vector<1x32xf32> to vector<8x32xf32>
    %248 = arith.addf %245, %247 : vector<8x32xf32>
    %249 = arith.addf %210, %248 : vector<8x32xf32>
    %250 = vector.extract_strided_slice %212 {offsets = [2, 0], sizes = [1, 32], strides = [1, 1]} : vector<7x32xf32> to vector<1x32xf32>
    %251 = vector.extract_strided_slice %212 {offsets = [3, 0], sizes = [1, 32], strides = [1, 1]} : vector<7x32xf32> to vector<1x32xf32>
    %cst_109 = arith.constant dense<0.000000e+00> : vector<8xf32>
    %252 = vector.multi_reduction <add>, %249, %cst_109 [1] : vector<8x32xf32> to vector<8xf32>
    %253 = vector.shape_cast %252 : vector<8xf32> to vector<8x1xf32>
    %cst_110 = arith.constant 3.200000e+01 : f32
    %254 = vector.broadcast %cst_110 : f32 to vector<8x1xf32>
    %255 = arith.divf %253, %254 : vector<8x1xf32>
    %256 = vector.broadcast %255 : vector<8x1xf32> to vector<8x32xf32>
    %257 = arith.subf %249, %256 : vector<8x32xf32>
    %258 = arith.mulf %257, %257 : vector<8x32xf32>
    %cst_111 = arith.constant dense<0.000000e+00> : vector<8xf32>
    %259 = vector.multi_reduction <add>, %258, %cst_111 [1] : vector<8x32xf32> to vector<8xf32>
    %260 = vector.shape_cast %259 : vector<8xf32> to vector<8x1xf32>
    %cst_112 = arith.constant 3.200000e+01 : f32
    %261 = vector.broadcast %cst_112 : f32 to vector<8x1xf32>
    %262 = arith.divf %260, %261 : vector<8x1xf32>
    %263 = vector.broadcast %255 : vector<8x1xf32> to vector<8x32xf32>
    %264 = arith.subf %249, %263 : vector<8x32xf32>
    %cst_113 = arith.constant 9.99999974E-6 : f32
    %265 = vector.broadcast %cst_113 : f32 to vector<8x1xf32>
    %266 = arith.addf %262, %265 : vector<8x1xf32>
    %267 = math.rsqrt %266 : vector<8x1xf32>
    %268 = vector.broadcast %267 : vector<8x1xf32> to vector<8x32xf32>
    %269 = arith.mulf %264, %268 : vector<8x32xf32>
    %270 = vector.broadcast %250 : vector<1x32xf32> to vector<8x32xf32>
    %271 = arith.mulf %269, %270 : vector<8x32xf32>
    %272 = vector.broadcast %251 : vector<1x32xf32> to vector<8x32xf32>
    %273 = arith.addf %271, %272 : vector<8x32xf32>
    %c2_114 = arith.constant 2 : index
    %c0_115 = arith.constant 0 : index
    %c0_116 = arith.constant 0 : index
    %274 = vector.load %arg6[%c2_114, %c0_115, %c0_116] : memref<4x32x64xf32, #tpu.memory_space<vmem>>, vector<1x32x64xf32>
    %275 = vector.shape_cast %274 : vector<1x32x64xf32> to vector<32x64xf32>
    %cst_117 = arith.constant dense<0.000000e+00> : vector<8x64xf32>
    %276 = tpu.matmul %273, %275, %cst_117 {dimension_numbers = #tpu.dot_dimension_numbers<[1], [0], [0], [1], [0, 0, 1, 1], [], []>, precision = #tpu.contract_precision<fp32>} : vector<8x32xf32>, vector<32x64xf32>, vector<8x64xf32> -> vector<8x64xf32>
    %277 = vector.extract_strided_slice %214 {offsets = [1, 0], sizes = [1, 64], strides = [1, 1]} : vector<2x64xf32> to vector<1x64xf32>
    %278 = vector.broadcast %277 : vector<1x64xf32> to vector<8x64xf32>
    %279 = arith.addf %276, %278 : vector<8x64xf32>
    %cst_118 = arith.constant 0.000000e+00 : f32
    %280 = vector.broadcast %cst_118 : f32 to vector<8x64xf32>
    %281 = arith.maximumf %279, %280 : vector<8x64xf32>
    %c2_119 = arith.constant 2 : index
    %c0_120 = arith.constant 0 : index
    %c0_121 = arith.constant 0 : index
    %282 = vector.load %arg7[%c2_119, %c0_120, %c0_121] : memref<4x64x32xf32, #tpu.memory_space<vmem>>, vector<1x64x32xf32>
    %283 = vector.shape_cast %282 : vector<1x64x32xf32> to vector<64x32xf32>
    %cst_122 = arith.constant dense<0.000000e+00> : vector<8x32xf32>
    %284 = tpu.matmul %281, %283, %cst_122 {dimension_numbers = #tpu.dot_dimension_numbers<[1], [0], [0], [1], [0, 0, 1, 1], [], []>, precision = #tpu.contract_precision<fp32>} : vector<8x64xf32>, vector<64x32xf32>, vector<8x32xf32> -> vector<8x32xf32>
    %285 = vector.extract_strided_slice %212 {offsets = [4, 0], sizes = [1, 32], strides = [1, 1]} : vector<7x32xf32> to vector<1x32xf32>
    %286 = vector.broadcast %285 : vector<1x32xf32> to vector<8x32xf32>
    %287 = arith.addf %284, %286 : vector<8x32xf32>
    %288 = arith.addf %273, %287 : vector<8x32xf32>
    %289 = vector.extract_strided_slice %212 {offsets = [5, 0], sizes = [1, 32], strides = [1, 1]} : vector<7x32xf32> to vector<1x32xf32>
    %290 = vector.extract_strided_slice %212 {offsets = [6, 0], sizes = [1, 32], strides = [1, 1]} : vector<7x32xf32> to vector<1x32xf32>
    %cst_123 = arith.constant dense<0.000000e+00> : vector<8xf32>
    %291 = vector.multi_reduction <add>, %288, %cst_123 [1] : vector<8x32xf32> to vector<8xf32>
    %292 = vector.shape_cast %291 : vector<8xf32> to vector<8x1xf32>
    %cst_124 = arith.constant 3.200000e+01 : f32
    %293 = vector.broadcast %cst_124 : f32 to vector<8x1xf32>
    %294 = arith.divf %292, %293 : vector<8x1xf32>
    %295 = vector.broadcast %294 : vector<8x1xf32> to vector<8x32xf32>
    %296 = arith.subf %288, %295 : vector<8x32xf32>
    %297 = arith.mulf %296, %296 : vector<8x32xf32>
    %cst_125 = arith.constant dense<0.000000e+00> : vector<8xf32>
    %298 = vector.multi_reduction <add>, %297, %cst_125 [1] : vector<8x32xf32> to vector<8xf32>
    %299 = vector.shape_cast %298 : vector<8xf32> to vector<8x1xf32>
    %cst_126 = arith.constant 3.200000e+01 : f32
    %300 = vector.broadcast %cst_126 : f32 to vector<8x1xf32>
    %301 = arith.divf %299, %300 : vector<8x1xf32>
    %302 = vector.broadcast %294 : vector<8x1xf32> to vector<8x32xf32>
    %303 = arith.subf %288, %302 : vector<8x32xf32>
    %cst_127 = arith.constant 9.99999974E-6 : f32
    %304 = vector.broadcast %cst_127 : f32 to vector<8x1xf32>
    %305 = arith.addf %301, %304 : vector<8x1xf32>
    %306 = math.rsqrt %305 : vector<8x1xf32>
    %307 = vector.broadcast %306 : vector<8x1xf32> to vector<8x32xf32>
    %308 = arith.mulf %303, %307 : vector<8x32xf32>
    %309 = vector.broadcast %289 : vector<1x32xf32> to vector<8x32xf32>
    %310 = arith.mulf %308, %309 : vector<8x32xf32>
    %311 = vector.broadcast %290 : vector<1x32xf32> to vector<8x32xf32>
    %312 = arith.addf %310, %311 : vector<8x32xf32>
    %c3 = arith.constant 3 : index
    %c0_128 = arith.constant 0 : index
    %c0_129 = arith.constant 0 : index
    %313 = vector.load %arg8[%c3, %c0_128, %c0_129] : memref<4x7x32xf32, #tpu.memory_space<vmem>>, vector<1x7x32xf32>
    %314 = vector.shape_cast %313 : vector<1x7x32xf32> to vector<7x32xf32>
    %c3_130 = arith.constant 3 : index
    %c0_131 = arith.constant 0 : index
    %c0_132 = arith.constant 0 : index
    %315 = vector.load %arg9[%c3_130, %c0_131, %c0_132] : memref<4x2x64xf32, #tpu.memory_space<vmem>>, vector<1x2x64xf32>
    %316 = vector.shape_cast %315 : vector<1x2x64xf32> to vector<2x64xf32>
    %c3_133 = arith.constant 3 : index
    %c0_134 = arith.constant 0 : index
    %c0_135 = arith.constant 0 : index
    %317 = vector.load %arg3[%c3_133, %c0_134, %c0_135] : memref<4x32x64xf32, #tpu.memory_space<vmem>>, vector<1x32x64xf32>
    %318 = vector.shape_cast %317 : vector<1x32x64xf32> to vector<32x64xf32>
    %cst_136 = arith.constant dense<0.000000e+00> : vector<8x64xf32>
    %319 = tpu.matmul %312, %318, %cst_136 {dimension_numbers = #tpu.dot_dimension_numbers<[1], [0], [0], [1], [0, 0, 1, 1], [], []>, precision = #tpu.contract_precision<fp32>} : vector<8x32xf32>, vector<32x64xf32>, vector<8x64xf32> -> vector<8x64xf32>
    %320 = vector.extract_strided_slice %316 {offsets = [0, 0], sizes = [1, 64], strides = [1, 1]} : vector<2x64xf32> to vector<1x64xf32>
    %321 = vector.broadcast %320 : vector<1x64xf32> to vector<8x64xf32>
    %322 = arith.addf %319, %321 : vector<8x64xf32>
    %323 = vector.extract_strided_slice %322 {offsets = [0, 0], sizes = [8, 32], strides = [1, 1]} : vector<8x64xf32> to vector<8x32xf32>
    %324 = vector.extract_strided_slice %322 {offsets = [0, 32], sizes = [8, 32], strides = [1, 1]} : vector<8x64xf32> to vector<8x32xf32>
    %c3_137 = arith.constant 3 : index
    %c0_138 = arith.constant 0 : index
    %c0_139 = arith.constant 0 : index
    %325 = vector.load %arg4[%c3_137, %c0_138, %c0_139] : memref<4x64x32xf32, #tpu.memory_space<vmem>>, vector<1x64x32xf32>
    %326 = vector.shape_cast %325 : vector<1x64x32xf32> to vector<64x32xf32>
    %cst_140 = arith.constant dense<0.000000e+00> : vector<8x32xf32>
    %327 = tpu.matmul %3, %326, %cst_140 {dimension_numbers = #tpu.dot_dimension_numbers<[1], [0], [0], [1], [0, 0, 1, 1], [], []>, precision = #tpu.contract_precision<fp32>} : vector<8x64xf32>, vector<64x32xf32>, vector<8x32xf32> -> vector<8x32xf32>
    %328 = vector.extract_strided_slice %314 {offsets = [0, 0], sizes = [1, 32], strides = [1, 1]} : vector<7x32xf32> to vector<1x32xf32>
    %329 = vector.broadcast %328 : vector<1x32xf32> to vector<8x32xf32>
    %330 = arith.addf %327, %329 : vector<8x32xf32>
    %cst_141 = arith.constant dense<0.000000e+00> : vector<8x8xf32>
    %331 = tpu.matmul %323, %330, %cst_141 {dimension_numbers = #tpu.dot_dimension_numbers<[1], [1], [0], [0], [0, 0, 1, 0], [], []>, precision = #tpu.contract_precision<fp32>} : vector<8x32xf32>, vector<8x32xf32>, vector<8x8xf32> -> vector<8x8xf32>
    %cst_142 = arith.constant -1.000000e+30 : f32
    %332 = vector.broadcast %cst_142 : f32 to vector<8x8xf32>
    %333 = arith.select %6, %332, %331 : vector<8x8xi1>, vector<8x8xf32>
    %cst_143 = arith.constant dense<0xFF800000> : vector<8xf32>
    %334 = vector.multi_reduction <maximumf>, %333, %cst_143 [1] : vector<8x8xf32> to vector<8xf32>
    %335 = vector.shape_cast %334 : vector<8xf32> to vector<8x1xf32>
    %336 = vector.broadcast %335 : vector<8x1xf32> to vector<8x8xf32>
    %337 = arith.subf %333, %336 : vector<8x8xf32>
    %338 = math.exp %337 : vector<8x8xf32>
    %cst_144 = arith.constant dense<0.000000e+00> : vector<8xf32>
    %339 = vector.multi_reduction <add>, %338, %cst_144 [1] : vector<8x8xf32> to vector<8xf32>
    %340 = vector.shape_cast %339 : vector<8xf32> to vector<8x1xf32>
    %341 = tpu.reciprocal %340 {approx = true} : vector<8x1xf32> -> vector<8x1xf32>
    %342 = vector.broadcast %341 : vector<8x1xf32> to vector<8x8xf32>
    %343 = arith.mulf %338, %342 : vector<8x8xf32>
    %cst_145 = arith.constant dense<0.000000e+00> : vector<8x32xf32>
    %344 = tpu.matmul %343, %324, %cst_145 {dimension_numbers = #tpu.dot_dimension_numbers<[1], [0], [0], [1], [0, 0, 1, 1], [], []>, precision = #tpu.contract_precision<fp32>} : vector<8x8xf32>, vector<8x32xf32>, vector<8x32xf32> -> vector<8x32xf32>
    %c3_146 = arith.constant 3 : index
    %c0_147 = arith.constant 0 : index
    %c0_148 = arith.constant 0 : index
    %345 = vector.load %arg5[%c3_146, %c0_147, %c0_148] : memref<4x32x32xf32, #tpu.memory_space<vmem>>, vector<1x32x32xf32>
    %346 = vector.shape_cast %345 : vector<1x32x32xf32> to vector<32x32xf32>
    %cst_149 = arith.constant dense<0.000000e+00> : vector<8x32xf32>
    %347 = tpu.matmul %344, %346, %cst_149 {dimension_numbers = #tpu.dot_dimension_numbers<[1], [0], [0], [1], [0, 0, 1, 1], [], []>, precision = #tpu.contract_precision<fp32>} : vector<8x32xf32>, vector<32x32xf32>, vector<8x32xf32> -> vector<8x32xf32>
    %348 = vector.extract_strided_slice %314 {offsets = [1, 0], sizes = [1, 32], strides = [1, 1]} : vector<7x32xf32> to vector<1x32xf32>
    %349 = vector.broadcast %348 : vector<1x32xf32> to vector<8x32xf32>
    %350 = arith.addf %347, %349 : vector<8x32xf32>
    %351 = arith.addf %312, %350 : vector<8x32xf32>
    %352 = vector.extract_strided_slice %314 {offsets = [2, 0], sizes = [1, 32], strides = [1, 1]} : vector<7x32xf32> to vector<1x32xf32>
    %353 = vector.extract_strided_slice %314 {offsets = [3, 0], sizes = [1, 32], strides = [1, 1]} : vector<7x32xf32> to vector<1x32xf32>
    %cst_150 = arith.constant dense<0.000000e+00> : vector<8xf32>
    %354 = vector.multi_reduction <add>, %351, %cst_150 [1] : vector<8x32xf32> to vector<8xf32>
    %355 = vector.shape_cast %354 : vector<8xf32> to vector<8x1xf32>
    %cst_151 = arith.constant 3.200000e+01 : f32
    %356 = vector.broadcast %cst_151 : f32 to vector<8x1xf32>
    %357 = arith.divf %355, %356 : vector<8x1xf32>
    %358 = vector.broadcast %357 : vector<8x1xf32> to vector<8x32xf32>
    %359 = arith.subf %351, %358 : vector<8x32xf32>
    %360 = arith.mulf %359, %359 : vector<8x32xf32>
    %cst_152 = arith.constant dense<0.000000e+00> : vector<8xf32>
    %361 = vector.multi_reduction <add>, %360, %cst_152 [1] : vector<8x32xf32> to vector<8xf32>
    %362 = vector.shape_cast %361 : vector<8xf32> to vector<8x1xf32>
    %cst_153 = arith.constant 3.200000e+01 : f32
    %363 = vector.broadcast %cst_153 : f32 to vector<8x1xf32>
    %364 = arith.divf %362, %363 : vector<8x1xf32>
    %365 = vector.broadcast %357 : vector<8x1xf32> to vector<8x32xf32>
    %366 = arith.subf %351, %365 : vector<8x32xf32>
    %cst_154 = arith.constant 9.99999974E-6 : f32
    %367 = vector.broadcast %cst_154 : f32 to vector<8x1xf32>
    %368 = arith.addf %364, %367 : vector<8x1xf32>
    %369 = math.rsqrt %368 : vector<8x1xf32>
    %370 = vector.broadcast %369 : vector<8x1xf32> to vector<8x32xf32>
    %371 = arith.mulf %366, %370 : vector<8x32xf32>
    %372 = vector.broadcast %352 : vector<1x32xf32> to vector<8x32xf32>
    %373 = arith.mulf %371, %372 : vector<8x32xf32>
    %374 = vector.broadcast %353 : vector<1x32xf32> to vector<8x32xf32>
    %375 = arith.addf %373, %374 : vector<8x32xf32>
    %c3_155 = arith.constant 3 : index
    %c0_156 = arith.constant 0 : index
    %c0_157 = arith.constant 0 : index
    %376 = vector.load %arg6[%c3_155, %c0_156, %c0_157] : memref<4x32x64xf32, #tpu.memory_space<vmem>>, vector<1x32x64xf32>
    %377 = vector.shape_cast %376 : vector<1x32x64xf32> to vector<32x64xf32>
    %cst_158 = arith.constant dense<0.000000e+00> : vector<8x64xf32>
    %378 = tpu.matmul %375, %377, %cst_158 {dimension_numbers = #tpu.dot_dimension_numbers<[1], [0], [0], [1], [0, 0, 1, 1], [], []>, precision = #tpu.contract_precision<fp32>} : vector<8x32xf32>, vector<32x64xf32>, vector<8x64xf32> -> vector<8x64xf32>
    %379 = vector.extract_strided_slice %316 {offsets = [1, 0], sizes = [1, 64], strides = [1, 1]} : vector<2x64xf32> to vector<1x64xf32>
    %380 = vector.broadcast %379 : vector<1x64xf32> to vector<8x64xf32>
    %381 = arith.addf %378, %380 : vector<8x64xf32>
    %cst_159 = arith.constant 0.000000e+00 : f32
    %382 = vector.broadcast %cst_159 : f32 to vector<8x64xf32>
    %383 = arith.maximumf %381, %382 : vector<8x64xf32>
    %c3_160 = arith.constant 3 : index
    %c0_161 = arith.constant 0 : index
    %c0_162 = arith.constant 0 : index
    %384 = vector.load %arg7[%c3_160, %c0_161, %c0_162] : memref<4x64x32xf32, #tpu.memory_space<vmem>>, vector<1x64x32xf32>
    %385 = vector.shape_cast %384 : vector<1x64x32xf32> to vector<64x32xf32>
    %cst_163 = arith.constant dense<0.000000e+00> : vector<8x32xf32>
    %386 = tpu.matmul %383, %385, %cst_163 {dimension_numbers = #tpu.dot_dimension_numbers<[1], [0], [0], [1], [0, 0, 1, 1], [], []>, precision = #tpu.contract_precision<fp32>} : vector<8x64xf32>, vector<64x32xf32>, vector<8x32xf32> -> vector<8x32xf32>
    %387 = vector.extract_strided_slice %314 {offsets = [4, 0], sizes = [1, 32], strides = [1, 1]} : vector<7x32xf32> to vector<1x32xf32>
    %388 = vector.broadcast %387 : vector<1x32xf32> to vector<8x32xf32>
    %389 = arith.addf %386, %388 : vector<8x32xf32>
    %390 = arith.addf %375, %389 : vector<8x32xf32>
    %391 = vector.extract_strided_slice %314 {offsets = [5, 0], sizes = [1, 32], strides = [1, 1]} : vector<7x32xf32> to vector<1x32xf32>
    %392 = vector.extract_strided_slice %314 {offsets = [6, 0], sizes = [1, 32], strides = [1, 1]} : vector<7x32xf32> to vector<1x32xf32>
    %cst_164 = arith.constant dense<0.000000e+00> : vector<8xf32>
    %393 = vector.multi_reduction <add>, %390, %cst_164 [1] : vector<8x32xf32> to vector<8xf32>
    %394 = vector.shape_cast %393 : vector<8xf32> to vector<8x1xf32>
    %cst_165 = arith.constant 3.200000e+01 : f32
    %395 = vector.broadcast %cst_165 : f32 to vector<8x1xf32>
    %396 = arith.divf %394, %395 : vector<8x1xf32>
    %397 = vector.broadcast %396 : vector<8x1xf32> to vector<8x32xf32>
    %398 = arith.subf %390, %397 : vector<8x32xf32>
    %399 = arith.mulf %398, %398 : vector<8x32xf32>
    %cst_166 = arith.constant dense<0.000000e+00> : vector<8xf32>
    %400 = vector.multi_reduction <add>, %399, %cst_166 [1] : vector<8x32xf32> to vector<8xf32>
    %401 = vector.shape_cast %400 : vector<8xf32> to vector<8x1xf32>
    %cst_167 = arith.constant 3.200000e+01 : f32
    %402 = vector.broadcast %cst_167 : f32 to vector<8x1xf32>
    %403 = arith.divf %401, %402 : vector<8x1xf32>
    %404 = vector.broadcast %396 : vector<8x1xf32> to vector<8x32xf32>
    %405 = arith.subf %390, %404 : vector<8x32xf32>
    %cst_168 = arith.constant 9.99999974E-6 : f32
    %406 = vector.broadcast %cst_168 : f32 to vector<8x1xf32>
    %407 = arith.addf %403, %406 : vector<8x1xf32>
    %408 = math.rsqrt %407 : vector<8x1xf32>
    %409 = vector.broadcast %408 : vector<8x1xf32> to vector<8x32xf32>
    %410 = arith.mulf %405, %409 : vector<8x32xf32>
    %411 = vector.broadcast %391 : vector<1x32xf32> to vector<8x32xf32>
    %412 = arith.mulf %410, %411 : vector<8x32xf32>
    %413 = vector.broadcast %392 : vector<1x32xf32> to vector<8x32xf32>
    %414 = arith.addf %412, %413 : vector<8x32xf32>
    %c0_169 = arith.constant 0 : index
    %c0_170 = arith.constant 0 : index
    %c0_171 = arith.constant 0 : index
    %415 = vector.load %arg10[%c0_169, %c0_170, %c0_171] : memref<1x8x32xf32, #tpu.memory_space<vmem>>, vector<1x8x32xf32>
    %416 = vector.shape_cast %415 : vector<1x8x32xf32> to vector<8x32xf32>
    %417 = vector.shape_cast %414 : vector<8x32xf32> to vector<1x8x32xf32>
    tpu.vector_store %arg10[%c0_169, %c0_170, %c0_171], %417 {strides = array<i32>} : memref<1x8x32xf32, #tpu.memory_space<vmem>>, vector<1x8x32xf32>,
    return
  }
  func.func @transform_0(%arg0: i32) -> (i32, i32, i32) {
    %c0_i32 = arith.constant 0 : i32
    %c0_i32_0 = arith.constant 0 : i32
    %c0_i32_1 = arith.constant 0 : i32
    return %arg0, %c0_i32, %c0_i32_0 : i32, i32, i32
  }
  func.func @transform_1(%arg0: i32) -> (i32, i32, i32) {
    %c0_i32 = arith.constant 0 : i32
    %c0_i32_0 = arith.constant 0 : i32
    %c0_i32_1 = arith.constant 0 : i32
    return %arg0, %c0_i32, %c0_i32_0 : i32, i32, i32
  }
  func.func @transform_2(%arg0: i32) -> (i32, i32, i32) {
    %c0_i32 = arith.constant 0 : i32
    %c0_i32_0 = arith.constant 0 : i32
    %c0_i32_1 = arith.constant 0 : i32
    %c0_i32_2 = arith.constant 0 : i32
    return %c0_i32, %c0_i32_0, %c0_i32_1 : i32, i32, i32
  }
  func.func @transform_3(%arg0: i32) -> (i32, i32, i32) {
    %c0_i32 = arith.constant 0 : i32
    %c0_i32_0 = arith.constant 0 : i32
    %c0_i32_1 = arith.constant 0 : i32
    %c0_i32_2 = arith.constant 0 : i32
    return %c0_i32, %c0_i32_0, %c0_i32_1 : i32, i32, i32
  }
  func.func @transform_4(%arg0: i32) -> (i32, i32, i32) {
    %c0_i32 = arith.constant 0 : i32
    %c0_i32_0 = arith.constant 0 : i32
    %c0_i32_1 = arith.constant 0 : i32
    %c0_i32_2 = arith.constant 0 : i32
    return %c0_i32, %c0_i32_0, %c0_i32_1 : i32, i32, i32
  }
  func.func @transform_5(%arg0: i32) -> (i32, i32, i32) {
    %c0_i32 = arith.constant 0 : i32
    %c0_i32_0 = arith.constant 0 : i32
    %c0_i32_1 = arith.constant 0 : i32
    %c0_i32_2 = arith.constant 0 : i32
    return %c0_i32, %c0_i32_0, %c0_i32_1 : i32, i32, i32
  }
  func.func @transform_6(%arg0: i32) -> (i32, i32, i32) {
    %c0_i32 = arith.constant 0 : i32
    %c0_i32_0 = arith.constant 0 : i32
    %c0_i32_1 = arith.constant 0 : i32
    %c0_i32_2 = arith.constant 0 : i32
    return %c0_i32, %c0_i32_0, %c0_i32_1 : i32, i32, i32
  }
  func.func @transform_7(%arg0: i32) -> (i32, i32, i32) {
    %c0_i32 = arith.constant 0 : i32
    %c0_i32_0 = arith.constant 0 : i32
    %c0_i32_1 = arith.constant 0 : i32
    %c0_i32_2 = arith.constant 0 : i32
    return %c0_i32, %c0_i32_0, %c0_i32_1 : i32, i32, i32
  }
  func.func @transform_8(%arg0: i32) -> (i32, i32, i32) {
    %c0_i32 = arith.constant 0 : i32
    %c0_i32_0 = arith.constant 0 : i32
    %c0_i32_1 = arith.constant 0 : i32
    %c0_i32_2 = arith.constant 0 : i32
    return %c0_i32, %c0_i32_0, %c0_i32_1 : i32, i32, i32
  }
  func.func @transform_9(%arg0: i32) -> (i32, i32, i32) {
    %c0_i32 = arith.constant 0 : i32
    %c0_i32_0 = arith.constant 0 : i32
    %c0_i32_1 = arith.constant 0 : i32
    return %arg0, %c0_i32, %c0_i32_0 : i32, i32, i32
  }
}

</mosaic_0001>

<bundles_post_ra>
// kernel: tpu_custom_call.1
= control target key start
LH: loop header
LB: loop body
LE: loop exit
PB: predicated region body
PF: predicated region fallthrough
CT: control target
= control target key end

     0   :  { %14 = vsyncpa [#allocation3], 0  ;;  %s21263_s0 = inlined_call_operand.vmem [shape: f32[2,8,32], index: 0, kind: input, shape index: {}]   ;;  %s21264_s1 = inlined_call_operand.vmem [shape: f32[2,8,64], index: 1, kind: input, shape index: {}]   ;;  %s21265_s2 = inlined_call_operand.vmem [shape: f32[4,32,64], index: 2, kind: input, shape index: {}]   ;;  %s21266_s3 = inlined_call_operand.vmem [shape: f32[4,64,32], index: 3, kind: input, shape index: {}]   ;;  %s21267_s4 = inlined_call_operand.vmem [shape: f32[4,32,32], index: 4, kind: input, shape index: {}]   ;;  %s21268_s5 = inlined_call_operand.vmem [shape: f32[4,32,64], index: 5, kind: input, shape index: {}]   ;;  %s21269_s6 = inlined_call_operand.vmem [shape: f32[4,64,32], index: 6, kind: input, shape index: {}]   ;;  %s21270_s7 = inlined_call_operand.vmem [shape: f32[4,7,32], index: 7, kind: input, shape index: {}]   ;;  %s21271_s8 = inlined_call_operand.vmem [shape: f32[4,2,64], index: 8, kind: input, shape index: {}]   ;;  %s21272_s9 = inlined_call_operand.hbm [shape: f32[2,8,32], index: 9, kind: output, shape index: {}]  }
   0x1   :  { %16 = vsyncpa [#allocation3 + $0x1], 0  ;;  %s19039_s30 = smov 0   ;;  %s19041_s10 = smov 0  }
   0x2   :  { %s19043_s11 = smov 0   ;;  %s19045_s12 = smov 0  }
   0x3 LB: > { %s19060_s13 = sadd.s32 4294967295, %s18982_s12   ;;  %s14690_s14 = sadd.s32 4294967294, %s18982_s12   ;;  %s18982_s12 = sphi %s19045_s12, %s21278_s12   ;;  %s18978_s11 = sphi %s19043_s11, %s21277_s11   ;;  %s18974_s10 = sphi %s19041_s10, %s21276_s10   ;;  %s18970_s30 = sphi %s19039_s30, %s21275_s30  }
   0x4   : > { %s19064_s15 = sadd.s32 1, %s18982_s12   ;;  %s228_s16 = sadd.s32 1, %s18978_s11 }
   0x5   : > { %s225_s17 = ssub.s32 %s18982_s12, %s19064_s15  ;;  %p238_p0 = scmp.ne.s32.totalorder %s18978_s11, %s18974_s10 }
   0x6   : > { %p226_p1 = scmp.eq.s32.totalorder %s225_s17, 0  ;;  %p239_p2 = scmp.eq.s32.totalorder %s19060_s13, 1 }
   0x7   : > { %p244_p3 = scmp.ne.s32.totalorder %s18974_s10, %s18970_s30  ;;  %p245_p4 = scmp.eq.s32.totalorder %s14690_s14, 1 }
   0x8   : > { %s19075_s18 = scalar_select %p226_p1, %s18978_s11, %s228_s16  }
   0x9   : > { %p19077_p5 = por %p239_p2, %p238_p0  ;;  %p19081_p6 = por %p245_p4, %p244_p3 }
   0xa   : > { %p14693_p7 = scmp.ge.s32.totalorder %s18982_s12, 1  ;;  %p298_p8 = scmp.lt.s32.totalorder %s18982_s12, 3 }
   0xc   : > { %p299_p9 = pnand %p14693_p7, %p298_p8 }
   0xd   : > { %v354_v0 = vld [vmem:[%s21265_s2] sm:$0xff] (!%p299_p9)  ;;  %v355_v1 = vld [vmem:[%s21265_s2 + $0x8] sm:$0xff] (!%p299_p9)  ;;  %v356_v2 = vld [vmem:[%s21265_s2 + $0x10] sm:$0xff] (!%p299_p9)  ;;  %v18984_v3 = vmov (!%p299_p9), 0.0|0.0   ;;  %p337_p10 = scmp.lt.s32.totalorder (!%p299_p9), %s19060_s13, 1  ;;  %vm18985_vm0 = vmmov (!%p299_p9), 0  }
   0xe   : > { %302 = sbr.rel (%p299_p9) target bundleno = 10193 (0x27d1), region = 56  ;;  %17623 = vmatprep.subr.bf16.mxu1 (!%p299_p9), %v18984_v3  ;;  %v367_v4 = vand.u32 (!%p299_p9), 4294901760, %v354_v0  ;;  %v370_v5 = vand.u32 (!%p299_p9), 4294901760, %v355_v1  ;;  %17629 = vmatprep.subr.bf16.mxu0 (!%p299_p9), %v18984_v3  ;;  %v357_v6 = vld [vmem:[%s21265_s2 + $0x18] sm:$0xff] (!%p299_p9)  ;;  %v373_v7 = vand.u32 (!%p299_p9), 4294901760, %v356_v2  ;;  %v18986_v9 = vmov (!%p299_p9), 0.0  }
   0xf   : > { %v376_v8 = vand.u32 (!%p299_p9), 4294901760, %v357_v6  ;;  %15687 = vmatprep.mubr.msk.f32.mxu1 (!%p299_p9), %vm18985_vm0, %v18986_v9  ;;  %15698 = vmatprep.mubr.msk.f32.mxu0 (!%p299_p9), %vm18985_vm0, %v18986_v9  ;;  %vm362_vm1 = vcmask (!%p299_p9), 261120   ;;  %vm863_vm2 = vcmask (!%p299_p9), 523264   ;;  %v851_v26 = vld [vmem:[%s21266_s3] sm:$0xff] (!%p299_p9)  ;;  %v852_v32 = vld [vmem:[%s21266_s3 + $0x8] sm:$0xff] (!%p299_p9)  ;;  %v853_v41 = vld [vmem:[%s21266_s3 + $0x10] sm:$0xff] (!%p299_p9) }
  0x10   : > { %v19106_v10 = vpack.c.bf16 (!%p299_p9), %v370_v5, %v367_v4  ;;  %v19108_v11 = vsub.f32 (!%p299_p9), %v354_v0, %v367_v4  ;;  %v19110_v12 = vsub.f32 (!%p299_p9), %v355_v1, %v370_v5  ;;  %v19112_v13 = vsub.f32 (!%p299_p9), %v356_v2, %v373_v7  ;;  %v854_v42 = vld [vmem:[%s21266_s3 + $0x18] sm:$0xff] (!%p299_p9)  ;;  %v855_v50 = vld [vmem:[%s21266_s3 + $0x20] sm:$0xff] (!%p299_p9)  ;;  %v856_v51 = vld [vmem:[%s21266_s3 + $0x28] sm:$0xff] (!%p299_p9)  ;;  %s18987_s16 = smov (!%p299_p9), 96   ;;  %s334_s28 = sand.u32 (!%p299_p9), 1, %s18974_s10  }
  0x11   : > { %v19115_v14 = vsub.f32 (!%p299_p9), %v357_v6, %v376_v8  ;;  %v19120_v17 = vpack.c.bf16 (!%p299_p9), %v376_v8, %v373_v7  ;;  %v868_v37 = vand.u32 (!%p299_p9), 4294901760, %v851_v26  ;;  %v871_v38 = vand.u32 (!%p299_p9), 4294901760, %v852_v32  ;;  %v857_v57 = vld [vmem:[%s21266_s3 + $0x30] sm:$0xff] (!%p299_p9)  ;;  %v858_v58 = vld [vmem:[%s21266_s3 + $0x38] sm:$0xff] (!%p299_p9) }
  0x12   : > { %17625 = vmatpush3.bf16.msra.mxu1 (!%p299_p9), %v19106_v10  ;;  %v448_v15 = vand.u32 (!%p299_p9), 4294901760, %v19108_v11  ;;  %v455_v16 = vand.u32 (!%p299_p9), 4294901760, %v19110_v12  ;;  %v462_v18 = vand.u32 (!%p299_p9), 4294901760, %v19112_v13  ;;  %v874_v48 = vand.u32 (!%p299_p9), 4294901760, %v853_v41 }
  0x13   : > { %17626 = vmatprep.subr.bf16.mxu1 (!%p299_p9), %v18984_v3  ;;  %v469_v19 = vand.u32 (!%p299_p9), 4294901760, %v19115_v14  ;;  %v19174_v45 = vsub.f32 (!%p299_p9), %v851_v26, %v868_v37  ;;  %v19176_v46 = vpack.c.bf16 (!%p299_p9), %v871_v38, %v868_v37  ;;  %v19178_v47 = vsub.f32 (!%p299_p9), %v852_v32, %v871_v38 }
  0x14   : > { %v449_v20 = vsub.f32 (!%p299_p9), %v19108_v11, %v448_v15  ;;  %v456_v21 = vsub.f32 (!%p299_p9), %v19110_v12, %v455_v16  ;;  %v463_v22 = vsub.f32 (!%p299_p9), %v19112_v13, %v462_v18  ;;  %v877_v49 = vand.u32 (!%p299_p9), 4294901760, %v854_v42 }
  0x15   : > { %s338_s29 = scalar_select %p337_p10, %s19060_s13, 1  ;;  %v470_v24 = vsub.f32 %v19115_v14, %v469_v19  ;;  %v17636_v53 = vpack.c.bf16 %v19110_v12, %v19108_v11  ;;  %v880_v55 = vand.u32 4294901760, %v855_v50  ;;  %v883_v56 = vand.u32 4294901760, %v856_v51 }
  0x16   : > { %v450_v27 = vand.u32 4294901760, %v449_v20  ;;  %v457_v28 = vand.u32 4294901760, %v456_v21  ;;  %17628 = vmatpush3.bf16.msra.mxu1 %v19120_v17  ;;  %v464_v29 = vand.u32 4294901760, %v463_v22  ;;  %v953_v59 = vand.u32 4294901760, %v19174_v45 }
  0x17   : > { %s14695_s14 = sshll.u32 %s338_s29, 3  ;;  %v471_v33 = vand.u32 4294901760, %v470_v24  ;;  %17659 = vmatprep.subr.bf16.mxu1 %v18984_v3  ;;  %v19201_v60 = vpack.c.bf16 %v877_v49, %v874_v48  ;;  %v19203_v61 = vsub.f32 %v853_v41, %v874_v48  ;;  %v19205_v62 = vsub.f32 %v854_v42, %v877_v49  ;;  %s14694_s29 = sshll.u32 %s334_s28, 3 }
  0x18   : > { %s340_s21 = scalar_lea.vmem %s21263_s0, %s14695_s14  ;;  %s344_s24 = scalar_lea.vmem %s21264_s1, %s14695_s14  ;;  %v17630_v34 = vpack.c.bf16 %v457_v28, %v450_v27  ;;  %v960_v63 = vand.u32 4294901760, %v19178_v47  ;;  %v17639_v0 = vpack.c.bf16 %v19115_v14, %v19112_v13  ;;  %v886_v1 = vand.u32 4294901760, %v857_v57 }
  0x19   : > { %v19140_v23 = vld [vmem:[%s340_s21] sm:$0xff]  ;;  %v17633_v39 = vpack.c.bf16 %v471_v33, %v464_v29  ;;  %v889_v2 = vand.u32 4294901760, %v858_v58  ;;  %v19214_v4 = vpack.c.bf16 %v883_v56, %v880_v55  ;;  %v19216_v5 = vsub.f32 %v855_v50, %v880_v55  ;;  %s14788_s14 = sshll.u32 %s19060_s13, 7  ;;  %s336_s17 = scalar_lea.vmem [#allocation2], %s14694_s29 }
  0x1a   : > { %v364_v25 = vsel %vm362_vm1, %v19140_v23, 0  ;;  %v346_v30 = vld [vmem:[%s344_s24] sm:$0xff]  ;;  %17631 = vmatpush3.bf16.msra.mxu0 %v17630_v34  ;;  %v954_v7 = vsub.f32 %v19174_v45, %v953_v59  ;;  %v19227_v8 = vsub.f32 %v856_v51, %v883_v56  ;;  %v961_v20 = vsub.f32 %v19178_v47, %v960_v63  ;;  %s14619_s21 = sshll.u32 %s336_s17, 4  ;;  %s21220_s24 = scalar_lea.hbm %s21272_s9, %s14788_s14  ;;  %s21222_s21 = int_to_ptr.vmem [resolvable:$true] %s14619_s21 }
  0x1b   : > { %v19151_v31 = vand.u32 4294901760, %v364_v25  ;;  %v865_v36 = vsel %vm863_vm2, %v346_v30, 0  ;;  %17632 = vmatprep.subr.bf16.mxu0 %v18984_v3  ;;  %v967_v21 = vand.u32 4294901760, %v19203_v61  ;;  %v974_v22 = vand.u32 4294901760, %v19205_v62  ;;  %s18920_s25 = scalar_lea.vmem %s21222_s21, 128  ;;  %s18988_s13 = smov [#allocation2]  }
  0x1c   : > { %v19172_v44 = vand.u32 4294901760, %v865_v36  ;;  %v19236_v24 = vpack.c.bf16 %v889_v2, %v886_v1  ;;  %v19240_v26 = vsub.f32 %v858_v58, %v889_v2  ;;  %v955_v28 = vand.u32 4294901760, %v954_v7  ;;  %v19381_v58 = vld [vmem:[%s21271_s8] sm:$0x3]  ;;  %p18921_p11 = scmp.ne.s32.totalorder %s21222_s21, %s18920_s25  ;;  %s18924_s26 = sshll.u32 %s18988_s13, 4  ;;  %s18925_s26 = int_to_ptr.vmem [resolvable:$false] %s18924_s26 }
  0x1d   : > { %v19158_v35 = vsub.f32 %v364_v25, %v19151_v31  ;;  %v19238_v25 = vsub.f32 %v857_v57, %v886_v1  ;;  %v981_v29 = vand.u32 4294901760, %v19216_v5  ;;  %v962_v30 = vand.u32 4294901760, %v961_v20  ;;  %v19390_v2 = vld [vmem:[%s21270_s7] sm:$0x7f]  ;;  %s18926_s27 = scalar_lea.vmem %s18925_s26, 256  ;;  %p18927_p0 = scmp.lt.s32.totalorder %s21222_s21, %s18925_s26 }
  0x1e   : > { %17634 = vmatpush3.bf16.msra.mxu0 %v17633_v39  ;;  %v19190_v54 = vsub.f32 %v865_v36, %v19172_v44  ;;  %v968_v32 = vsub.f32 %v19203_v61, %v967_v21  ;;  %v975_v33 = vsub.f32 %v19205_v62, %v974_v22  ;;  %v988_v34 = vand.u32 4294901760, %v19227_v8  ;;  %p18922_p12 = pnand %p18921_p11, %p19077_p5  ;;  %p18928_p1 = scmp.lt.s32.totalorder %s18926_s27, %s18920_s25 }
  0x1f   : > { %v437_v40 = vand.u32 4294901760, %v19158_v35  ;;  %17635 = vmatprep.subr.bf16.mxu0 %v18984_v3  ;;  %v982_v37 = vsub.f32 %v19216_v5, %v981_v29  ;;  %v995_v38 = vand.u32 4294901760, %v19238_v25  ;;  %v1002_v39 = vand.u32 4294901760, %v19240_v26 }
  0x20   : > { %v19221_v6 = vand.u32 4294901760, %v19190_v54  ;;  %v17672_v41 = vpack.c.bf16 %v962_v30, %v955_v28  ;;  %v969_v42 = vand.u32 4294901760, %v968_v32  ;;  %v989_v48 = vsub.f32 %v19227_v8, %v988_v34  ;;  %p18923_p13 = pneg %p18922_p12  ;;  %p18929_p2 = por %p18928_p1, %p18927_p0 }
  0x21   : > { %v438_v43 = vsub.f32 %v19158_v35, %v437_v40  ;;  %15699 = vmatmul.mubr.f32.vlgmr.msra.gmra.mrb[0].mxu0 %v19151_v31  ;;  %v17648_v49 = vpack.c.bf16 %v455_v16, %v448_v15  ;;  %v996_v50 = vsub.f32 %v19238_v25, %v995_v38  ;;  %v1003_v11 = vsub.f32 %v19240_v26, %v1002_v39 }
  0x22   : > { %17637 = vmatpush3.bf16.msra.mxu0 %v17636_v53  ;;  %15709 = vmatprep.mubr.msk.f32.mxu0 %vm18985_vm0, %v18986_v9  ;;  %v943_v27 = vsub.f32 %v19190_v54, %v19221_v6  ;;  %v990_v53 = vand.u32 4294901760, %v989_v48  ;;  %v17651_v12 = vpack.c.bf16 %v469_v19, %v462_v18  ;;  %v17684_v14 = vpack.c.bf16 %v19178_v47, %v19174_v45  ;;  %p18930_p3 = pnand %p18929_p2, %p18923_p13 }
  0x23   : > { %v439_v52 = vand.u32 4294901760, %v438_v43  ;;  %17638 = vmatprep.subr.bf16.mxu0 %v18984_v3  ;;  %v976_v43 = vand.u32 4294901760, %v975_v33  ;;  %v997_v16 = vand.u32 4294901760, %v996_v50  ;;  %v17693_v18 = vpack.c.bf16 %v19240_v26, %v19238_v25 }
  0x24   : > { %v19259_v36 = vand.u32 4294901760, %v943_v27  ;;  %v17708_v19 = vpack.c.bf16 %v960_v63, %v953_v59  ;;  %v17717_v45 = vpack.c.bf16 %v1002_v39, %v995_v38  ;;  %v347_v55 = vlaneseq }
  0x25   : > { %15688 = vmatmul.mubr.f32.vlgmr.msra.gmra.mrb[0].mxu1 %v439_v52  ;;  %v17675_v51 = vpack.c.bf16 %v976_v43, %v969_v42  ;;  %v983_v52 = vand.u32 4294901760, %v982_v37  ;;  %vm1857_vm4 = vcmask 64512  }
  0x26   : > { %17661 = vmatpush3.bf16.msra.mxu1 %v19176_v46  ;;  %15761 = vmatprep.mubr.msk.f32.mxu1 %vm18985_vm0, %v18986_v9  ;;  %v19373_v56 = vshrl.u32 %v347_v55, 7 }
  0x27   : > { %17662 = vmatprep.subr.bf16.mxu1 %v18984_v3  ;;  %17640 = vmatpush3.bf16.msra.mxu0 %v17639_v0  ;;  %v17678_v15 = vpack.c.bf16 %v990_v53, %v983_v52  ;;  %v19434_v52 = vld [vmem:[%s21267_s4 + $0x8] sm:$0xff] }
  0x28   : > { %17641 = vmatprep.subr.bf16.mxu0 %v18984_v3  ;;  %v19376_v57 = vsub.s32 0, %v19373_v56 }
  0x2a   : > { %17664 = vmatpush3.bf16.msra.mxu1 %v19201_v60  ;;  %15710 = vmatmul.mubr.f32.vlgmr.msra.gmra.mrb[0].mxu0 %v19158_v35  ;;  %v1004_v35 = vand.u32 4294901760, %v1003_v11  ;;  %v361_v59 = vrot.slane %v19381_v58, %v19376_v57  ;;  %v2336_v11 = vand.u32 4294901760, %v19434_v52 }
  0x2b   : > { %17665 = vmatprep.subr.bf16.mxu1 %v18984_v3  ;;  %17643 = vmatpush3.bf16.msra.mxu0 %v19106_v10 }
  0x2c   : > { %17644 = vmatprep.subr.bf16.mxu0 %v18984_v3  ;;  %15720 = vmatprep.mubr.msk.f32.mxu0 %vm18985_vm0, %v18986_v9  ;;  %v17681_v13 = vpack.c.bf16 %v1004_v35, %v997_v16 }
  0x2e   : > { %17667 = vmatpush3.bf16.msra.mxu1 %v19214_v4 }
  0x2f   : > { %17668 = vmatprep.subr.bf16.mxu1 %v18984_v3  ;;  %17646 = vmatpush3.bf16.msra.mxu0 %v19120_v17 }
  0x30   : > { %17647 = vmatprep.subr.bf16.mxu0 %v18984_v3 }
  0x32   : > { %17670 = vmatpush3.bf16.msra.mxu1 %v19236_v24  ;;  %15721 = vmatmul.mubr.f32.vlgmr.msra.gmra.mrb[0].mxu0 %v437_v40  ;;  %v17714_v40 = vpack.c.bf16 %v988_v34, %v981_v29  ;;  %v19417_v34 = vand.u32 127, %v347_v55 }
  0x33   : > { %17671 = vmatprep.subr.bf16.mxu1 %v18984_v3  ;;  %17649 = vmatpush3.bf16.msra.mxu0 %v17648_v49 }
  0x34   : > { %17650 = vmatprep.subr.bf16.mxu0 %v18984_v3  ;;  %15731 = vmatprep.mubr.msk.f32.mxu0 %vm18985_vm0, %v18986_v9  ;;  %vm351_vm3 = vcmp.gt.s32.totalorder %v19417_v34, %v19373_v56 }
  0x35   : > { %15762 = vmatmul.mubr.f32.vlgmr.msra.gmra.mrb[2].mxu1 %v19259_v36 }
  0x36   : > { %17673 = vmatpush3.bf16.msra.mxu1 %v17672_v41  ;;  %15780 = vmatprep.mubr.msk.f32.mxu1 %vm18985_vm0, %v18986_v9 }
  0x37   : > { %17674 = vmatprep.subr.bf16.mxu1 %v18984_v3  ;;  %17652 = vmatpush3.bf16.msra.mxu0 %v17651_v12 }
  0x38   : > { %17653 = vmatprep.subr.bf16.mxu0 %v18984_v3 }
  0x3a   : > { %17676 = vmatpush3.bf16.msra.mxu1 %v17675_v51  ;;  %15732 = vmatmul.mubr.f32.vlgmr.msra.gmra.mrb[0].mxu0 %v19151_v31  ;;  %v19429_v51 = vld [vmem:[%s21267_s4] sm:$0xff] }
  0x3b   : > { %17677 = vmatprep.subr.bf16.mxu1 %v18984_v3  ;;  %17655 = vmatpush3.bf16.msra.mxu0 %v19106_v10  ;;  %v17687_v10 = vpack.c.bf16 %v19205_v62, %v19203_v61  ;;  %v2333_v53 = vand.u32 4294901760, %v19429_v51 }
  0x3c   : > { %17656 = vmatprep.subr.bf16.mxu0 %v18984_v3  ;;  %15742 = vmatprep.mubr.msk.f32.mxu0 %vm18985_vm0, %v18986_v9 }
  0x3d   : > { %v19441_v12 = vsub.f32 %v19429_v51, %v2333_v53 }
  0x3e   : > { %17679 = vmatpush3.bf16.msra.mxu1 %v17678_v15  ;;  %v19446_v15 = vsub.f32 %v19434_v52, %v2336_v11 }
  0x3f   : > { %17680 = vmatprep.subr.bf16.mxu1 %v18984_v3  ;;  %17658 = vmatpush3.bf16.msra.mxu0 %v19120_v17  ;;  %v17690_v17 = vpack.c.bf16 %v19227_v8, %v19216_v5  ;;  %v862_v5 = vrot.slane %v19390_v2, %v19376_v57  ;;  %v2414_v16 = vand.u32 4294901760, %v19441_v12 }
  0x40   : > { %15859 = vmatprep.subr.mxu0 %v18986_v9  ;;  %v2421_v35 = vand.u32 4294901760, %v19446_v15 }
  0x42   : > { %17682 = vmatpush3.bf16.msra.mxu1 %v17681_v13  ;;  %15743 = vmatmul.mubr.f32.vlgmr.msra.gmra.mrb[0].mxu0 %v19151_v31  ;;  %v17711_v31 = vpack.c.bf16 %v974_v22, %v967_v21  ;;  %v2415_v13 = vsub.f32 %v19441_v12, %v2414_v16  ;;  %v17756_v51 = vpack.c.bf16 %v2421_v35, %v2414_v16 }
  0x43   : > { %17683 = vmatprep.subr.bf16.mxu1 %v18984_v3  ;;  %15861 = vmatprep.mubr.msk.f32.mxu0 %vm18985_vm0, %v18986_v9 }
  0x45   : > { %15781 = vmatmul.mubr.f32.vlgmr.msra.gmra.mrb[2].mxu1 %v19172_v44 }
  0x46   : > { %17685 = vmatpush3.bf16.msra.mxu1 %v17684_v14  ;;  %15799 = vmatprep.mubr.msk.f32.mxu1 %vm18985_vm0, %v18986_v9  ;;  %v2422_v14 = vsub.f32 %v19446_v15, %v2421_v35 }
  0x47   : > { %17686 = vmatprep.subr.bf16.mxu1 %v18984_v3 }
  0x4a   : > { %17688 = vmatpush3.bf16.msra.mxu1 %v17687_v10  ;;  %v2416_v10 = vand.u32 4294901760, %v2415_v13 }
  0x4b   : > { %17689 = vmatprep.subr.bf16.mxu1 %v18984_v3 }
  0x4e   : > { %17691 = vmatpush3.bf16.msra.mxu1 %v17690_v17  ;;  %v2423_v17 = vand.u32 4294901760, %v2422_v14 }
  0x4f   : > { %17692 = vmatprep.subr.bf16.mxu1 %v18984_v3 }
  0x52   : > { %17694 = vmatpush3.bf16.msra.mxu1 %v17693_v18  ;;  %v17738_v18 = vpack.c.bf16 %v2423_v17, %v2416_v10 }
  0x53   : > { %17695 = vmatprep.subr.bf16.mxu1 %v18984_v3 }
  0x55   : > { %15800 = vmatmul.mubr.f32.vlgmr.msra.gmra.mrb[2].mxu1 %v19190_v54 }
  0x56   : > { %17697 = vmatpush3.bf16.msra.mxu1 %v19176_v46  ;;  %15818 = vmatprep.mubr.msk.f32.mxu1 %vm18985_vm0, %v18986_v9 }
  0x57   : > { %17698 = vmatprep.subr.bf16.mxu1 %v18984_v3 }
  0x5a   : > { %17700 = vmatpush3.bf16.msra.mxu1 %v19201_v60 }
  0x5b   : > { %17701 = vmatprep.subr.bf16.mxu1 %v18984_v3 }
  0x5e   : > { %17703 = vmatpush3.bf16.msra.mxu1 %v19214_v4 }
  0x5f   : > { %17704 = vmatprep.subr.bf16.mxu1 %v18984_v3 }
  0x62   : > { %17706 = vmatpush3.bf16.msra.mxu1 %v19236_v24 }
  0x63   : > { %17707 = vmatprep.subr.bf16.mxu1 %v18984_v3 }
  0x65   : > { %15819 = vmatmul.mubr.f32.vlgmr.msra.gmra.mrb[2].mxu1 %v19221_v6 }
  0x66   : > { %17709 = vmatpush3.bf16.msra.mxu1 %v17708_v19  ;;  %15837 = vmatprep.mubr.msk.f32.mxu1 %vm18985_vm0, %v18986_v9 }
  0x67   : > { %17710 = vmatprep.subr.bf16.mxu1 %v18984_v3 }
  0x6a   : > { %17712 = vmatpush3.bf16.msra.mxu1 %v17711_v31 }
  0x6b   : > { %17713 = vmatprep.subr.bf16.mxu1 %v18984_v3 }
  0x6e   : > { %17715 = vmatpush3.bf16.msra.mxu1 %v17714_v40 }
  0x6f   : > { %17716 = vmatprep.subr.bf16.mxu1 %v18984_v3 }
  0x72   : > { %17718 = vmatpush3.bf16.msra.mxu1 %v17717_v45 }
  0x73   : > { %17719 = vmatprep.subr.bf16.mxu1 %v18984_v3 }
  0x75   : > { %15838 = vmatmul.mubr.f32.vlgmr.msra.gmra.mrb[2].mxu1 %v19172_v44 }
  0x76   : > { %17721 = vmatpush3.bf16.msra.mxu1 %v19176_v46  ;;  %15856 = vmatprep.mubr.msk.f32.mxu1 %vm18985_vm0, %v18986_v9 }
  0x77   : > { %17722 = vmatprep.subr.bf16.mxu1 %v18984_v3 }
  0x7a   : > { %17724 = vmatpush3.bf16.msra.mxu1 %v19201_v60 }
  0x7b   : > { %17725 = vmatprep.subr.bf16.mxu1 %v18984_v3 }
  0x7e   : > { %17727 = vmatpush3.bf16.msra.mxu1 %v19214_v4 }
  0x7f   : > { %17728 = vmatprep.subr.bf16.mxu1 %v18984_v3 }
  0x82   : > { %17730 = vmatpush3.bf16.msra.mxu1 %v19236_v24 }
  0x83   : > { %17737 = vmatprep.subr.bf16.mxu1 %v18984_v3 }
  0x85   : > { %15857 = vmatmul.mubr.f32.vlgmr.msra.gmra.mrb[2].mxu1 %v19172_v44 }
  0x86   : > { %15938 = vmatprep.mubr.msk.f32.mxu1 %vm18985_vm0, %v18986_v9  ;;  %17739 = vmatpush3.bf16.msra.mxu1 %v17738_v18 }
  0x87   : > { %17740 = vmatprep.subr.bf16.mxu1 %v18984_v3 }
  0xf8   : > { %v441_v46 = vpop.f32.mrb[0].mxu1 }
  0xf9   : > { %v15689_v47 = vpop.f32.mrb[1].mxu1  ;;  %v442_v60 = vadd.f32 %v441_v46, %v361_v59 }
 0x115   : > { %v847_v61 = vpop.f32.mrb[0].mxu0 }
 0x116   : > { %v18632_v62 = vadd.f32 %v847_v61, %v442_v60  ;;  %v15744_v63 = vpop.f32.mrb[1].mxu0 }
 0x118   : > { %1869 = vrot.lane.b32.xlu1 %v18632_v62, %s18987_s16  ;;  %v1405_v0 = vsel %vm362_vm1, %v18632_v62, 0 }
 0x119   : > { %v1476_v1 = vand.u32 4294901760, %v1405_v0 }
 0x11b   : > { %v1477_v4 = vsub.f32 %v1405_v0, %v1476_v1 }
 0x11d   : > { %v1478_v7 = vand.u32 4294901760, %v1477_v4 }
 0x11f   : > { %v1479_v24 = vsub.f32 %v1477_v4, %v1478_v7 }
 0x121   : > { %v1480_v27 = vand.u32 4294901760, %v1479_v24 }
 0x158   : > { %v1400_v8 = vpop.f32.mrb[2].mxu1 }
 0x159   : > { %v18633_v20 = vadd.f32 %v1400_v8, %v862_v5  ;;  %v15858_v21 = vpop.f32.mrb[3].mxu1 }
 0x15b   : > { %v1408_v22 = vsel %vm362_vm1, %v18633_v20, 0 }
 0x15c   : > { %v1411_v25 = vand.u32 4294901760, %v1408_v22 }
 0x15e   : > { %v1488_v26 = vsub.f32 %v1408_v22, %v1411_v25  ;;  %15860 = vmatpush3.xpose.msra.mxu0 %v1411_v25 }
 0x15f   : > { %15864 = vmatprep.subr.mxu0 %v18986_v9 }
 0x160   : > { %v1489_v28 = vand.u32 4294901760, %v1488_v26 }
 0x161   : > { %15862 = vmatmul.mubr.f32.vlgmr.msra.gmra.mrb[2].mxu0 %v1480_v27 }
 0x162   : > { %v1490_v29 = vsub.f32 %v1488_v26, %v1489_v28  ;;  %15866 = vmatprep.mubr.msk.f32.mxu0 %vm18985_vm0, %v18986_v9 }
 0x164   : > { %v1491_v30 = vand.u32 4294901760, %v1490_v29  ;;  %v17732_v29 = vpack.c.bf16 %v2336_v11, %v2333_v53  ;;  %v19519_v11 = vsub.s32 1, %v19373_v56 }
 0x166   : > { %15865 = vmatpush3.xpose.msra.mxu0 %v1491_v30 }
 0x167   : > { %15869 = vmatprep.subr.mxu0 %v18986_v9 }
 0x169   : > { %15867 = vmatmul.mubr.f32.vlgmr.msra.gmra.mrb[2].mxu0 %v1476_v1 }
 0x16a   : > { %15870 = vmatpush3.xpose.msra.mxu0 %v1488_v26  ;;  %15871 = vmatprep.mubr.msk.f32.mxu0 %vm18985_vm0, %v18986_v9 }
 0x16b   : > { %15874 = vmatprep.subr.mxu0 %v18986_v9 }
 0x171   : > { %15872 = vmatmul.mubr.f32.vlgmr.msra.gmra.mrb[2].mxu0 %v1477_v4  ;;  %v2324_v4 = vld [vmem:[%s21267_s4 + $0x18] sm:$0xff] }
 0x172   : > { %15875 = vmatpush3.xpose.msra.mxu0 %v1411_v25  ;;  %15876 = vmatprep.mubr.msk.f32.mxu0 %vm18985_vm0, %v18986_v9 }
 0x173   : > { %15879 = vmatprep.subr.mxu0 %v18986_v9 }
 0x179   : > { %15877 = vmatmul.mubr.f32.vlgmr.msra.gmra.mrb[2].mxu0 %v1478_v7  ;;  %v2342_v7 = vand.u32 4294901760, %v2324_v4 }
 0x17a   : > { %15880 = vmatpush3.xpose.msra.mxu0 %v1489_v28  ;;  %15881 = vmatprep.mubr.msk.f32.mxu0 %vm18985_vm0, %v18986_v9 }
 0x17b   : > { %15884 = vmatprep.subr.mxu0 %v18986_v9  ;;  %v2434_v20 = vsub.f32 %v2324_v4, %v2342_v7 }
 0x17d   : > { %v2435_v22 = vand.u32 4294901760, %v2434_v20 }
 0x181   : > { %15882 = vmatmul.mubr.f32.vlgmr.msra.gmra.mrb[2].mxu0 %v1476_v1 }
 0x182   : > { %15885 = vmatpush3.xpose.msra.mxu0 %v1411_v25  ;;  %15886 = vmatprep.mubr.msk.f32.mxu0 %vm18985_vm0, %v18986_v9  ;;  %v2436_v25 = vsub.f32 %v2434_v20, %v2435_v22 }
 0x183   : > { %15889 = vmatprep.subr.mxu0 %v18986_v9 }
 0x184   : > { %v2437_v27 = vand.u32 4294901760, %v2436_v25 }
 0x189   : > { %15887 = vmatmul.mubr.f32.vlgmr.msra.gmra.mrb[2].mxu0 %v1476_v1  ;;  %v2323_v1 = vld [vmem:[%s21267_s4 + $0x10] sm:$0xff] }
 0x18a   : > { %15891 = vmatprep.mubr.msk.f32.mxu0 %vm18985_vm0, %v18986_v9  ;;  %v1870_v32 = vpop.permute.xlu1 %1869  ;;  %v2339_v5 = vand.u32 4294901760, %v2323_v1 }
 0x18b   : > { %v19413_v33 = vand.u32 4294901760, %v1870_v32 }
 0x18c   : > { %v2427_v8 = vsub.f32 %v2323_v1, %v2339_v5  ;;  %v17735_v30 = vpack.c.bf16 %v2342_v7, %v2339_v5  ;;  %v2842_v5 = vld [vmem:[%s21268_s5] sm:$0xff]  ;;  %v2843_v7 = vld [vmem:[%s21268_s5 + $0x8] sm:$0xff] }
 0x18d   : > { %15890 = vmatpush3.msra.mxu0 %v19413_v33  ;;  %v1953_v40 = vsub.f32 %v1870_v32, %v19413_v33 }
 0x18e   : > { %15894 = vmatprep.subr.mxu0 %v18986_v9  ;;  %v2428_v21 = vand.u32 4294901760, %v2427_v8  ;;  %v17747_v32 = vpack.c.bf16 %v2434_v20, %v2427_v8  ;;  %v2857_v20 = vand.u32 4294901760, %v2843_v7 }
 0x18f   : > { %v1954_v55 = vand.u32 4294901760, %v1953_v40 }
 0x190   : > { %v2429_v24 = vsub.f32 %v2427_v8, %v2428_v21  ;;  %v2854_v8 = vand.u32 4294901760, %v2842_v5 }
 0x191   : > { %v1955_v61 = vsub.f32 %v1953_v40, %v1954_v55 }
 0x192   : > { %v2430_v26 = vand.u32 4294901760, %v2429_v24  ;;  %v19538_v25 = vpack.c.bf16 %v2857_v20, %v2854_v8 }
 0x193   : > { %v1956_v0 = vand.u32 4294901760, %v1955_v61 }
 0x194   : > { %v17741_v28 = vpack.c.bf16 %v2437_v27, %v2430_v26  ;;  %v2934_v26 = vsub.f32 %v2842_v5, %v2854_v8  ;;  %v2941_v27 = vsub.f32 %v2843_v7, %v2857_v20 }
 0x196   : > { %17742 = vmatpush3.bf16.msra.mxu1 %v17741_v28 }
 0x197   : > { %17749 = vmatprep.subr.bf16.mxu1 %v18984_v3 }
 0x25c   : > { %v1852_v37 = vpop.f32.mrb[2].mxu0 }
 0x25d   : > { %v1856_v38 = vsel %vm351_vm3, -1e+30, %v1852_v37  ;;  %v15888_v39 = vpop.f32.mrb[3].mxu0 }
 0x25e   : > { %v1858_v41 = vsel %vm1857_vm4, %v1856_v38, -inf }
 0x25f   : > { %1859 = vmax.xlane.f32.xlu0 %v1858_v41 }
 0x2ec   : > { %v1860_v42 = vpop.xlane.xlu0 %1859 }
 0x2ed   : > { %v1861_v43 = vsub.f32 %v1856_v38, %v1860_v42 }
 0x2ef   : > { %v1862_v48 = vmul.f32 1.442695, %v1861_v43 }
 0x2f1   : > { %18885 = vpow2.f32 %v1862_v48 }
 0x2fb   : > { %v18886_v49 = vpop.eup %18885 }
 0x2fc   : > { %v1864_v50 = vsel %vm1857_vm4, %v18886_v49, 0.0 }
 0x2fd   : > { %1865 = vadd.xlane.f32.xlu0 %v1864_v50 }
 0x38a   : > { %v1866_v19 = vpop.xlane.xlu0 %1865 }
 0x38b   : > { %18887 = vrcp.f32 %v1866_v19 }
 0x395   : > { %v18888_v31 = vpop.eup %18887 }
 0x396   : > { %v1868_v45 = vmul.f32 %v18888_v31, %v18886_v49  ;;  %v17744_v49 = vpack.c.bf16 %v19446_v15, %v19441_v12  ;;  %v2328_v12 = vrot.slane %v19390_v2, %v19519_v11 }
 0x398   : > { %v1873_v46 = vsel %vm1857_vm4, %v1868_v45, 0 }
 0x399   : > { %v1941_v47 = vand.u32 4294901760, %v1873_v46 }
 0x39b   : > { %v1942_v59 = vsub.f32 %v1873_v46, %v1941_v47 }
 0x39d   : > { %v1943_v60 = vand.u32 4294901760, %v1942_v59 }
 0x39f   : > { %v1944_v62 = vsub.f32 %v1942_v59, %v1943_v60 }
 0x3a1   : > { %v1945_v63 = vand.u32 4294901760, %v1944_v62 }
 0x3a3   : > { %15892 = vmatmul.mubr.f32.vlgmr.msra.gmra.mrb[4].mxu0 %v1945_v63 }
 0x3a4   : > { %15895 = vmatpush3.msra.mxu0 %v1956_v0  ;;  %15896 = vmatprep.mubr.msk.f32.mxu0 %vm18985_vm0, %v18986_v9 }
 0x3a5   : > { %15899 = vmatprep.subr.mxu0 %v18986_v9 }
 0x3ab   : > { %15897 = vmatmul.mubr.f32.vlgmr.msra.gmra.mrb[4].mxu0 %v1941_v47 }
 0x3ac   : > { %15900 = vmatpush3.msra.mxu0 %v1953_v40  ;;  %15901 = vmatprep.mubr.msk.f32.mxu0 %vm18985_vm0, %v18986_v9 }
 0x3ad   : > { %15904 = vmatprep.subr.mxu0 %v18986_v9 }
 0x3b3   : > { %15902 = vmatmul.mubr.f32.vlgmr.msra.gmra.mrb[4].mxu0 %v1942_v59 }
 0x3b4   : > { %15905 = vmatpush3.msra.mxu0 %v19413_v33  ;;  %15906 = vmatprep.mubr.msk.f32.mxu0 %vm18985_vm0, %v18986_v9 }
 0x3b5   : > { %15909 = vmatprep.subr.mxu0 %v18986_v9 }
 0x3bb   : > { %15907 = vmatmul.mubr.f32.vlgmr.msra.gmra.mrb[4].mxu0 %v1943_v60 }
 0x3bc   : > { %15910 = vmatpush3.msra.mxu0 %v1954_v55  ;;  %15911 = vmatprep.mubr.msk.f32.mxu0 %vm18985_vm0, %v18986_v9 }
 0x3bd   : > { %15914 = vmatprep.subr.mxu0 %v18986_v9 }
 0x3c3   : > { %15912 = vmatmul.mubr.f32.vlgmr.msra.gmra.mrb[4].mxu0 %v1941_v47 }
 0x3c4   : > { %15915 = vmatpush3.msra.mxu0 %v19413_v33  ;;  %15916 = vmatprep.mubr.msk.f32.mxu0 %vm18985_vm0, %v18986_v9  ;;  %v17759_v33 = vpack.c.bf16 %v2435_v22, %v2428_v21  ;;  %v2845_v21 = vld [vmem:[%s21268_s5 + $0x18] sm:$0xff] }
 0x3c5   : > { %17731 = vmatprep.subr.bf16.mxu0 %v18984_v3  ;;  %v2863_v24 = vand.u32 4294901760, %v2845_v21 }
 0x3cb   : > { %15917 = vmatmul.mubr.f32.vlgmr.msra.gmra.mrb[4].mxu0 %v1941_v47 }
 0x3cc   : > { %15927 = vmatprep.mubr.msk.f32.mxu0 %vm18985_vm0, %v18986_v9  ;;  %17733 = vmatpush3.bf16.msra.mxu0 %v17732_v29 }
 0x3cd   : > { %17734 = vmatprep.subr.bf16.mxu0 %v18984_v3 }
 0x3d0   : > { %17736 = vmatpush3.bf16.msra.mxu0 %v17735_v30 }
 0x3d1   : > { %17743 = vmatprep.subr.bf16.mxu0 %v18984_v3 }
 0x49e   : > { %v2317_v37 = vpop.f32.mrb[4].mxu0 }
 0x49f   : > { %v2330_v38 = vsel %vm362_vm1, %v2317_v37, 0  ;;  %v15918_v39 = vpop.f32.mrb[5].mxu0 }
 0x4a0   : > { %v2401_v41 = vand.u32 4294901760, %v2330_v38 }
 0x4a2   : > { %v2402_v42 = vsub.f32 %v2330_v38, %v2401_v41  ;;  %15939 = vmatmul.mubr.f32.vlgmr.msra.gmra.mrb[4].mxu1 %v2401_v41 }
 0x4a3   : > { %17751 = vmatpush3.bf16.msra.mxu1 %v17732_v29  ;;  %15960 = vmatprep.mubr.msk.f32.mxu1 %vm18985_vm0, %v18986_v9 }
 0x4a4   : > { %v2403_v43 = vand.u32 4294901760, %v2402_v42  ;;  %17752 = vmatprep.subr.bf16.mxu1 %v18984_v3 }
 0x4a6   : > { %v2404_v48 = vsub.f32 %v2402_v42, %v2403_v43 }
 0x4a7   : > { %17754 = vmatpush3.bf16.msra.mxu1 %v17735_v30 }
 0x4a8   : > { %v2405_v50 = vand.u32 4294901760, %v2404_v48  ;;  %17761 = vmatprep.subr.bf16.mxu1 %v18984_v3 }
 0x4aa   : > { %15961 = vmatmul.mubr.f32.vlgmr.msra.gmra.mrb[6].mxu1 %v2403_v43  ;;  %15928 = vmatmul.mubr.f32.vlgmr.msra.gmra.mrb[6].mxu0 %v2405_v50 }
 0x4ab   : > { %17745 = vmatpush3.bf16.msra.mxu0 %v17744_v49  ;;  %17763 = vmatpush3.bf16.msra.mxu1 %v17732_v29  ;;  %v2955_v29 = vsub.f32 %v2845_v21, %v2863_v24  ;;  %v3342_v21 = vld [vmem:[%s21269_s6 + $0x18] sm:$0xff] }
 0x4ac   : > { %17746 = vmatprep.subr.bf16.mxu0 %v18984_v3  ;;  %17764 = vmatprep.subr.bf16.mxu1 %v18984_v3 }
 0x4ad   : > { %15949 = vmatprep.mubr.msk.f32.mxu0 %vm18985_vm0, %v18986_v9  ;;  %15982 = vmatprep.mubr.msk.f32.mxu1 %vm18985_vm0, %v18986_v9  ;;  %v2956_v43 = vand.u32 4294901760, %v2955_v29 }
 0x4af   : > { %17748 = vmatpush3.bf16.msra.mxu0 %v17747_v32  ;;  %17766 = vmatpush3.bf16.msra.mxu1 %v17735_v30  ;;  %v2935_v32 = vand.u32 4294901760, %v2934_v26  ;;  %v2957_v50 = vsub.f32 %v2955_v29, %v2956_v43 }
 0x4b0   : > { %17755 = vmatprep.subr.bf16.mxu0 %v18984_v3  ;;  %17803 = vmatprep.subr.bf16.mxu1 %v18984_v3 }
 0x4b1   : > { %v2936_v37 = vsub.f32 %v2934_v26, %v2935_v32 }
 0x4b2   : > { %15950 = vmatmul.mubr.f32.vlgmr.msra.gmra.mrb[8].mxu0 %v2402_v42  ;;  %15983 = vmatmul.mubr.f32.vlgmr.msra.gmra.mrb[8].mxu1 %v2401_v41 }
 0x4b3   : > { %17757 = vmatpush3.bf16.msra.mxu0 %v17756_v51  ;;  %15971 = vmatprep.mubr.msk.f32.mxu0 %vm18985_vm0, %v18986_v9  ;;  %v2937_v39 = vand.u32 4294901760, %v2936_v37 }
 0x4b4   : > { %17758 = vmatprep.subr.bf16.mxu0 %v18984_v3  ;;  %16067 = vmatprep.mubr.msk.f32.mxu1 %vm18985_vm0, %v18986_v9 }
 0x4b7   : > { %17760 = vmatpush3.bf16.msra.mxu0 %v17759_v33  ;;  %v2942_v33 = vand.u32 4294901760, %v2941_v27 }
 0x4b8   : > { %17767 = vmatprep.subr.bf16.mxu0 %v18984_v3 }
 0x4b9   : > { %v2943_v38 = vsub.f32 %v2941_v27, %v2942_v33 }
 0x4ba   : > { %15972 = vmatmul.mubr.f32.vlgmr.msra.gmra.mrb[10].mxu0 %v2401_v41 }
 0x4bb   : > { %15993 = vmatprep.mubr.msk.f32.mxu0 %vm18985_vm0, %v18986_v9  ;;  %17769 = vmatpush3.bf16.msra.mxu0 %v19538_v25  ;;  %v2944_v41 = vand.u32 4294901760, %v2943_v38 }
 0x4bc   : > { %17770 = vmatprep.subr.bf16.mxu0 %v18984_v3 }
 0x4bd   : > { %v17774_v48 = vpack.c.bf16 %v2944_v41, %v2937_v39 }
 0x575   : > { %v2498_v52 = vpop.f32.mrb[4].mxu1 }
 0x576   : > { %v15940_v53 = vpop.f32.mrb[5].mxu1 }
 0x57d   : > { %v2655_v15 = vpop.f32.mrb[6].mxu1  ;;  %v2407_v16 = vpop.f32.mrb[6].mxu0 }
 0x57e   : > { %v2408_v35 = vadd.f32 %v2407_v16, %v2328_v12  ;;  %v15962_v13 = vpop.f32.mrb[7].mxu1  ;;  %v15929_v14 = vpop.f32.mrb[7].mxu0  ;;  %v17780_v12 = vpack.c.bf16 %v2941_v27, %v2934_v26  ;;  %v17792_v16 = vpack.c.bf16 %v2942_v33, %v2935_v32  ;;  %v3343_v26 = vld [vmem:[%s21269_s6 + $0x20] sm:$0xff]  ;;  %v3344_v27 = vld [vmem:[%s21269_s6 + $0x28] sm:$0xff]  ;;  %v3345_v32 = vld [vmem:[%s21269_s6 + $0x30] sm:$0xff] }
 0x57f   : > { %v3339_v13 = vld [vmem:[%s21269_s6] sm:$0xff]  ;;  %v3340_v14 = vld [vmem:[%s21269_s6 + $0x8] sm:$0xff]  ;;  %v3346_v33 = vld [vmem:[%s21269_s6 + $0x38] sm:$0xff]  ;;  %v3373_v37 = vand.u32 4294901760, %v3345_v32 }
 0x580   : > { %v2499_v10 = vadd.f32 %v2498_v52, %v2408_v35  ;;  %v2958_v52 = vand.u32 4294901760, %v2957_v50  ;;  %v3376_v38 = vand.u32 4294901760, %v3346_v33 }
 0x582   : > { %v19632_v39 = vpack.c.bf16 %v3376_v38, %v3373_v37  ;;  %v19645_v50 = vsub.f32 %v3346_v33, %v3376_v38  ;;  %v2849_v38 = vrot.slane %v19381_v58, %v19519_v11 }
 0x585   : > { %v2578_v17 = vpop.f32.mrb[8].mxu0  ;;  %v2813_v18 = vpop.f32.mrb[8].mxu1 }
 0x586   : > { %v2579_v19 = vadd.f32 %v2578_v17, %v2499_v10  ;;  %v15951_v31 = vpop.f32.mrb[9].mxu0  ;;  %v15984_v40 = vpop.f32.mrb[9].mxu1  ;;  %v3355_v10 = vand.u32 4294901760, %v3339_v13  ;;  %v3358_v17 = vand.u32 4294901760, %v3340_v14 }
 0x588   : > { %v2656_v45 = vadd.f32 %v2655_v15, %v2579_v19  ;;  %v19554_v19 = vsub.f32 %v3339_v13, %v3355_v10  ;;  %v19556_v31 = vsub.f32 %v3340_v14, %v3358_v17 }
 0x58d   : > { %v2738_v46 = vpop.f32.mrb[10].mxu0 }
 0x58e   : > { %v2739_v47 = vadd.f32 %v2738_v46, %v2656_v45  ;;  %v15973_v55 = vpop.f32.mrb[11].mxu0 }
 0x58f   : > { %v19564_v55 = vsub.s32 3, %v19373_v56 }
 0x590   : > { %v2814_v59 = vadd.f32 %v2813_v18, %v2739_v47  ;;  %v19552_v18 = vpack.c.bf16 %v3358_v17, %v3355_v10  ;;  %v19561_v47 = vsub.s32 2, %v19373_v56 }
 0x592   : > { %v2817_v60 = vadd.f32 %v2814_v59, %v19140_v23  ;;  %v2844_v23 = vld [vmem:[%s21268_s5 + $0x10] sm:$0xff]  ;;  %17805 = vmatpush3.bf16.msra.mxu1 %v19552_v18  ;;  %v2835_v59 = vrot.slane %v19390_v2, %v19561_v47 }
 0x593   : > { %v2860_v22 = vand.u32 4294901760, %v2844_v23  ;;  %17806 = vmatprep.subr.bf16.mxu1 %v18984_v3 }
 0x594   : > { %v2818_v61 = vsel %vm362_vm1, %v2817_v60, 0.0 }
 0x595   : > { %2819 = vadd.xlane.f32.xlu1 %v2818_v61  ;;  %v2948_v28 = vsub.f32 %v2844_v23, %v2860_v22  ;;  %v19541_v30 = vpack.c.bf16 %v2863_v24, %v2860_v22  ;;  %v3364_v24 = vand.u32 4294901760, %v3342_v21 }
 0x597   : > { %17772 = vmatpush3.bf16.msra.mxu0 %v19541_v30  ;;  %v2949_v42 = vand.u32 4294901760, %v2948_v28  ;;  %v17783_v15 = vpack.c.bf16 %v2955_v29, %v2948_v28  ;;  %v3370_v29 = vand.u32 4294901760, %v3344_v27 }
 0x598   : > { %17773 = vmatprep.subr.bf16.mxu0 %v18984_v3 }
 0x599   : > { %v2950_v49 = vsub.f32 %v2948_v28, %v2949_v42  ;;  %v17795_v35 = vpack.c.bf16 %v2956_v43, %v2949_v42  ;;  %v3367_v28 = vand.u32 4294901760, %v3343_v26  ;;  %v19636_v42 = vsub.f32 %v3342_v21, %v3364_v24 }
 0x59b   : > { %v2951_v51 = vand.u32 4294901760, %v2950_v49  ;;  %v19638_v43 = vsub.f32 %v3343_v26, %v3367_v28  ;;  %v19643_v49 = vsub.f32 %v3345_v32, %v3373_v37  ;;  %v3461_v13 = vand.u32 4294901760, %v19636_v42 }
 0x59d   : > { %v17777_v53 = vpack.c.bf16 %v2958_v52, %v2951_v51  ;;  %v3440_v51 = vand.u32 4294901760, %v19554_v19  ;;  %v3447_v52 = vand.u32 4294901760, %v19556_v31  ;;  %v3462_v17 = vsub.f32 %v19636_v42, %v3461_v13 }
 0x622   : > { %v2820_v62 = vpop.xlane.xlu1 %2819 }
 0x623   : > { %v2822_v63 = vmul.f32 0.03125, %v2820_v62  ;;  %v2840_v62 = vrot.slane %v19390_v2, %v19564_v55 }
 0x625   : > { %v2823_v0 = vsub.f32 %v2817_v60, %v2822_v63 }
 0x627   : > { %v2824_v1 = vmul.f32 %v2823_v0, %v2823_v0 }
 0x629   : > { %v2825_v4 = vsel %vm362_vm1, %v2824_v1, 0.0 }
 0x62a   : > { %2826 = vadd.xlane.f32.xlu0 %v2825_v4 }
 0x6b7   : > { %v2827_v40 = vpop.xlane.xlu0 %2826 }
 0x6b8   : > { %v2828_v45 = vmul.f32 0.03125, %v2827_v40 }
 0x6ba   : > { %v2829_v46 = vadd.f32 1e-05, %v2828_v45  ;;  %v3463_v45 = vand.u32 4294901760, %v3462_v17 }
 0x6bc   : > { %18889 = vrsqrt.f32 %v2829_v46  ;;  %v3468_v46 = vand.u32 4294901760, %v19638_v43 }
 0x6c6   : > { %v18890_v60 = vpop.eup %18889 }
 0x6c7   : > { %v2831_v61 = vmul.f32 %v18890_v60, %v2823_v0  ;;  %v3341_v0 = vld [vmem:[%s21269_s6 + $0x10] sm:$0xff] }
 0x6c8   : > { %v3361_v22 = vand.u32 4294901760, %v3341_v0 }
 0x6c9   : > { %v2836_v63 = vmul.f32 %v2835_v59, %v2831_v61  ;;  %v3469_v61 = vsub.f32 %v19638_v43, %v3468_v46 }
 0x6ca   : > { %v19634_v41 = vsub.f32 %v3341_v0, %v3361_v22 }
 0x6cb   : > { %v19570_v1 = vadd.f32 %v2840_v62, %v2836_v63  ;;  %v3470_v63 = vand.u32 4294901760, %v3469_v61 }
 0x6cc   : > { %v17831_v26 = vpack.c.bf16 %v19636_v42, %v19634_v41 }
 0x6cd   : > { %v2851_v4 = vsel %vm362_vm1, %v19570_v1, 0 }
 0x6ce   : > { %v2922_v5 = vand.u32 4294901760, %v2851_v4 }
 0x6d0   : > { %v2923_v7 = vsub.f32 %v2851_v4, %v2922_v5 }
 0x6d2   : > { %v2924_v23 = vand.u32 4294901760, %v2923_v7 }
 0x6d4   : > { %v2925_v8 = vsub.f32 %v2923_v7, %v2924_v23 }
 0x6d6   : > { %v2926_v20 = vand.u32 4294901760, %v2925_v8 }
 0x6d8   : > { %15994 = vmatmul.mubr.f32.vlgmr.msra.gmra.mrb[12].mxu0 %v2926_v20 }
 0x6d9   : > { %17775 = vmatpush3.bf16.msra.mxu0 %v17774_v48  ;;  %16004 = vmatprep.mubr.msk.f32.mxu0 %vm18985_vm0, %v18986_v9  ;;  %v19640_v48 = vsub.f32 %v3344_v27, %v3370_v29 }
 0x6da   : > { %17776 = vmatprep.subr.bf16.mxu0 %v18984_v3 }
 0x6db   : > { %v3475_v59 = vand.u32 4294901760, %v19640_v48  ;;  %v17834_v27 = vpack.c.bf16 %v19640_v48, %v19638_v43 }
 0x6dd   : > { %17778 = vmatpush3.bf16.msra.mxu0 %v17777_v53  ;;  %v3441_v53 = vsub.f32 %v19554_v19, %v3440_v51  ;;  %v3476_v62 = vsub.f32 %v19640_v48, %v3475_v59  ;;  %v17858_v33 = vpack.c.bf16 %v3475_v59, %v3468_v46 }
 0x6de   : > { %17779 = vmatprep.subr.bf16.mxu0 %v18984_v3 }
 0x6df   : > { %v3477_v4 = vand.u32 4294901760, %v3476_v62 }
 0x6e0   : > { %16005 = vmatmul.mubr.f32.vlgmr.msra.gmra.mrb[12].mxu0 %v2922_v5 }
 0x6e1   : > { %17781 = vmatpush3.bf16.msra.mxu0 %v17780_v12  ;;  %16015 = vmatprep.mubr.msk.f32.mxu0 %vm18985_vm0, %v18986_v9  ;;  %v3448_v12 = vsub.f32 %v19556_v31, %v3447_v52 }
 0x6e2   : > { %17782 = vmatprep.subr.bf16.mxu0 %v18984_v3 }
 0x6e5   : > { %17784 = vmatpush3.bf16.msra.mxu0 %v17783_v15  ;;  %v3442_v15 = vand.u32 4294901760, %v3441_v53 }
 0x6e6   : > { %17785 = vmatprep.subr.bf16.mxu0 %v18984_v3 }
 0x6e8   : > { %16016 = vmatmul.mubr.f32.vlgmr.msra.gmra.mrb[12].mxu0 %v2923_v7  ;;  %v3489_v7 = vand.u32 4294901760, %v19645_v50 }
 0x6e9   : > { %17787 = vmatpush3.bf16.msra.mxu0 %v19538_v25  ;;  %16026 = vmatprep.mubr.msk.f32.mxu0 %vm18985_vm0, %v18986_v9 }
 0x6ea   : > { %17788 = vmatprep.subr.bf16.mxu0 %v18984_v3  ;;  %v3490_v20 = vsub.f32 %v19645_v50, %v3489_v7 }
 0x6ec   : > { %v3491_v21 = vand.u32 4294901760, %v3490_v20  ;;  %v14707_v20 = vld [vmem:[%s21266_s3 + $0x60] sm:$0xff] }
 0x6ed   : > { %17790 = vmatpush3.bf16.msra.mxu0 %v19541_v30 }
 0x6ee   : > { %17791 = vmatprep.subr.bf16.mxu0 %v18984_v3 }
 0x6f0   : > { %16027 = vmatmul.mubr.f32.vlgmr.msra.gmra.mrb[12].mxu0 %v2924_v23  ;;  %v17822_v23 = vpack.c.bf16 %v3477_v4, %v3470_v63  ;;  %v14703_v63 = vld [vmem:[%s21266_s3 + $0x40] sm:$0xff]  ;;  %v14704_v4 = vld [vmem:[%s21266_s3 + $0x48] sm:$0xff] }
 0x6f1   : > { %17793 = vmatpush3.bf16.msra.mxu0 %v17792_v16  ;;  %16037 = vmatprep.mubr.msk.f32.mxu0 %vm18985_vm0, %v18986_v9  ;;  %v3449_v16 = vand.u32 4294901760, %v3448_v12 }
 0x6f2   : > { %17794 = vmatprep.subr.bf16.mxu0 %v18984_v3 }
 0x6f3   : > { %v17816_v14 = vpack.c.bf16 %v3449_v16, %v3442_v15 }
 0x6f5   : > { %17796 = vmatpush3.bf16.msra.mxu0 %v17795_v35  ;;  %v3454_v35 = vand.u32 4294901760, %v19634_v41 }
 0x6f6   : > { %17797 = vmatprep.subr.bf16.mxu0 %v18984_v3 }
 0x6f7   : > { %v3455_v10 = vsub.f32 %v19634_v41, %v3454_v35  ;;  %v17855_v32 = vpack.c.bf16 %v3461_v13, %v3454_v35 }
 0x6f8   : > { %16038 = vmatmul.mubr.f32.vlgmr.msra.gmra.mrb[12].mxu0 %v2922_v5 }
 0x6f9   : > { %17799 = vmatpush3.bf16.msra.mxu0 %v19538_v25  ;;  %16048 = vmatprep.mubr.msk.f32.mxu0 %vm18985_vm0, %v18986_v9  ;;  %v19608_v25 = vpack.c.bf16 %v3364_v24, %v3361_v22  ;;  %v3456_v40 = vand.u32 4294901760, %v3455_v10  ;;  %v17828_v24 = vpack.c.bf16 %v19556_v31, %v19554_v19 }
 0x6fa   : > { %17800 = vmatprep.subr.bf16.mxu0 %v18984_v3 }
 0x6fb   : > { %17808 = vmatpush3.bf16.msra.mxu1 %v19608_v25  ;;  %v17819_v60 = vpack.c.bf16 %v3463_v45, %v3456_v40 }
 0x6fc   : > { %17809 = vmatprep.subr.bf16.mxu1 %v18984_v3 }
 0x6fd   : > { %17802 = vmatpush3.bf16.msra.mxu0 %v19541_v30  ;;  %v19620_v30 = vpack.c.bf16 %v3370_v29, %v3367_v28  ;;  %v17837_v28 = vpack.c.bf16 %v19645_v50, %v19643_v49  ;;  %v17852_v29 = vpack.c.bf16 %v3447_v52, %v3440_v51 }
 0x6fe   : > { %17839 = vmatprep.subr.bf16.mxu0 %v18984_v3 }
 0x6ff   : > { %17811 = vmatpush3.bf16.msra.mxu1 %v19620_v30 }
 0x700   : > { %16049 = vmatmul.mubr.f32.vlgmr.msra.gmra.mrb[12].mxu0 %v2922_v5  ;;  %17812 = vmatprep.subr.bf16.mxu1 %v18984_v3  ;;  %v3482_v5 = vand.u32 4294901760, %v19643_v49 }
 0x701   : > { %17841 = vmatpush3.bf16.msra.mxu0 %v19552_v18  ;;  %16124 = vmatprep.mubr.msk.f32.mxu0 %vm18985_vm0, %v18986_v9 }
 0x702   : > { %17842 = vmatprep.subr.bf16.mxu0 %v18984_v3  ;;  %v3483_v8 = vsub.f32 %v19643_v49, %v3482_v5  ;;  %v17861_v37 = vpack.c.bf16 %v3489_v7, %v3482_v5  ;;  %v14705_v5 = vld [vmem:[%s21266_s3 + $0x50] sm:$0xff]  ;;  %v4430_v7 = vand.u32 4294901760, %v14703_v63 }
 0x703   : > { %17814 = vmatpush3.bf16.msra.mxu1 %v19632_v39 }
 0x704   : > { %17815 = vmatprep.subr.bf16.mxu1 %v18984_v3  ;;  %v3484_v0 = vand.u32 4294901760, %v3483_v8  ;;  %v4436_v8 = vand.u32 4294901760, %v14705_v5 }
 0x705   : > { %17844 = vmatpush3.bf16.msra.mxu0 %v19608_v25 }
 0x706   : > { %17845 = vmatprep.subr.bf16.mxu0 %v18984_v3  ;;  %v17825_v22 = vpack.c.bf16 %v3491_v21, %v3484_v0  ;;  %v14708_v0 = vld [vmem:[%s21266_s3 + $0x68] sm:$0xff] }
 0x709   : > { %17847 = vmatpush3.bf16.msra.mxu0 %v19620_v30 }
 0x70a   : > { %17848 = vmatprep.subr.bf16.mxu0 %v18984_v3 }
 0x70d   : > { %17850 = vmatpush3.bf16.msra.mxu0 %v19632_v39 }
 0x70e   : > { %17863 = vmatprep.subr.bf16.mxu0 %v18984_v3 }
 0x7d3   : > { %v3334_v53 = vpop.f32.mrb[12].mxu0 }
 0x7d4   : > { %v18634_v12 = vadd.f32 %v3334_v53, %v2849_v38  ;;  %v16050_v15 = vpop.f32.mrb[13].mxu0  ;;  %v14710_v38 = vld [vmem:[%s21266_s3 + $0x78] sm:$0xff] }
 0x7d6   : > { %v3338_v19 = vmax.f32 %v18634_v12, 0.0 }
 0x7d8   : > { %v3352_v31 = vsel %vm863_vm2, %v3338_v19, 0 }
 0x7d9   : > { %v3427_v41 = vand.u32 4294901760, %v3352_v31 }
 0x7db   : > { %v3428_v42 = vsub.f32 %v3352_v31, %v3427_v41 }
 0x7dd   : > { %v3429_v16 = vand.u32 4294901760, %v3428_v42 }
 0x7df   : > { %16125 = vmatmul.mubr.f32.vlgmr.msra.gmra.mrb[14].mxu0 %v3429_v16  ;;  %v3430_v43 = vsub.f32 %v3428_v42, %v3429_v16 }
 0x7e0   : > { %17865 = vmatpush3.bf16.msra.mxu0 %v19552_v18  ;;  %16162 = vmatprep.mubr.msk.f32.mxu0 %vm18985_vm0, %v18986_v9 }
 0x7e1   : > { %17866 = vmatprep.subr.bf16.mxu0 %v18984_v3  ;;  %v3431_v48 = vand.u32 4294901760, %v3430_v43 }
 0x7e3   : > { %16068 = vmatmul.mubr.f32.vlgmr.msra.gmra.mrb[10].mxu1 %v3431_v48 }
 0x7e4   : > { %17817 = vmatpush3.bf16.msra.mxu1 %v17816_v14  ;;  %17868 = vmatpush3.bf16.msra.mxu0 %v19608_v25 }
 0x7e5   : > { %17818 = vmatprep.subr.bf16.mxu1 %v18984_v3  ;;  %17869 = vmatprep.subr.bf16.mxu0 %v18984_v3 }
 0x7e6   : > { %16086 = vmatprep.mubr.msk.f32.mxu1 %vm18985_vm0, %v18986_v9 }
 0x7e8   : > { %17820 = vmatpush3.bf16.msra.mxu1 %v17819_v60  ;;  %17871 = vmatpush3.bf16.msra.mxu0 %v19620_v30 }
 0x7e9   : > { %17821 = vmatprep.subr.bf16.mxu1 %v18984_v3  ;;  %17872 = vmatprep.subr.bf16.mxu0 %v18984_v3 }
 0x7ec   : > { %17823 = vmatpush3.bf16.msra.mxu1 %v17822_v23  ;;  %17874 = vmatpush3.bf16.msra.mxu0 %v19632_v39  ;;  %v19710_v39 = vsub.s32 4, %v19373_v56  ;;  %v4433_v23 = vand.u32 4294901760, %v14704_v4 }
 0x7ed   : > { %17824 = vmatprep.subr.bf16.mxu1 %v18984_v3  ;;  %17911 = vmatprep.subr.bf16.mxu0 %v18984_v3 }
 0x7ee   : > { %v3350_v49 = vrot.slane %v19390_v2, %v19710_v39 }
 0x7ef   : > { %16163 = vmatmul.mubr.f32.vlgmr.msra.gmra.mrb[16].mxu0 %v3427_v41 }
 0x7f0   : > { %17826 = vmatpush3.bf16.msra.mxu1 %v17825_v22  ;;  %16247 = vmatprep.mubr.msk.f32.mxu0 %vm18985_vm0, %v18986_v9  ;;  %v19737_v22 = vpack.c.bf16 %v4433_v23, %v4430_v7 }
 0x7f1   : > { %17827 = vmatprep.subr.bf16.mxu1 %v18984_v3 }
 0x7f2   : > { %17913 = vmatpush3.bf16.msra.mxu0 %v19737_v22 }
 0x7f3   : > { %16087 = vmatmul.mubr.f32.vlgmr.msra.gmra.mrb[12].mxu1 %v3427_v41  ;;  %17914 = vmatprep.subr.bf16.mxu0 %v18984_v3 }
 0x7f4   : > { %17829 = vmatpush3.bf16.msra.mxu1 %v17828_v24  ;;  %16105 = vmatprep.mubr.msk.f32.mxu1 %vm18985_vm0, %v18986_v9  ;;  %v19739_v24 = vsub.f32 %v14703_v63, %v4430_v7 }
 0x7f5   : > { %17830 = vmatprep.subr.bf16.mxu1 %v18984_v3 }
 0x7f6   : > { %v4515_v53 = vand.u32 4294901760, %v19739_v24 }
 0x7f8   : > { %17832 = vmatpush3.bf16.msra.mxu1 %v17831_v26  ;;  %v19741_v26 = vsub.f32 %v14704_v4, %v4433_v23  ;;  %v4516_v43 = vsub.f32 %v19739_v24, %v4515_v53 }
 0x7f9   : > { %17833 = vmatprep.subr.bf16.mxu1 %v18984_v3 }
 0x7fa   : > { %v4522_v12 = vand.u32 4294901760, %v19741_v26 }
 0x7fc   : > { %17835 = vmatpush3.bf16.msra.mxu1 %v17834_v27  ;;  %v19743_v27 = vsub.f32 %v14705_v5, %v4436_v8  ;;  %v4523_v48 = vsub.f32 %v19741_v26, %v4522_v12 }
 0x7fd   : > { %17836 = vmatprep.subr.bf16.mxu1 %v18984_v3 }
 0x800   : > { %17838 = vmatpush3.bf16.msra.mxu1 %v17837_v28  ;;  %v4442_v28 = vand.u32 4294901760, %v14707_v20 }
 0x801   : > { %17851 = vmatprep.subr.bf16.mxu1 %v18984_v3 }
 0x802   : > { %v19759_v15 = vsub.f32 %v14707_v20, %v4442_v28 }
 0x803   : > { %16106 = vmatmul.mubr.f32.vlgmr.msra.gmra.mrb[14].mxu1 %v3428_v42  ;;  %v4529_v42 = vand.u32 4294901760, %v19743_v27 }
 0x804   : > { %17853 = vmatpush3.bf16.msra.mxu1 %v17852_v29  ;;  %16143 = vmatprep.mubr.msk.f32.mxu1 %vm18985_vm0, %v18986_v9  ;;  %v4445_v29 = vand.u32 4294901760, %v14708_v0 }
 0x805   : > { %17854 = vmatprep.subr.bf16.mxu1 %v18984_v3 }
 0x806   : > { %v19761_v19 = vpack.c.bf16 %v4445_v29, %v4442_v28  ;;  %v19765_v16 = vsub.f32 %v14708_v0, %v4445_v29  ;;  %v17960_v28 = vpack.c.bf16 %v4522_v12, %v4515_v53  ;;  %v14700_v53 = vld [vmem:[%s21265_s2 + $0x28] sm:$0xff]  ;;  %v14701_v12 = vld [vmem:[%s21265_s2 + $0x30] sm:$0xff] }
 0x808   : > { %17856 = vmatpush3.bf16.msra.mxu1 %v17855_v32  ;;  %v17942_v0 = vpack.c.bf16 %v19765_v16, %v19759_v15 }
 0x809   : > { %17857 = vmatprep.subr.bf16.mxu1 %v18984_v3 }
 0x80c   : > { %17859 = vmatpush3.bf16.msra.mxu1 %v17858_v33 }
 0x80d   : > { %17860 = vmatprep.subr.bf16.mxu1 %v18984_v3 }
 0x810   : > { %17862 = vmatpush3.bf16.msra.mxu1 %v17861_v37  ;;  %v14709_v37 = vld [vmem:[%s21266_s3 + $0x70] sm:$0xff] }
 0x811   : > { %17875 = vmatprep.subr.bf16.mxu1 %v18984_v3  ;;  %v4448_v31 = vand.u32 4294901760, %v14709_v37 }
 0x813   : > { %16144 = vmatmul.mubr.f32.vlgmr.msra.gmra.mrb[16].mxu1 %v3427_v41  ;;  %v4451_v41 = vand.u32 4294901760, %v14710_v38 }
 0x814   : > { %16173 = vmatprep.mubr.msk.f32.mxu1 %vm18985_vm0, %v18986_v9 }
 0x8b2   : > { %v3713_v58 = vpop.f32.mrb[14].mxu0 }
 0x8b3   : > { %v16126_v18 = vpop.f32.mrb[15].mxu0 }
 0x8b4   : > { %v4543_v18 = vand.u32 4294901760, %v19759_v15 }
 0x8b6   : > { %v3433_v25 = vpop.f32.mrb[10].mxu1 }
 0x8b7   : > { %v16069_v30 = vpop.f32.mrb[11].mxu1  ;;  %v3434_v52 = vadd.f32 %v3433_v25, %v3350_v49  ;;  %v19776_v25 = vpack.c.bf16 %v4451_v41, %v4448_v31  ;;  %v19780_v49 = vsub.f32 %v14710_v38, %v4451_v41  ;;  %v14699_v38 = vld [vmem:[%s21265_s2 + $0x20] sm:$0xff] }
 0x8b8   : > { %v19778_v30 = vsub.f32 %v14709_v37, %v4448_v31  ;;  %v3938_v31 = vand.u32 4294901760, %v14701_v12 }
 0x8c2   : > { %v3887_v50 = vpop.f32.mrb[16].mxu0 }
 0x8c3   : > { %v16164_v51 = vpop.f32.mrb[17].mxu0 }
 0x8c4   : > { %v4517_v51 = vand.u32 4294901760, %v4516_v43 }
 0x8c6   : > { %v3544_v35 = vpop.f32.mrb[12].mxu1 }
 0x8c7   : > { %v3545_v13 = vadd.f32 %v3544_v35, %v3434_v52  ;;  %v16088_v14 = vpop.f32.mrb[13].mxu1  ;;  %v4524_v52 = vand.u32 4294901760, %v4523_v48  ;;  %v4026_v48 = vsub.f32 %v14701_v12, %v3938_v31 }
 0x8c8   : > { %v4544_v14 = vsub.f32 %v19759_v15, %v4543_v18  ;;  %v3932_v15 = vand.u32 4294901760, %v14699_v38 }
 0x8d6   : > { %v3632_v10 = vpop.f32.mrb[14].mxu1 }
 0x8d7   : > { %v3633_v17 = vadd.f32 %v3632_v10, %v3545_v13  ;;  %v16107_v40 = vpop.f32.mrb[15].mxu1  ;;  %v4550_v13 = vand.u32 4294901760, %v19765_v16  ;;  %v4557_v10 = vand.u32 4294901760, %v19778_v30 }
 0x8d8   : > { %v17924_v40 = vpack.c.bf16 %v4524_v52, %v4517_v51 }
 0x8d9   : > { %v3714_v45 = vadd.f32 %v3713_v58, %v3633_v17  ;;  %v4564_v17 = vand.u32 4294901760, %v19780_v49  ;;  %v4558_v63 = vsub.f32 %v19778_v30, %v4557_v10 }
 0x8db   : > { %v4565_v4 = vsub.f32 %v19780_v49, %v4564_v17  ;;  %v4559_v7 = vand.u32 4294901760, %v4558_v63 }
 0x8dd   : > { %v4566_v23 = vand.u32 4294901760, %v4565_v4 }
 0x8e6   : > { %v3808_v46 = vpop.f32.mrb[16].mxu1 }
 0x8e7   : > { %v3809_v59 = vadd.f32 %v3808_v46, %v3714_v45  ;;  %v16145_v60 = vpop.f32.mrb[17].mxu1 }
 0x8e8   : > { %v4545_v60 = vand.u32 4294901760, %v4544_v14 }
 0x8e9   : > { %v3888_v61 = vadd.f32 %v3887_v50, %v3809_v59  ;;  %v4530_v50 = vsub.f32 %v19743_v27, %v4529_v42  ;;  %v4551_v59 = vsub.f32 %v19765_v16, %v4550_v13  ;;  %v4012_v16 = vsub.f32 %v14699_v38, %v3932_v15 }
 0x8eb   : > { %v19715_v62 = vadd.f32 %v3888_v61, %v19570_v1  ;;  %v14706_v1 = vld [vmem:[%s21266_s3 + $0x58] sm:$0xff]  ;;  %v4531_v45 = vand.u32 4294901760, %v4530_v50 }
 0x8ec   : > { %v4439_v21 = vand.u32 4294901760, %v14706_v1 }
 0x8ed   : > { %v3892_v2 = vsel %vm362_vm1, %v19715_v62, 0.0 }
 0x8ee   : > { %3893 = vadd.xlane.f32.xlu0 %v3892_v2  ;;  %v19746_v32 = vpack.c.bf16 %v4439_v21, %v4436_v8  ;;  %v19748_v33 = vsub.f32 %v14706_v1, %v4439_v21  ;;  %v4552_v2 = vand.u32 4294901760, %v4551_v59  ;;  %v17933_v1 = vpack.c.bf16 %v4566_v23, %v4559_v7 }
 0x8ef   : > { %v17936_v8 = vpack.c.bf16 %v19741_v26, %v19739_v24  ;;  %v17945_v21 = vpack.c.bf16 %v19780_v49, %v19778_v30  ;;  %v17966_v24 = vpack.c.bf16 %v4550_v13, %v4543_v18  ;;  %v17969_v26 = vpack.c.bf16 %v4564_v17, %v4557_v10 }
 0x8f0   : > { %17916 = vmatpush3.bf16.msra.mxu0 %v19746_v32  ;;  %v4536_v58 = vand.u32 4294901760, %v19748_v33  ;;  %v17930_v5 = vpack.c.bf16 %v4552_v2, %v4545_v60  ;;  %v17939_v20 = vpack.c.bf16 %v19748_v33, %v19743_v27  ;;  %v19888_v7 = vsub.s32 5, %v19373_v56 }
 0x8f1   : > { %17917 = vmatprep.subr.bf16.mxu0 %v18984_v3  ;;  %v19891_v23 = vsub.s32 6, %v19373_v56  ;;  %v14772_v56 = vld [vmem:[%s21267_s4 + $0x68] sm:$0xff] }
 0x8f2   : > { %v4537_v35 = vsub.f32 %v19748_v33, %v4536_v58  ;;  %v17963_v29 = vpack.c.bf16 %v4536_v58, %v4529_v42 }
 0x8f4   : > { %17919 = vmatpush3.bf16.msra.mxu0 %v19761_v19  ;;  %v4538_v46 = vand.u32 4294901760, %v4537_v35  ;;  %v4027_v35 = vand.u32 4294901760, %v4026_v48 }
 0x8f5   : > { %17920 = vmatprep.subr.bf16.mxu0 %v18984_v3 }
 0x8f6   : > { %v17927_v61 = vpack.c.bf16 %v4538_v46, %v4531_v45  ;;  %v4028_v10 = vsub.f32 %v4026_v48, %v4027_v35 }
 0x8f8   : > { %17922 = vmatpush3.bf16.msra.mxu0 %v19776_v25 }
 0x8f9   : > { %17923 = vmatprep.subr.bf16.mxu0 %v18984_v3 }
 0x8fb   : > { %16248 = vmatmul.mubr.f32.vlgmr.msra.gmra.mrb[18].mxu0 %v19259_v36 }
 0x8fc   : > { %17925 = vmatpush3.bf16.msra.mxu0 %v17924_v40  ;;  %16266 = vmatprep.mubr.msk.f32.mxu0 %vm18985_vm0, %v18986_v9  ;;  %v4029_v40 = vand.u32 4294901760, %v4028_v10 }
 0x8fd   : > { %17926 = vmatprep.subr.bf16.mxu0 %v18984_v3 }
 0x900   : > { %17928 = vmatpush3.bf16.msra.mxu0 %v17927_v61 }
 0x901   : > { %17929 = vmatprep.subr.bf16.mxu0 %v18984_v3 }
 0x904   : > { %17931 = vmatpush3.bf16.msra.mxu0 %v17930_v5 }
 0x905   : > { %17932 = vmatprep.subr.bf16.mxu0 %v18984_v3 }
 0x908   : > { %17934 = vmatpush3.bf16.msra.mxu0 %v17933_v1  ;;  %v18917_v1 = vld [vmem:[%s21270_s7] sm:$0x7f] }
 0x909   : > { %17935 = vmatprep.subr.bf16.mxu0 %v18984_v3 }
 0x90b   : > { %16267 = vmatmul.mubr.f32.vlgmr.msra.gmra.mrb[18].mxu0 %v19172_v44 }
 0x90c   : > { %17937 = vmatpush3.bf16.msra.mxu0 %v17936_v8  ;;  %16285 = vmatprep.mubr.msk.f32.mxu0 %vm18985_vm0, %v18986_v9  ;;  %v3908_v8 = vrot.slane %v18917_v1, %v19888_v7 }
 0x90d   : > { %17938 = vmatprep.subr.bf16.mxu0 %v18984_v3 }
 0x910   : > { %17940 = vmatpush3.bf16.msra.mxu0 %v17939_v20 }
 0x911   : > { %17941 = vmatprep.subr.bf16.mxu0 %v18984_v3 }
 0x914   : > { %17943 = vmatpush3.bf16.msra.mxu0 %v17942_v0 }
 0x915   : > { %17944 = vmatprep.subr.bf16.mxu0 %v18984_v3 }
 0x918   : > { %17946 = vmatpush3.bf16.msra.mxu0 %v17945_v21  ;;  %v3913_v21 = vrot.slane %v18917_v1, %v19891_v23 }
 0x919   : > { %17947 = vmatprep.subr.bf16.mxu0 %v18984_v3 }
 0x91b   : > { %16286 = vmatmul.mubr.f32.vlgmr.msra.gmra.mrb[18].mxu0 %v19190_v54 }
 0x91c   : > { %17949 = vmatpush3.bf16.msra.mxu0 %v19737_v22  ;;  %16304 = vmatprep.mubr.msk.f32.mxu0 %vm18985_vm0, %v18986_v9 }
 0x91d   : > { %17950 = vmatprep.subr.bf16.mxu0 %v18984_v3 }
 0x920   : > { %17952 = vmatpush3.bf16.msra.mxu0 %v19746_v32 }
 0x921   : > { %17953 = vmatprep.subr.bf16.mxu0 %v18984_v3 }
 0x924   : > { %17955 = vmatpush3.bf16.msra.mxu0 %v19761_v19 }
 0x925   : > { %17956 = vmatprep.subr.bf16.mxu0 %v18984_v3 }
 0x928   : > { %17958 = vmatpush3.bf16.msra.mxu0 %v19776_v25 }
 0x929   : > { %17959 = vmatprep.subr.bf16.mxu0 %v18984_v3 }
 0x92b   : > { %16305 = vmatmul.mubr.f32.vlgmr.msra.gmra.mrb[18].mxu0 %v19221_v6 }
 0x92c   : > { %17961 = vmatpush3.bf16.msra.mxu0 %v17960_v28  ;;  %16323 = vmatprep.mubr.msk.f32.mxu0 %vm18985_vm0, %v18986_v9 }
 0x92d   : > { %17962 = vmatprep.subr.bf16.mxu0 %v18984_v3 }
 0x930   : > { %17964 = vmatpush3.bf16.msra.mxu0 %v17963_v29 }
 0x931   : > { %17965 = vmatprep.subr.bf16.mxu0 %v18984_v3 }
 0x934   : > { %17967 = vmatpush3.bf16.msra.mxu0 %v17966_v24 }
 0x935   : > { %17968 = vmatprep.subr.bf16.mxu0 %v18984_v3 }
 0x938   : > { %17970 = vmatpush3.bf16.msra.mxu0 %v17969_v26 }
 0x939   : > { %17971 = vmatprep.subr.bf16.mxu0 %v18984_v3 }
 0x93b   : > { %16324 = vmatmul.mubr.f32.vlgmr.msra.gmra.mrb[18].mxu0 %v19172_v44 }
 0x93c   : > { %17973 = vmatpush3.bf16.msra.mxu0 %v19737_v22  ;;  %16342 = vmatprep.mubr.msk.f32.mxu0 %vm18985_vm0, %v18986_v9 }
 0x93d   : > { %17974 = vmatprep.subr.bf16.mxu0 %v18984_v3 }
 0x940   : > { %17976 = vmatpush3.bf16.msra.mxu0 %v19746_v32 }
 0x941   : > { %17977 = vmatprep.subr.bf16.mxu0 %v18984_v3 }
 0x944   : > { %17979 = vmatpush3.bf16.msra.mxu0 %v19761_v19  ;;  %v3935_v19 = vand.u32 4294901760, %v14700_v53 }
 0x945   : > { %17980 = vmatprep.subr.bf16.mxu0 %v18984_v3 }
 0x946   : > { %v19879_v42 = vpack.c.bf16 %v3935_v19, %v3932_v15  ;;  %v4019_v43 = vsub.f32 %v14700_v53, %v3935_v19  ;;  %v19923_v53 = vld [vmem:[%s21270_s7 + $0x8] sm:$0x7f] }
 0x947   : > { %v4428_v12 = vrot.slane %v19923_v53, %v19376_v57 }
 0x948   : > { %17982 = vmatpush3.bf16.msra.mxu0 %v19776_v25  ;;  %17877 = vmatpush3.bf16.msra.mxu1 %v19879_v42  ;;  %v4013_v25 = vand.u32 4294901760, %v4012_v16  ;;  %v4020_v30 = vand.u32 4294901760, %v4019_v43  ;;  %v17888_v59 = vpack.c.bf16 %v4019_v43, %v4012_v16 }
 0x949   : > { %17995 = vmatprep.subr.bf16.mxu0 %v18984_v3  ;;  %17878 = vmatprep.subr.bf16.mxu1 %v18984_v3 }
 0x94a   : > { %v4014_v49 = vsub.f32 %v4012_v16, %v4013_v25  ;;  %v4021_v50 = vsub.f32 %v4019_v43, %v4020_v30  ;;  %v17900_v61 = vpack.c.bf16 %v4020_v30, %v4013_v25 }
 0x94b   : > { %16343 = vmatmul.mubr.f32.vlgmr.msra.gmra.mrb[18].mxu0 %v19172_v44 }
 0x94c   : > { %16435 = vmatprep.mubr.msk.f32.mxu0 %vm18985_vm0, %v18986_v9  ;;  %v4015_v51 = vand.u32 4294901760, %v4014_v49  ;;  %v4022_v52 = vand.u32 4294901760, %v4021_v50 }
 0x94e   : > { %v17882_v14 = vpack.c.bf16 %v4022_v52, %v4015_v51 }
 0x97b   : > { %v3894_v22 = vpop.xlane.xlu0 %3893 }
 0x97c   : > { %v3895_v27 = vmul.f32 0.03125, %v3894_v22 }
 0x97e   : > { %v3896_v33 = vsub.f32 %v19715_v62, %v3895_v27  ;;  %v14702_v62 = vld [vmem:[%s21265_s2 + $0x38] sm:$0xff] }
 0x97f   : > { %v3941_v41 = vand.u32 4294901760, %v14702_v62 }
 0x980   : > { %v3897_v32 = vmul.f32 %v3896_v33, %v3896_v33 }
 0x981   : > { %v4033_v58 = vsub.f32 %v14702_v62, %v3941_v41  ;;  %v19882_v18 = vpack.c.bf16 %v3941_v41, %v3938_v31  ;;  %v19940_v31 = vld [vmem:[%s21271_s8 + $0x2] sm:$0x3] }
 0x982   : > { %v3898_v37 = vsel %vm362_vm1, %v3897_v32, 0.0  ;;  %v3927_v41 = vrot.slane %v19940_v31, %v19376_v57 }
 0x983   : > { %3899 = vadd.xlane.f32.xlu0 %v3898_v37  ;;  %17880 = vmatpush3.bf16.msra.mxu1 %v19882_v18  ;;  %v4034_v13 = vand.u32 4294901760, %v4033_v58  ;;  %v17891_v60 = vpack.c.bf16 %v4033_v58, %v4026_v48 }
 0x984   : > { %17881 = vmatprep.subr.bf16.mxu1 %v18984_v3 }
 0x985   : > { %v4035_v17 = vsub.f32 %v4033_v58, %v4034_v13  ;;  %v17903_v2 = vpack.c.bf16 %v4034_v13, %v4027_v35 }
 0x987   : > { %v4036_v45 = vand.u32 4294901760, %v4035_v17 }
 0x989   : > { %v17885_v46 = vpack.c.bf16 %v4036_v45, %v4029_v40 }
 0xa10   : > { %v3900_v63 = vpop.xlane.xlu0 %3899 }
 0xa11   : > { %v3901_v4 = vmul.f32 0.03125, %v3900_v63 }
 0xa13   : > { %v3902_v5 = vadd.f32 1e-05, %v3901_v4 }
 0xa15   : > { %18891 = vrsqrt.f32 %v3902_v5 }
 0xa1f   : > { %v18892_v20 = vpop.eup %18891 }
 0xa20   : > { %v3904_v0 = vmul.f32 %v18892_v20, %v3896_v33  ;;  %v4962_v33 = vpop.f32.mrb[18].mxu0 }
 0xa21   : > { %v16344_v38 = vpop.f32.mrb[19].mxu0  ;;  %v18636_v15 = vadd.f32 %v4962_v33, %v4428_v12 }
 0xa22   : > { %v3909_v28 = vmul.f32 %v3908_v8, %v3904_v0 }
 0xa23   : > { %v4970_v19 = vsel %vm362_vm1, %v18636_v15, 0 }
 0xa24   : > { %v19898_v29 = vadd.f32 %v3913_v21, %v3909_v28  ;;  %v4973_v62 = vand.u32 4294901760, %v4970_v19 }
 0xa26   : > { %v3929_v24 = vsel %vm362_vm1, %v19898_v29, 0  ;;  %v5050_v16 = vsub.f32 %v4970_v19, %v4973_v62 }
 0xa27   : > { %v4000_v26 = vand.u32 4294901760, %v3929_v24 }
 0xa28   : > { %v5051_v25 = vand.u32 4294901760, %v5050_v16 }
 0xa29   : > { %v4001_v22 = vsub.f32 %v3929_v24, %v4000_v26 }
 0xa2a   : > { %v5052_v50 = vsub.f32 %v5050_v16, %v5051_v25 }
 0xa2b   : > { %v4002_v27 = vand.u32 4294901760, %v4001_v22 }
 0xa2c   : > { %v5053_v35 = vand.u32 4294901760, %v5052_v50 }
 0xa2d   : > { %v4003_v32 = vsub.f32 %v4001_v22, %v4002_v27 }
 0xa2f   : > { %v4004_v37 = vand.u32 4294901760, %v4003_v32 }
 0xa31   : > { %16174 = vmatmul.mubr.f32.vlgmr.msra.gmra.mrb[18].mxu1 %v4004_v37 }
 0xa32   : > { %17883 = vmatpush3.bf16.msra.mxu1 %v17882_v14  ;;  %16184 = vmatprep.mubr.msk.f32.mxu1 %vm18985_vm0, %v18986_v9 }
 0xa33   : > { %17884 = vmatprep.subr.bf16.mxu1 %v18984_v3 }
 0xa36   : > { %17886 = vmatpush3.bf16.msra.mxu1 %v17885_v46 }
 0xa37   : > { %17887 = vmatprep.subr.bf16.mxu1 %v18984_v3 }
 0xa39   : > { %16185 = vmatmul.mubr.f32.vlgmr.msra.gmra.mrb[18].mxu1 %v4000_v26 }
 0xa3a   : > { %17889 = vmatpush3.bf16.msra.mxu1 %v17888_v59  ;;  %16195 = vmatprep.mubr.msk.f32.mxu1 %vm18985_vm0, %v18986_v9 }
 0xa3b   : > { %17890 = vmatprep.subr.bf16.mxu1 %v18984_v3 }
 0xa3e   : > { %17892 = vmatpush3.bf16.msra.mxu1 %v17891_v60 }
 0xa3f   : > { %17893 = vmatprep.subr.bf16.mxu1 %v18984_v3 }
 0xa41   : > { %16196 = vmatmul.mubr.f32.vlgmr.msra.gmra.mrb[18].mxu1 %v4001_v22 }
 0xa42   : > { %17895 = vmatpush3.bf16.msra.mxu1 %v19879_v42  ;;  %16206 = vmatprep.mubr.msk.f32.mxu1 %vm18985_vm0, %v18986_v9 }
 0xa43   : > { %17896 = vmatprep.subr.bf16.mxu1 %v18984_v3 }
 0xa46   : > { %17898 = vmatpush3.bf16.msra.mxu1 %v19882_v18 }
 0xa47   : > { %17899 = vmatprep.subr.bf16.mxu1 %v18984_v3 }
 0xa49   : > { %16207 = vmatmul.mubr.f32.vlgmr.msra.gmra.mrb[18].mxu1 %v4002_v27 }
 0xa4a   : > { %17901 = vmatpush3.bf16.msra.mxu1 %v17900_v61  ;;  %16217 = vmatprep.mubr.msk.f32.mxu1 %vm18985_vm0, %v18986_v9  ;;  %v14711_v61 = vld [vmem:[%s21267_s4 + $0x20] sm:$0xff] }
 0xa4b   : > { %17902 = vmatprep.subr.bf16.mxu1 %v18984_v3  ;;  %v5895_v63 = vand.u32 4294901760, %v14711_v61 }
 0xa4d   : > { %v19974_v5 = vsub.f32 %v14711_v61, %v5895_v63 }
 0xa4e   : > { %17904 = vmatpush3.bf16.msra.mxu1 %v17903_v2  ;;  %v14712_v2 = vld [vmem:[%s21267_s4 + $0x28] sm:$0xff] }
 0xa4f   : > { %17905 = vmatprep.subr.bf16.mxu1 %v18984_v3  ;;  %v5898_v4 = vand.u32 4294901760, %v14712_v2 }
 0xa51   : > { %16218 = vmatmul.mubr.f32.vlgmr.msra.gmra.mrb[18].mxu1 %v4000_v26  ;;  %v19976_v1 = vsub.f32 %v14712_v2, %v5898_v4 }
 0xa52   : > { %17907 = vmatpush3.bf16.msra.mxu1 %v19879_v42  ;;  %16228 = vmatprep.mubr.msk.f32.mxu1 %vm18985_vm0, %v18986_v9 }
 0xa53   : > { %17908 = vmatprep.subr.bf16.mxu1 %v18984_v3  ;;  %v17996_v8 = vpack.c.bf16 %v19976_v1, %v19974_v5 }
 0xa55   : > { %17997 = vmatpush3.bf16.msra.mxu0 %v17996_v8 }
 0xa56   : > { %17910 = vmatpush3.bf16.msra.mxu1 %v19882_v18  ;;  %17998 = vmatprep.subr.bf16.mxu0 %v18984_v3 }
 0xa57   : > { %16345 = vmatprep.subr.mxu1 %v18986_v9 }
 0xa59   : > { %16229 = vmatmul.mubr.f32.vlgmr.msra.gmra.mrb[18].mxu1 %v4000_v26 }
 0xa5a   : > { %16347 = vmatprep.mubr.msk.f32.mxu1 %vm18985_vm0, %v18986_v9 }
 0xa5f   : > { %16346 = vmatpush3.xpose.msra.mxu1 %v4973_v62 }
 0xa60   : > { %16350 = vmatprep.subr.mxu1 %v18986_v9 }
 0xb2c   : > { %v4412_v42 = vpop.f32.mrb[18].mxu1 }
 0xb2d   : > { %v18635_v43 = vadd.f32 %v4412_v42, %v3927_v41  ;;  %v16230_v48 = vpop.f32.mrb[19].mxu1  ;;  %v14714_v41 = vld [vmem:[%s21267_s4 + $0x38] sm:$0xff] }
 0xb2f   : > { %v4967_v58 = vsel %vm362_vm1, %v18635_v43, 0 }
 0xb30   : > { %v5038_v18 = vand.u32 4294901760, %v4967_v58 }
 0xb32   : > { %v5039_v30 = vsub.f32 %v4967_v58, %v5038_v18 }
 0xb34   : > { %v5040_v49 = vand.u32 4294901760, %v5039_v30 }
 0xb36   : > { %v5041_v51 = vsub.f32 %v5039_v30, %v5040_v49 }
 0xb38   : > { %v5042_v52 = vand.u32 4294901760, %v5041_v51 }
 0xb3a   : > { %16348 = vmatmul.mubr.f32.vlgmr.msra.gmra.mrb[20].mxu1 %v5042_v52 }
 0xb3b   : > { %16351 = vmatpush3.xpose.msra.mxu1 %v5053_v35  ;;  %16352 = vmatprep.mubr.msk.f32.mxu1 %vm18985_vm0, %v18986_v9 }
 0xb3c   : > { %16355 = vmatprep.subr.mxu1 %v18986_v9 }
 0xb42   : > { %16353 = vmatmul.mubr.f32.vlgmr.msra.gmra.mrb[20].mxu1 %v5038_v18 }
 0xb43   : > { %16356 = vmatpush3.xpose.msra.mxu1 %v5050_v16  ;;  %16357 = vmatprep.mubr.msk.f32.mxu1 %vm18985_vm0, %v18986_v9  ;;  %v5904_v16 = vand.u32 4294901760, %v14714_v41 }
 0xb44   : > { %16360 = vmatprep.subr.mxu1 %v18986_v9 }
 0xb45   : > { %v5996_v48 = vsub.f32 %v14714_v41, %v5904_v16 }
 0xb4a   : > { %16358 = vmatmul.mubr.f32.vlgmr.msra.gmra.mrb[20].mxu1 %v5039_v30 }
 0xb4b   : > { %16361 = vmatpush3.xpose.msra.mxu1 %v4973_v62  ;;  %16362 = vmatprep.mubr.msk.f32.mxu1 %vm18985_vm0, %v18986_v9 }
 0xb4c   : > { %16365 = vmatprep.subr.mxu1 %v18986_v9 }
 0xb52   : > { %16363 = vmatmul.mubr.f32.vlgmr.msra.gmra.mrb[20].mxu1 %v5040_v49  ;;  %v5997_v49 = vand.u32 4294901760, %v5996_v48 }
 0xb53   : > { %16366 = vmatpush3.xpose.msra.mxu1 %v5051_v25  ;;  %16367 = vmatprep.mubr.msk.f32.mxu1 %vm18985_vm0, %v18986_v9 }
 0xb54   : > { %16370 = vmatprep.subr.mxu1 %v18986_v9  ;;  %v5998_v52 = vsub.f32 %v5996_v48, %v5997_v49 }
 0xb5a   : > { %16368 = vmatmul.mubr.f32.vlgmr.msra.gmra.mrb[20].mxu1 %v5038_v18 }
 0xb5b   : > { %16371 = vmatpush3.xpose.msra.mxu1 %v4973_v62  ;;  %16372 = vmatprep.mubr.msk.f32.mxu1 %vm18985_vm0, %v18986_v9  ;;  %v14713_v62 = vld [vmem:[%s21267_s4 + $0x30] sm:$0xff] }
 0xb5c   : > { %16375 = vmatprep.subr.mxu1 %v18986_v9  ;;  %v5901_v42 = vand.u32 4294901760, %v14713_v62 }
 0xb5e   : > { %v17987_v25 = vpack.c.bf16 %v5904_v16, %v5901_v42 }
 0xb62   : > { %16373 = vmatmul.mubr.f32.vlgmr.msra.gmra.mrb[20].mxu1 %v5038_v18  ;;  %v17984_v18 = vpack.c.bf16 %v5898_v4, %v5895_v63 }
 0xb63   : > { %16377 = vmatprep.mubr.msk.f32.mxu1 %vm18985_vm0, %v18986_v9 }
 0xc35   : > { %v5414_v13 = vpop.f32.mrb[20].mxu1 }
 0xc36   : > { %v5418_v14 = vsel %vm351_vm3, -1e+30, %v5414_v13  ;;  %v16374_v10 = vpop.f32.mrb[21].mxu1  ;;  %v5999_v13 = vand.u32 4294901760, %v5998_v52  ;;  %v14715_v52 = vld [vmem:[%s21268_s5 + $0x20] sm:$0xff] }
 0xc37   : > { %v5419_v17 = vsel %vm1857_vm4, %v5418_v14, -inf  ;;  %v5976_v10 = vand.u32 4294901760, %v19974_v5 }
 0xc38   : > { %5420 = vmax.xlane.f32.xlu0 %v5419_v17  ;;  %v5983_v17 = vand.u32 4294901760, %v19976_v1 }
 0xc3a   : > { %v18008_v2 = vpack.c.bf16 %v5983_v17, %v5976_v10 }
 0xcc5   : > { %v5421_v40 = vpop.xlane.xlu0 %5420 }
 0xcc6   : > { %v5422_v45 = vsub.f32 %v5418_v14, %v5421_v40 }
 0xcc8   : > { %v5423_v46 = vmul.f32 1.442695, %v5422_v45 }
 0xcca   : > { %18893 = vpow2.f32 %v5423_v46 }
 0xcd4   : > { %v18894_v59 = vpop.eup %18893 }
 0xcd5   : > { %v5425_v60 = vsel %vm1857_vm4, %v18894_v59, 0.0 }
 0xcd6   : > { %5426 = vadd.xlane.f32.xlu0 %v5425_v60  ;;  %v5984_v60 = vsub.f32 %v19976_v1, %v5983_v17 }
 0xcd8   : > { %v5985_v8 = vand.u32 4294901760, %v5984_v60 }
 0xcec   : > { %5430 = vrot.lane.b32.xlu0 %v18635_v43, %s18987_s16  ;;  %v5989_v43 = vsub.f32 %v14713_v62, %v5901_v42 }
 0xcee   : > { %v17999_v58 = vpack.c.bf16 %v5996_v48, %v5989_v43  ;;  %v5990_v30 = vand.u32 4294901760, %v5989_v43 }
 0xcf0   : > { %18000 = vmatpush3.bf16.msra.mxu0 %v17999_v58  ;;  %v18011_v50 = vpack.c.bf16 %v5997_v49, %v5990_v30  ;;  %v5991_v51 = vsub.f32 %v5989_v43, %v5990_v30 }
 0xcf1   : > { %18007 = vmatprep.subr.bf16.mxu0 %v18984_v3 }
 0xcf2   : > { %v5992_v35 = vand.u32 4294901760, %v5991_v51 }
 0xcf4   : > { %v17993_v14 = vpack.c.bf16 %v5999_v13, %v5992_v35  ;;  %v14716_v35 = vld [vmem:[%s21268_s5 + $0x28] sm:$0xff]  ;;  %v6416_v13 = vand.u32 4294901760, %v14715_v52 }
 0xd63   : > { %v5427_v20 = vpop.xlane.xlu0 %5426 }
 0xd64   : > { %18895 = vrcp.f32 %v5427_v20 }
 0xd67   : > { %v5431_v0 = vpop.permute.xlu0 %5430 }
 0xd68   : > { %v5437_v21 = vand.u32 4294901760, %v5431_v0 }
 0xd6a   : > { %16376 = vmatpush3.msra.mxu1 %v5437_v21  ;;  %v5514_v26 = vsub.f32 %v5431_v0, %v5437_v21 }
 0xd6b   : > { %16380 = vmatprep.subr.mxu1 %v18986_v9 }
 0xd6c   : > { %v5515_v32 = vand.u32 4294901760, %v5514_v26 }
 0xd6e   : > { %v18896_v28 = vpop.eup %18895  ;;  %v5516_v38 = vsub.f32 %v5514_v26, %v5515_v32 }
 0xd6f   : > { %v5429_v24 = vmul.f32 %v18896_v28, %v18894_v59  ;;  %v5977_v59 = vsub.f32 %v19974_v5, %v5976_v10  ;;  %v14718_v10 = vld [vmem:[%s21268_s5 + $0x38] sm:$0xff] }
 0xd70   : > { %v5517_v19 = vand.u32 4294901760, %v5516_v38 }
 0xd71   : > { %v5434_v22 = vsel %vm1857_vm4, %v5429_v24, 0  ;;  %v5978_v4 = vand.u32 4294901760, %v5977_v59 }
 0xd72   : > { %v5502_v27 = vand.u32 4294901760, %v5434_v22 }
 0xd74   : > { %v5503_v37 = vsub.f32 %v5434_v22, %v5502_v27 }
 0xd76   : > { %v5504_v33 = vand.u32 4294901760, %v5503_v37 }
 0xd78   : > { %v5505_v12 = vsub.f32 %v5503_v37, %v5504_v33 }
 0xd7a   : > { %v5506_v15 = vand.u32 4294901760, %v5505_v12 }
 0xd7c   : > { %16378 = vmatmul.mubr.f32.vlgmr.msra.gmra.mrb[22].mxu1 %v5506_v15 }
 0xd7d   : > { %16381 = vmatpush3.msra.mxu1 %v5517_v19  ;;  %16382 = vmatprep.mubr.msk.f32.mxu1 %vm18985_vm0, %v18986_v9 }
 0xd7e   : > { %16385 = vmatprep.subr.mxu1 %v18986_v9 }
 0xd84   : > { %16383 = vmatmul.mubr.f32.vlgmr.msra.gmra.mrb[22].mxu1 %v5502_v27 }
 0xd85   : > { %16386 = vmatpush3.msra.mxu1 %v5514_v26  ;;  %16387 = vmatprep.mubr.msk.f32.mxu1 %vm18985_vm0, %v18986_v9 }
 0xd86   : > { %16390 = vmatprep.subr.mxu1 %v18986_v9 }
 0xd8c   : > { %16388 = vmatmul.mubr.f32.vlgmr.msra.gmra.mrb[22].mxu1 %v5503_v37 }
 0xd8d   : > { %16391 = vmatpush3.msra.mxu1 %v5437_v21  ;;  %16392 = vmatprep.mubr.msk.f32.mxu1 %vm18985_vm0, %v18986_v9 }
 0xd8e   : > { %16395 = vmatprep.subr.mxu1 %v18986_v9 }
 0xd94   : > { %16393 = vmatmul.mubr.f32.vlgmr.msra.gmra.mrb[22].mxu1 %v5504_v33 }
 0xd95   : > { %16396 = vmatpush3.msra.mxu1 %v5515_v32  ;;  %16397 = vmatprep.mubr.msk.f32.mxu1 %vm18985_vm0, %v18986_v9 }
 0xd96   : > { %16400 = vmatprep.subr.mxu1 %v18986_v9 }
 0xd9c   : > { %16398 = vmatmul.mubr.f32.vlgmr.msra.gmra.mrb[22].mxu1 %v5502_v27 }
 0xd9d   : > { %16401 = vmatpush3.msra.mxu1 %v5437_v21  ;;  %16402 = vmatprep.mubr.msk.f32.mxu1 %vm18985_vm0, %v18986_v9  ;;  %v17990_v21 = vpack.c.bf16 %v5985_v8, %v5978_v4 }
 0xd9e   : > { %17983 = vmatprep.subr.bf16.mxu1 %v18984_v3 }
 0xda4   : > { %16403 = vmatmul.mubr.f32.vlgmr.msra.gmra.mrb[22].mxu1 %v5502_v27  ;;  %v5890_v27 = vrot.slane %v19923_v53, %v19519_v11 }
 0xda5   : > { %16413 = vmatprep.mubr.msk.f32.mxu1 %vm18985_vm0, %v18986_v9  ;;  %17985 = vmatpush3.bf16.msra.mxu1 %v17984_v18 }
 0xda6   : > { %17986 = vmatprep.subr.bf16.mxu1 %v18984_v3 }
 0xda9   : > { %17988 = vmatpush3.bf16.msra.mxu1 %v17987_v25 }
 0xdaa   : > { %17989 = vmatprep.subr.bf16.mxu1 %v18984_v3 }
 0xe77   : > { %v5878_v40 = vpop.f32.mrb[22].mxu1 }
 0xe78   : > { %v5892_v45 = vsel %vm362_vm1, %v5878_v40, 0  ;;  %v16404_v46 = vpop.f32.mrb[23].mxu1  ;;  %v6425_v40 = vand.u32 4294901760, %v14718_v10 }
 0xe79   : > { %v5963_v61 = vand.u32 4294901760, %v5892_v45  ;;  %v6496_v46 = vsub.f32 %v14715_v52, %v6416_v13 }
 0xe7b   : > { %v5964_v63 = vsub.f32 %v5892_v45, %v5963_v61 }
 0xe7d   : > { %v5965_v20 = vand.u32 4294901760, %v5964_v63  ;;  %16436 = vmatmul.mubr.f32.vlgmr.msra.gmra.mrb[20].mxu0 %v5964_v63 }
 0xe7e   : > { %18009 = vmatpush3.bf16.msra.mxu0 %v18008_v2  ;;  %16457 = vmatprep.mubr.msk.f32.mxu0 %vm18985_vm0, %v18986_v9 }
 0xe7f   : > { %v5966_v0 = vsub.f32 %v5964_v63, %v5965_v20  ;;  %18010 = vmatprep.subr.bf16.mxu0 %v18984_v3  ;;  %v6497_v63 = vand.u32 4294901760, %v6496_v46 }
 0xe81   : > { %v5967_v28 = vand.u32 4294901760, %v5966_v0  ;;  %v6498_v8 = vsub.f32 %v6496_v46, %v6497_v63 }
 0xe82   : > { %18012 = vmatpush3.bf16.msra.mxu0 %v18011_v50 }
 0xe83   : > { %16414 = vmatmul.mubr.f32.vlgmr.msra.gmra.mrb[24].mxu1 %v5967_v28  ;;  %18019 = vmatprep.subr.bf16.mxu0 %v18984_v3  ;;  %v6499_v0 = vand.u32 4294901760, %v6498_v8 }
 0xe84   : > { %17991 = vmatpush3.bf16.msra.mxu1 %v17990_v21  ;;  %16424 = vmatprep.mubr.msk.f32.mxu1 %vm18985_vm0, %v18986_v9 }
 0xe85   : > { %16458 = vmatmul.mubr.f32.vlgmr.msra.gmra.mrb[22].mxu0 %v5963_v61  ;;  %17992 = vmatprep.subr.bf16.mxu1 %v18984_v3 }
 0xe86   : > { %16479 = vmatprep.mubr.msk.f32.mxu0 %vm18985_vm0, %v18986_v9 }
 0xe88   : > { %17994 = vmatpush3.bf16.msra.mxu1 %v17993_v14  ;;  %v6419_v14 = vand.u32 4294901760, %v14716_v35 }
 0xe89   : > { %18001 = vmatprep.subr.bf16.mxu1 %v18984_v3 }
 0xe8a   : > { %v20051_v45 = vpack.c.bf16 %v6419_v14, %v6416_v13  ;;  %v6503_v59 = vsub.f32 %v14716_v35, %v6419_v14 }
 0xe8b   : > { %16425 = vmatmul.mubr.f32.vlgmr.msra.gmra.mrb[26].mxu1 %v5963_v61 }
 0xe8c   : > { %18003 = vmatpush3.bf16.msra.mxu1 %v17984_v18  ;;  %16446 = vmatprep.mubr.msk.f32.mxu1 %vm18985_vm0, %v18986_v9  ;;  %v6504_v4 = vand.u32 4294901760, %v6503_v59 }
 0xe8d   : > { %18004 = vmatprep.subr.bf16.mxu1 %v18984_v3  ;;  %18021 = vmatpush3.bf16.msra.mxu0 %v20051_v45 }
 0xe8e   : > { %18022 = vmatprep.subr.bf16.mxu0 %v18984_v3 }
 0xe90   : > { %18006 = vmatpush3.bf16.msra.mxu1 %v17987_v25 }
 0xe91   : > { %18013 = vmatprep.subr.bf16.mxu1 %v18984_v3 }
 0xe93   : > { %16447 = vmatmul.mubr.f32.vlgmr.msra.gmra.mrb[28].mxu1 %v5965_v20  ;;  %v6505_v20 = vsub.f32 %v6503_v59, %v6504_v4 }
 0xe94   : > { %18015 = vmatpush3.bf16.msra.mxu1 %v17984_v18  ;;  %16468 = vmatprep.mubr.msk.f32.mxu1 %vm18985_vm0, %v18986_v9 }
 0xe95   : > { %18016 = vmatprep.subr.bf16.mxu1 %v18984_v3  ;;  %v6506_v21 = vand.u32 4294901760, %v6505_v20  ;;  %v14725_v20 = vld [vmem:[%s21269_s6 + $0x70] sm:$0xff] }
 0xe98   : > { %18018 = vmatpush3.bf16.msra.mxu1 %v17987_v25 }
 0xe99   : > { %18055 = vmatprep.subr.bf16.mxu1 %v18984_v3 }
 0xe9b   : > { %16469 = vmatmul.mubr.f32.vlgmr.msra.gmra.mrb[30].mxu1 %v5963_v61  ;;  %v6517_v61 = vsub.f32 %v14718_v10, %v6425_v40 }
 0xe9c   : > { %16553 = vmatprep.mubr.msk.f32.mxu1 %vm18985_vm0, %v18986_v9 }
 0xf50   : > { %v6140_v5 = vpop.f32.mrb[20].mxu0 }
 0xf51   : > { %v16437_v1 = vpop.f32.mrb[21].mxu0 }
 0xf52   : > { %v18026_v1 = vpack.c.bf16 %v6506_v21, %v6499_v0  ;;  %v14726_v0 = vld [vmem:[%s21269_s6 + $0x78] sm:$0xff]  ;;  %v6936_v21 = vand.u32 4294901760, %v14725_v20 }
 0xf56   : > { %v5969_v24 = vpop.f32.mrb[24].mxu1 }
 0xf57   : > { %v16415_v26 = vpop.f32.mrb[25].mxu1  ;;  %v5970_v37 = vadd.f32 %v5969_v24, %v5890_v27 }
 0xf58   : > { %v6300_v22 = vpop.f32.mrb[22].mxu0 }
 0xf59   : > { %v16459_v32 = vpop.f32.mrb[23].mxu0 }
 0xf5e   : > { %v6060_v33 = vpop.f32.mrb[26].mxu1 }
 0xf5f   : > { %v6061_v38 = vadd.f32 %v6060_v33, %v5970_v37  ;;  %v16426_v12 = vpop.f32.mrb[27].mxu1  ;;  %v18032_v37 = vpack.c.bf16 %v6503_v59, %v6496_v46 }
 0xf61   : > { %v6141_v15 = vadd.f32 %v6140_v5, %v6061_v38  ;;  %v6518_v5 = vand.u32 4294901760, %v6517_v61  ;;  %v18044_v38 = vpack.c.bf16 %v6504_v4, %v6497_v63 }
 0xf63   : > { %v6519_v26 = vsub.f32 %v6517_v61, %v6518_v5 }
 0xf65   : > { %v6520_v27 = vand.u32 4294901760, %v6519_v26 }
 0xf66   : > { %v6217_v19 = vpop.f32.mrb[28].mxu1 }
 0xf67   : > { %v6218_v62 = vadd.f32 %v6217_v19, %v6141_v15  ;;  %v16448_v41 = vpop.f32.mrb[29].mxu1  ;;  %v14719_v15 = vld [vmem:[%s21269_s6 + $0x40] sm:$0xff]  ;;  %v14720_v19 = vld [vmem:[%s21269_s6 + $0x48] sm:$0xff] }
 0xf68   : > { %v6921_v41 = vand.u32 4294901760, %v14720_v19 }
 0xf69   : > { %v6301_v42 = vadd.f32 %v6300_v22, %v6218_v62  ;;  %v6918_v62 = vand.u32 4294901760, %v14719_v15 }
 0xf6e   : > { %v6375_v16 = vpop.f32.mrb[30].mxu1 }
 0xf6f   : > { %v6376_v43 = vadd.f32 %v6375_v16, %v6301_v42  ;;  %v16470_v48 = vpop.f32.mrb[31].mxu1  ;;  %v20065_v42 = vpack.c.bf16 %v6921_v41, %v6918_v62  ;;  %v20067_v16 = vsub.f32 %v14719_v15, %v6918_v62 }
 0xf71   : > { %v6379_v58 = vadd.f32 %v6376_v43, %v19898_v29  ;;  %v14717_v29 = vld [vmem:[%s21268_s5 + $0x30] sm:$0xff]  ;;  %v20069_v43 = vsub.f32 %v14720_v19, %v6921_v41  ;;  %18057 = vmatpush3.bf16.msra.mxu1 %v20065_v42 }
 0xf72   : > { %v6422_v17 = vand.u32 4294901760, %v14717_v29  ;;  %18058 = vmatprep.subr.bf16.mxu1 %v18984_v3 }
 0xf73   : > { %v6380_v18 = vsel %vm362_vm1, %v6379_v58, 0.0 }
 0xf74   : > { %6381 = vadd.xlane.f32.xlu1 %v6380_v18  ;;  %v6510_v60 = vsub.f32 %v14717_v29, %v6422_v17  ;;  %v20054_v2 = vpack.c.bf16 %v6425_v40, %v6422_v17 }
 0xf76   : > { %18024 = vmatpush3.bf16.msra.mxu0 %v20054_v2  ;;  %v6511_v28 = vand.u32 4294901760, %v6510_v60  ;;  %v18035_v33 = vpack.c.bf16 %v6517_v61, %v6510_v60  ;;  %v14723_v61 = vld [vmem:[%s21269_s6 + $0x60] sm:$0xff] }
 0xf77   : > { %18025 = vmatprep.subr.bf16.mxu0 %v18984_v3  ;;  %v6930_v63 = vand.u32 4294901760, %v14723_v61 }
 0xf78   : > { %v6512_v24 = vsub.f32 %v6510_v60, %v6511_v28  ;;  %v18047_v12 = vpack.c.bf16 %v6518_v5, %v6511_v28  ;;  %v6939_v28 = vand.u32 4294901760, %v14726_v0 }
 0xf79   : > { %v20145_v26 = vsub.f32 %v14723_v61, %v6930_v63 }
 0xf7a   : > { %v6513_v22 = vand.u32 4294901760, %v6512_v24  ;;  %v20139_v5 = vpack.c.bf16 %v6939_v28, %v6936_v21 }
 0xf7c   : > { %v18029_v32 = vpack.c.bf16 %v6520_v27, %v6513_v22  ;;  %v20150_v27 = vsub.f32 %v14725_v20, %v6936_v21 }
0x1001   : > { %v6382_v25 = vpop.xlane.xlu1 %6381 }
0x1002   : > { %v6383_v30 = vmul.f32 0.03125, %v6382_v25  ;;  %v6396_v25 = vrot.slane %v19923_v53, %v19561_v47 }
0x1004   : > { %v6384_v49 = vsub.f32 %v6379_v58, %v6383_v30 }
0x1006   : > { %v6385_v50 = vmul.f32 %v6384_v49, %v6384_v49 }
0x1008   : > { %v6386_v51 = vsel %vm362_vm1, %v6385_v50, 0.0 }
0x1009   : > { %6387 = vadd.xlane.f32.xlu1 %v6386_v51  ;;  %v6401_v51 = vrot.slane %v19923_v53, %v19564_v55 }
0x1096   : > { %v6388_v48 = vpop.xlane.xlu1 %6387 }
0x1097   : > { %v6389_v58 = vmul.f32 0.03125, %v6388_v48 }
0x1099   : > { %v6390_v18 = vadd.f32 1e-05, %v6389_v58 }
0x109b   : > { %18897 = vrsqrt.f32 %v6390_v18 }
0x10a5   : > { %v18898_v30 = vpop.eup %18897 }
0x10a6   : > { %v6392_v50 = vmul.f32 %v18898_v30, %v6384_v49  ;;  %v14721_v49 = vld [vmem:[%s21269_s6 + $0x50] sm:$0xff] }
0x10a7   : > { %v6924_v46 = vand.u32 4294901760, %v14721_v49 }
0x10a8   : > { %v6397_v52 = vmul.f32 %v6396_v25, %v6392_v50  ;;  %v7031_v50 = vand.u32 4294901760, %v20145_v26 }
0x10aa   : > { %v20077_v35 = vadd.f32 %v6401_v51, %v6397_v52 }
0x10ac   : > { %v6413_v29 = vsel %vm362_vm1, %v20077_v35, 0 }
0x10ad   : > { %v6484_v13 = vand.u32 4294901760, %v6413_v29 }
0x10af   : > { %v6485_v14 = vsub.f32 %v6413_v29, %v6484_v13  ;;  %v7032_v29 = vsub.f32 %v20145_v26, %v7031_v50 }
0x10b1   : > { %v6486_v10 = vand.u32 4294901760, %v6485_v14 }
0x10b3   : > { %v6487_v17 = vsub.f32 %v6485_v14, %v6486_v10 }
0x10b5   : > { %v6488_v40 = vand.u32 4294901760, %v6487_v17  ;;  %v7045_v17 = vand.u32 4294901760, %v20150_v27 }
0x10b7   : > { %16480 = vmatmul.mubr.f32.vlgmr.msra.gmra.mrb[24].mxu0 %v6488_v40 }
0x10b8   : > { %18027 = vmatpush3.bf16.msra.mxu0 %v18026_v1  ;;  %16490 = vmatprep.mubr.msk.f32.mxu0 %vm18985_vm0, %v18986_v9  ;;  %v20141_v1 = vsub.f32 %v14721_v49, %v6924_v46 }
0x10b9   : > { %18028 = vmatprep.subr.bf16.mxu0 %v18984_v3 }
0x10ba   : > { %v7017_v62 = vand.u32 4294901760, %v20141_v1 }
0x10bc   : > { %18030 = vmatpush3.bf16.msra.mxu0 %v18029_v32  ;;  %v20152_v32 = vsub.f32 %v14726_v0, %v6939_v28  ;;  %v7018_v58 = vsub.f32 %v20141_v1, %v7017_v62 }
0x10bd   : > { %18031 = vmatprep.subr.bf16.mxu0 %v18984_v3 }
0x10be   : > { %v7019_v25 = vand.u32 4294901760, %v7018_v58  ;;  %v7052_v40 = vand.u32 4294901760, %v20152_v32  ;;  %v18089_v0 = vpack.c.bf16 %v20152_v32, %v20150_v27 }
0x10bf   : > { %16491 = vmatmul.mubr.f32.vlgmr.msra.gmra.mrb[24].mxu0 %v6484_v13 }
0x10c0   : > { %18033 = vmatpush3.bf16.msra.mxu0 %v18032_v37  ;;  %16501 = vmatprep.mubr.msk.f32.mxu0 %vm18985_vm0, %v18986_v9  ;;  %v7003_v37 = vand.u32 4294901760, %v20067_v16 }
0x10c1   : > { %18034 = vmatprep.subr.bf16.mxu0 %v18984_v3 }
0x10c4   : > { %18036 = vmatpush3.bf16.msra.mxu0 %v18035_v33  ;;  %v7010_v33 = vand.u32 4294901760, %v20069_v43 }
0x10c5   : > { %18037 = vmatprep.subr.bf16.mxu0 %v18984_v3 }
0x10c6   : > { %v18104_v21 = vpack.c.bf16 %v7010_v33, %v7003_v37 }
0x10c7   : > { %16502 = vmatmul.mubr.f32.vlgmr.msra.gmra.mrb[24].mxu0 %v6485_v14  ;;  %v7033_v14 = vand.u32 4294901760, %v7032_v29 }
0x10c8   : > { %18039 = vmatpush3.bf16.msra.mxu0 %v20051_v45  ;;  %16512 = vmatprep.mubr.msk.f32.mxu0 %vm18985_vm0, %v18986_v9 }
0x10c9   : > { %18040 = vmatprep.subr.bf16.mxu0 %v18984_v3 }
0x10cc   : > { %18042 = vmatpush3.bf16.msra.mxu0 %v20054_v2 }
0x10cd   : > { %18043 = vmatprep.subr.bf16.mxu0 %v18984_v3 }
0x10cf   : > { %16513 = vmatmul.mubr.f32.vlgmr.msra.gmra.mrb[24].mxu0 %v6486_v10 }
0x10d0   : > { %18045 = vmatpush3.bf16.msra.mxu0 %v18044_v38  ;;  %16523 = vmatprep.mubr.msk.f32.mxu0 %vm18985_vm0, %v18986_v9  ;;  %v7004_v38 = vsub.f32 %v20067_v16, %v7003_v37 }
0x10d1   : > { %18046 = vmatprep.subr.bf16.mxu0 %v18984_v3 }
0x10d2   : > { %v7005_v15 = vand.u32 4294901760, %v7004_v38 }
0x10d4   : > { %18048 = vmatpush3.bf16.msra.mxu0 %v18047_v12  ;;  %v7011_v12 = vsub.f32 %v20069_v43, %v7010_v33 }
0x10d5   : > { %18049 = vmatprep.subr.bf16.mxu0 %v18984_v3 }
0x10d6   : > { %v7012_v19 = vand.u32 4294901760, %v7011_v12  ;;  %v18113_v12 = vpack.c.bf16 %v7052_v40, %v7045_v17 }
0x10d7   : > { %16524 = vmatmul.mubr.f32.vlgmr.msra.gmra.mrb[24].mxu0 %v6484_v13 }
0x10d8   : > { %18051 = vmatpush3.bf16.msra.mxu0 %v20051_v45  ;;  %16534 = vmatprep.mubr.msk.f32.mxu0 %vm18985_vm0, %v18986_v9  ;;  %v14722_v45 = vld [vmem:[%s21269_s6 + $0x58] sm:$0xff]  ;;  %v18068_v48 = vpack.c.bf16 %v7012_v19, %v7005_v15  ;;  %v6411_v15 = vrot.slane %v19940_v31, %v19519_v11 }
0x10d9   : > { %18052 = vmatprep.subr.bf16.mxu0 %v18984_v3  ;;  %v6927_v59 = vand.u32 4294901760, %v14722_v45 }
0x10db   : > { %v20115_v60 = vpack.c.bf16 %v6927_v59, %v6924_v46  ;;  %v20143_v24 = vsub.f32 %v14722_v45, %v6927_v59  ;;  %v7046_v45 = vsub.f32 %v20150_v27, %v7045_v17  ;;  %v7053_v46 = vsub.f32 %v20152_v32, %v7052_v40  ;;  %v14733_v17 = vld [vmem:[%s21266_s3 + $0x80] sm:$0xff]  ;;  %v14734_v40 = vld [vmem:[%s21266_s3 + $0x88] sm:$0xff] }
0x10dc   : > { %18054 = vmatpush3.bf16.msra.mxu0 %v20054_v2  ;;  %v14724_v2 = vld [vmem:[%s21269_s6 + $0x68] sm:$0xff] }
0x10dd   : > { %18091 = vmatprep.subr.bf16.mxu0 %v18984_v3  ;;  %18060 = vmatpush3.bf16.msra.mxu1 %v20115_v60  ;;  %v6933_v4 = vand.u32 4294901760, %v14724_v2  ;;  %v7024_v41 = vand.u32 4294901760, %v20143_v24  ;;  %v7047_v59 = vand.u32 4294901760, %v7046_v45  ;;  %v7054_v61 = vand.u32 4294901760, %v7053_v46 }
0x10de   : > { %18061 = vmatprep.subr.bf16.mxu1 %v18984_v3  ;;  %v7993_v45 = vand.u32 4294901760, %v14733_v17  ;;  %v7996_v46 = vand.u32 4294901760, %v14734_v40 }
0x10df   : > { %16535 = vmatmul.mubr.f32.vlgmr.msra.gmra.mrb[24].mxu0 %v6484_v13  ;;  %v20127_v8 = vpack.c.bf16 %v6933_v4, %v6930_v63  ;;  %v20147_v22 = vsub.f32 %v14724_v2, %v6933_v4  ;;  %v7025_v18 = vsub.f32 %v20143_v24, %v7024_v41  ;;  %v18077_v2 = vpack.c.bf16 %v7054_v61, %v7047_v59  ;;  %v14737_v61 = vld [vmem:[%s21266_s3 + $0xa0] sm:$0xff] }
0x10e0   : > { %18093 = vmatpush3.bf16.msra.mxu0 %v20065_v42  ;;  %16610 = vmatprep.mubr.msk.f32.mxu0 %vm18985_vm0, %v18986_v9  ;;  %v18080_v63 = vpack.c.bf16 %v20069_v43, %v20067_v16  ;;  %v18083_v4 = vpack.c.bf16 %v20143_v24, %v20141_v1  ;;  %v18107_v28 = vpack.c.bf16 %v7024_v41, %v7017_v62 }
0x10e1   : > { %18094 = vmatprep.subr.bf16.mxu0 %v18984_v3  ;;  %18063 = vmatpush3.bf16.msra.mxu1 %v20127_v8  ;;  %v7026_v30 = vand.u32 4294901760, %v7025_v18  ;;  %v7038_v51 = vand.u32 4294901760, %v20147_v22  ;;  %v18086_v20 = vpack.c.bf16 %v20147_v22, %v20145_v26 }
0x10e2   : > { %18064 = vmatprep.subr.bf16.mxu1 %v18984_v3 }
0x10e3   : > { %v18071_v52 = vpack.c.bf16 %v7026_v30, %v7019_v25  ;;  %v7039_v13 = vsub.f32 %v20147_v22, %v7038_v51  ;;  %v18110_v38 = vpack.c.bf16 %v7038_v51, %v7031_v50 }
0x10e4   : > { %18096 = vmatpush3.bf16.msra.mxu0 %v20115_v60 }
0x10e5   : > { %18097 = vmatprep.subr.bf16.mxu0 %v18984_v3  ;;  %18066 = vmatpush3.bf16.msra.mxu1 %v20139_v5  ;;  %v7040_v10 = vand.u32 4294901760, %v7039_v13 }
0x10e6   : > { %18067 = vmatprep.subr.bf16.mxu1 %v18984_v3 }
0x10e7   : > { %v18074_v49 = vpack.c.bf16 %v7040_v10, %v7033_v14 }
0x10e8   : > { %18099 = vmatpush3.bf16.msra.mxu0 %v20127_v8 }
0x10e9   : > { %18100 = vmatprep.subr.bf16.mxu0 %v18984_v3 }
0x10ec   : > { %18102 = vmatpush3.bf16.msra.mxu0 %v20139_v5 }
0x10ed   : > { %18115 = vmatprep.subr.bf16.mxu0 %v18984_v3 }
0x11b2   : > { %v6896_v19 = vpop.f32.mrb[24].mxu0 }
0x11b3   : > { %v18637_v58 = vadd.f32 %v6896_v19, %v6411_v15  ;;  %v16536_v18 = vpop.f32.mrb[25].mxu0  ;;  %v14739_v19 = vld [vmem:[%s21266_s3 + $0xb0] sm:$0xff] }
0x11b5   : > { %v6900_v16 = vmax.f32 %v18637_v58, 0.0  ;;  %v14740_v58 = vld [vmem:[%s21266_s3 + $0xb8] sm:$0xff] }
0x11b7   : > { %v6915_v43 = vsel %vm863_vm2, %v6900_v16, 0 }
0x11b8   : > { %v6990_v1 = vand.u32 4294901760, %v6915_v43 }
0x11ba   : > { %v6991_v24 = vsub.f32 %v6915_v43, %v6990_v1 }
0x11bc   : > { %v6992_v25 = vand.u32 4294901760, %v6991_v24 }
0x11be   : > { %16611 = vmatmul.mubr.f32.vlgmr.msra.gmra.mrb[26].mxu0 %v6992_v25  ;;  %v6993_v26 = vsub.f32 %v6991_v24, %v6992_v25  ;;  %v8014_v25 = vand.u32 4294901760, %v14740_v58 }
0x11bf   : > { %18117 = vmatpush3.bf16.msra.mxu0 %v20065_v42  ;;  %16648 = vmatprep.mubr.msk.f32.mxu0 %vm18985_vm0, %v18986_v9 }
0x11c0   : > { %18118 = vmatprep.subr.bf16.mxu0 %v18984_v3  ;;  %v6994_v22 = vand.u32 4294901760, %v6993_v26 }
0x11c2   : > { %16554 = vmatmul.mubr.f32.vlgmr.msra.gmra.mrb[32].mxu1 %v6994_v22 }
0x11c3   : > { %18069 = vmatpush3.bf16.msra.mxu1 %v18068_v48  ;;  %18120 = vmatpush3.bf16.msra.mxu0 %v20115_v60 }
0x11c4   : > { %18070 = vmatprep.subr.bf16.mxu1 %v18984_v3  ;;  %18121 = vmatprep.subr.bf16.mxu0 %v18984_v3 }
0x11c5   : > { %16572 = vmatprep.mubr.msk.f32.mxu1 %vm18985_vm0, %v18986_v9 }
0x11c7   : > { %18072 = vmatpush3.bf16.msra.mxu1 %v18071_v52  ;;  %18123 = vmatpush3.bf16.msra.mxu0 %v20127_v8 }
0x11c8   : > { %18073 = vmatprep.subr.bf16.mxu1 %v18984_v3  ;;  %18124 = vmatprep.subr.bf16.mxu0 %v18984_v3 }
0x11cb   : > { %18075 = vmatpush3.bf16.msra.mxu1 %v18074_v49  ;;  %18126 = vmatpush3.bf16.msra.mxu0 %v20139_v5  ;;  %v6913_v5 = vrot.slane %v19923_v53, %v19710_v39  ;;  %v14735_v49 = vld [vmem:[%s21266_s3 + $0x90] sm:$0xff] }
0x11cc   : > { %18076 = vmatprep.subr.bf16.mxu1 %v18984_v3  ;;  %18163 = vmatprep.subr.bf16.mxu0 %v18984_v3  ;;  %v7999_v59 = vand.u32 4294901760, %v14735_v49 }
0x11ce   : > { %16649 = vmatmul.mubr.f32.vlgmr.msra.gmra.mrb[28].mxu0 %v6990_v1 }
0x11cf   : > { %18078 = vmatpush3.bf16.msra.mxu1 %v18077_v2  ;;  %16733 = vmatprep.mubr.msk.f32.mxu0 %vm18985_vm0, %v18986_v9  ;;  %v14738_v2 = vld [vmem:[%s21266_s3 + $0xa8] sm:$0xff] }
0x11d0   : > { %18079 = vmatprep.subr.bf16.mxu1 %v18984_v3 }
0x11d2   : > { %16573 = vmatmul.mubr.f32.vlgmr.msra.gmra.mrb[34].mxu1 %v6990_v1 }
0x11d3   : > { %18081 = vmatpush3.bf16.msra.mxu1 %v18080_v63  ;;  %16591 = vmatprep.mubr.msk.f32.mxu1 %vm18985_vm0, %v18986_v9 }
0x11d4   : > { %18082 = vmatprep.subr.bf16.mxu1 %v18984_v3 }
0x11d7   : > { %18084 = vmatpush3.bf16.msra.mxu1 %v18083_v4  ;;  %v20241_v4 = vpack.c.bf16 %v7996_v46, %v7993_v45 }
0x11d8   : > { %18085 = vmatprep.subr.bf16.mxu1 %v18984_v3 }
0x11d9   : > { %18165 = vmatpush3.bf16.msra.mxu0 %v20241_v4 }
0x11da   : > { %18166 = vmatprep.subr.bf16.mxu0 %v18984_v3 }
0x11db   : > { %18087 = vmatpush3.bf16.msra.mxu1 %v18086_v20  ;;  %v20243_v20 = vsub.f32 %v14733_v17, %v7993_v45 }
0x11dc   : > { %18088 = vmatprep.subr.bf16.mxu1 %v18984_v3 }
0x11dd   : > { %v8078_v18 = vand.u32 4294901760, %v20243_v20 }
0x11df   : > { %18090 = vmatpush3.bf16.msra.mxu1 %v18089_v0  ;;  %v20245_v0 = vsub.f32 %v14734_v40, %v7996_v46 }
0x11e0   : > { %18103 = vmatprep.subr.bf16.mxu1 %v18984_v3 }
0x11e1   : > { %v8085_v16 = vand.u32 4294901760, %v20245_v0 }
0x11e2   : > { %16592 = vmatmul.mubr.f32.vlgmr.msra.gmra.mrb[36].mxu1 %v6991_v24  ;;  %v8011_v24 = vand.u32 4294901760, %v14739_v19 }
0x11e3   : > { %18105 = vmatpush3.bf16.msra.mxu1 %v18104_v21  ;;  %16629 = vmatprep.mubr.msk.f32.mxu1 %vm18985_vm0, %v18986_v9  ;;  %v20247_v21 = vsub.f32 %v14735_v49, %v7999_v59 }
0x11e4   : > { %18106 = vmatprep.subr.bf16.mxu1 %v18984_v3 }
0x11e5   : > { %v8092_v26 = vand.u32 4294901760, %v20247_v21 }
0x11e7   : > { %18108 = vmatpush3.bf16.msra.mxu1 %v18107_v28  ;;  %v8005_v28 = vand.u32 4294901760, %v14737_v61 }
0x11e8   : > { %18109 = vmatprep.subr.bf16.mxu1 %v18984_v3 }
0x11e9   : > { %v20263_v43 = vsub.f32 %v14737_v61, %v8005_v28 }
0x11eb   : > { %18111 = vmatpush3.bf16.msra.mxu1 %v18110_v38  ;;  %v8008_v38 = vand.u32 4294901760, %v14738_v2 }
0x11ec   : > { %18112 = vmatprep.subr.bf16.mxu1 %v18984_v3 }
0x11ed   : > { %v20269_v22 = vsub.f32 %v14738_v2, %v8008_v38  ;;  %v18188_v2 = vpack.c.bf16 %v20245_v0, %v20243_v20 }
0x11ef   : > { %18114 = vmatpush3.bf16.msra.mxu1 %v18113_v12 }
0x11f0   : > { %18127 = vmatprep.subr.bf16.mxu1 %v18984_v3 }
0x11f2   : > { %16630 = vmatmul.mubr.f32.vlgmr.msra.gmra.mrb[38].mxu1 %v6990_v1  ;;  %v20265_v1 = vpack.c.bf16 %v8008_v38, %v8005_v28  ;;  %v18194_v28 = vpack.c.bf16 %v20269_v22, %v20263_v43 }
0x11f3   : > { %16659 = vmatprep.mubr.msk.f32.mxu1 %vm18985_vm0, %v18986_v9 }
0x1291   : > { %v7276_v31 = vpop.f32.mrb[26].mxu0 }
0x1292   : > { %v16612_v42 = vpop.f32.mrb[27].mxu0 }
0x1293   : > { %v8086_v42 = vsub.f32 %v20245_v0, %v8085_v16 }
0x1295   : > { %v6996_v60 = vpop.f32.mrb[32].mxu1 }
0x1296   : > { %v16555_v8 = vpop.f32.mrb[33].mxu1  ;;  %v6997_v37 = vadd.f32 %v6996_v60, %v6913_v5  ;;  %v20280_v5 = vpack.c.bf16 %v8014_v25, %v8011_v24 }
0x1297   : > { %v8106_v8 = vand.u32 4294901760, %v20263_v43 }
0x12a1   : > { %v7450_v27 = vpop.f32.mrb[28].mxu0 }
0x12a2   : > { %v16650_v32 = vpop.f32.mrb[29].mxu0 }
0x12a3   : > { %v20284_v32 = vsub.f32 %v14740_v58, %v8014_v25 }
0x12a5   : > { %v7107_v33 = vpop.f32.mrb[34].mxu1 }
0x12a6   : > { %v7108_v62 = vadd.f32 %v7107_v33, %v6997_v37  ;;  %v16574_v41 = vpop.f32.mrb[35].mxu1  ;;  %v8093_v37 = vsub.f32 %v20247_v21, %v8092_v26 }
0x12b5   : > { %v7195_v48 = vpop.f32.mrb[36].mxu1 }
0x12b6   : > { %v7196_v30 = vadd.f32 %v7195_v48, %v7108_v62  ;;  %v16593_v50 = vpop.f32.mrb[37].mxu1  ;;  %v8087_v62 = vand.u32 4294901760, %v8086_v42  ;;  %v8113_v48 = vand.u32 4294901760, %v20269_v22 }
0x12b8   : > { %v7277_v51 = vadd.f32 %v7276_v31, %v7196_v30  ;;  %v8079_v31 = vsub.f32 %v20243_v20, %v8078_v18  ;;  %v8107_v30 = vsub.f32 %v20263_v43, %v8106_v8  ;;  %v18218_v20 = vpack.c.bf16 %v8113_v48, %v8106_v8  ;;  %v14730_v43 = vld [vmem:[%s21265_s2 + $0x48] sm:$0xff] }
0x12b9   : > { %v7498_v25 = vand.u32 4294901760, %v14730_v43 }
0x12ba   : > { %v8080_v33 = vand.u32 4294901760, %v8079_v31 }
0x12c5   : > { %v7371_v52 = vpop.f32.mrb[38].mxu1 }
0x12c6   : > { %v7372_v29 = vadd.f32 %v7371_v52, %v7277_v51  ;;  %v16631_v13 = vpop.f32.mrb[39].mxu1  ;;  %v8127_v51 = vand.u32 4294901760, %v20284_v32  ;;  %v18176_v52 = vpack.c.bf16 %v8087_v62, %v8080_v33 }
0x12c8   : > { %v7451_v14 = vadd.f32 %v7450_v27, %v7372_v29  ;;  %v20282_v27 = vsub.f32 %v14739_v19, %v8011_v24  ;;  %v8094_v29 = vand.u32 4294901760, %v8093_v37  ;;  %v8128_v45 = vsub.f32 %v20284_v32, %v8127_v51 }
0x12c9   : > { %v18212_v19 = vpack.c.bf16 %v8085_v16, %v8078_v18  ;;  %v14729_v16 = vld [vmem:[%s21265_s2 + $0x40] sm:$0xff] }
0x12ca   : > { %v20219_v10 = vadd.f32 %v7451_v14, %v20077_v35  ;;  %v14736_v35 = vld [vmem:[%s21266_s3 + $0x98] sm:$0xff]  ;;  %v8120_v50 = vand.u32 4294901760, %v20282_v27  ;;  %v8114_v14 = vsub.f32 %v20269_v22, %v8113_v48  ;;  %v18197_v38 = vpack.c.bf16 %v20284_v32, %v20282_v27 }
0x12cb   : > { %v8002_v63 = vand.u32 4294901760, %v14736_v35  ;;  %v7495_v24 = vand.u32 4294901760, %v14729_v16 }
0x12cc   : > { %v7455_v53 = vsel %vm362_vm1, %v20219_v10, 0.0  ;;  %v8115_v40 = vand.u32 4294901760, %v8114_v14  ;;  %v8121_v49 = vsub.f32 %v20282_v27, %v8120_v50  ;;  %v18221_v0 = vpack.c.bf16 %v8127_v51, %v8120_v50 }
0x12cd   : > { %7456 = vadd.xlane.f32.xlu1 %v7455_v53  ;;  %v20250_v12 = vpack.c.bf16 %v8002_v63, %v7999_v59  ;;  %v20252_v15 = vsub.f32 %v14736_v35, %v8002_v63  ;;  %v8108_v53 = vand.u32 4294901760, %v8107_v30  ;;  %v8129_v59 = vand.u32 4294901760, %v8128_v45 }
0x12ce   : > { %v8122_v35 = vand.u32 4294901760, %v8121_v49  ;;  %v20383_v31 = vpack.c.bf16 %v7498_v25, %v7495_v24  ;;  %v7575_v42 = vsub.f32 %v14729_v16, %v7495_v24 }
0x12cf   : > { %18168 = vmatpush3.bf16.msra.mxu0 %v20250_v12  ;;  %v8099_v60 = vand.u32 4294901760, %v20252_v15  ;;  %v18182_v46 = vpack.c.bf16 %v8115_v40, %v8108_v53  ;;  %v18191_v63 = vpack.c.bf16 %v20252_v15, %v20247_v21 }
0x12d0   : > { %18169 = vmatprep.subr.bf16.mxu0 %v18984_v3  ;;  %v18185_v61 = vpack.c.bf16 %v8129_v59, %v8122_v35  ;;  %18129 = vmatpush3.bf16.msra.mxu1 %v20383_v31  ;;  %v7576_v32 = vand.u32 4294901760, %v7575_v42 }
0x12d1   : > { %v8100_v41 = vsub.f32 %v20252_v15, %v8099_v60  ;;  %v18215_v58 = vpack.c.bf16 %v8099_v60, %v8092_v26  ;;  %v7582_v60 = vsub.f32 %v14730_v43, %v7498_v25  ;;  %18130 = vmatprep.subr.bf16.mxu1 %v18984_v3  ;;  %v20421_v43 = vld [vmem:[%s21270_s7 + $0x10] sm:$0x7f] }
0x12d2   : > { %v7577_v33 = vsub.f32 %v7575_v42, %v7576_v32 }
0x12d3   : > { %18171 = vmatpush3.bf16.msra.mxu0 %v20265_v1  ;;  %v8101_v13 = vand.u32 4294901760, %v8100_v41  ;;  %v7583_v37 = vand.u32 4294901760, %v7582_v60 }
0x12d4   : > { %18172 = vmatprep.subr.bf16.mxu0 %v18984_v3  ;;  %v7578_v41 = vand.u32 4294901760, %v7577_v33 }
0x12d5   : > { %v18179_v17 = vpack.c.bf16 %v8101_v13, %v8094_v29  ;;  %v7584_v62 = vsub.f32 %v7582_v60, %v7583_v37  ;;  %v18152_v49 = vpack.c.bf16 %v7583_v37, %v7576_v32 }
0x12d7   : > { %18174 = vmatpush3.bf16.msra.mxu0 %v20280_v5  ;;  %v7585_v48 = vand.u32 4294901760, %v7584_v62 }
0x12d8   : > { %18175 = vmatprep.subr.bf16.mxu0 %v18984_v3 }
0x12d9   : > { %v18134_v51 = vpack.c.bf16 %v7585_v48, %v7578_v41 }
0x12da   : > { %16734 = vmatmul.mubr.f32.vlgmr.msra.gmra.mrb[30].mxu0 %v19259_v36 }
0x12db   : > { %18177 = vmatpush3.bf16.msra.mxu0 %v18176_v52  ;;  %16752 = vmatprep.mubr.msk.f32.mxu0 %vm18985_vm0, %v18986_v9 }
0x12dc   : > { %18178 = vmatprep.subr.bf16.mxu0 %v18984_v3 }
0x12df   : > { %18180 = vmatpush3.bf16.msra.mxu0 %v18179_v17  ;;  %v18140_v17 = vpack.c.bf16 %v7582_v60, %v7575_v42 }
0x12e0   : > { %18181 = vmatprep.subr.bf16.mxu0 %v18984_v3 }
0x12e3   : > { %18183 = vmatpush3.bf16.msra.mxu0 %v18182_v46 }
0x12e4   : > { %18184 = vmatprep.subr.bf16.mxu0 %v18984_v3 }
0x12e7   : > { %18186 = vmatpush3.bf16.msra.mxu0 %v18185_v61  ;;  %v18918_v61 = vld [vmem:[%s21270_s7 + $0x8] sm:$0x7f] }
0x12e8   : > { %18187 = vmatprep.subr.bf16.mxu0 %v18984_v3 }
0x12ea   : > { %16753 = vmatmul.mubr.f32.vlgmr.msra.gmra.mrb[30].mxu0 %v19172_v44 }
0x12eb   : > { %18189 = vmatpush3.bf16.msra.mxu0 %v18188_v2  ;;  %16771 = vmatprep.mubr.msk.f32.mxu0 %vm18985_vm0, %v18986_v9  ;;  %v7471_v2 = vrot.slane %v18918_v61, %v19888_v7 }
0x12ec   : > { %18190 = vmatprep.subr.bf16.mxu0 %v18984_v3 }
0x12ef   : > { %18192 = vmatpush3.bf16.msra.mxu0 %v18191_v63 }
0x12f0   : > { %18193 = vmatprep.subr.bf16.mxu0 %v18984_v3 }
0x12f3   : > { %18195 = vmatpush3.bf16.msra.mxu0 %v18194_v28 }
0x12f4   : > { %18196 = vmatprep.subr.bf16.mxu0 %v18984_v3 }
0x12f7   : > { %18198 = vmatpush3.bf16.msra.mxu0 %v18197_v38  ;;  %v7476_v38 = vrot.slane %v18918_v61, %v19891_v23 }
0x12f8   : > { %18199 = vmatprep.subr.bf16.mxu0 %v18984_v3 }
0x12fa   : > { %16772 = vmatmul.mubr.f32.vlgmr.msra.gmra.mrb[30].mxu0 %v19190_v54 }
0x12fb   : > { %18201 = vmatpush3.bf16.msra.mxu0 %v20241_v4  ;;  %16790 = vmatprep.mubr.msk.f32.mxu0 %vm18985_vm0, %v18986_v9 }
0x12fc   : > { %18202 = vmatprep.subr.bf16.mxu0 %v18984_v3 }
0x12ff   : > { %18204 = vmatpush3.bf16.msra.mxu0 %v20250_v12 }
0x1300   : > { %18205 = vmatprep.subr.bf16.mxu0 %v18984_v3 }
0x1303   : > { %18207 = vmatpush3.bf16.msra.mxu0 %v20265_v1 }
0x1304   : > { %18208 = vmatprep.subr.bf16.mxu0 %v18984_v3 }
0x1307   : > { %18210 = vmatpush3.bf16.msra.mxu0 %v20280_v5 }
0x1308   : > { %18211 = vmatprep.subr.bf16.mxu0 %v18984_v3 }
0x130a   : > { %16791 = vmatmul.mubr.f32.vlgmr.msra.gmra.mrb[30].mxu0 %v19221_v6 }
0x130b   : > { %18213 = vmatpush3.bf16.msra.mxu0 %v18212_v19  ;;  %16809 = vmatprep.mubr.msk.f32.mxu0 %vm18985_vm0, %v18986_v9 }
0x130c   : > { %18214 = vmatprep.subr.bf16.mxu0 %v18984_v3 }
0x130f   : > { %18216 = vmatpush3.bf16.msra.mxu0 %v18215_v58 }
0x1310   : > { %18217 = vmatprep.subr.bf16.mxu0 %v18984_v3 }
0x1313   : > { %18219 = vmatpush3.bf16.msra.mxu0 %v18218_v20 }
0x1314   : > { %18220 = vmatprep.subr.bf16.mxu0 %v18984_v3 }
0x1317   : > { %18222 = vmatpush3.bf16.msra.mxu0 %v18221_v0 }
0x1318   : > { %18223 = vmatprep.subr.bf16.mxu0 %v18984_v3 }
0x131a   : > { %16810 = vmatmul.mubr.f32.vlgmr.msra.gmra.mrb[30].mxu0 %v19172_v44 }
0x131b   : > { %18225 = vmatpush3.bf16.msra.mxu0 %v20241_v4  ;;  %16828 = vmatprep.mubr.msk.f32.mxu0 %vm18985_vm0, %v18986_v9 }
0x131c   : > { %18226 = vmatprep.subr.bf16.mxu0 %v18984_v3 }
0x131f   : > { %18228 = vmatpush3.bf16.msra.mxu0 %v20250_v12 }
0x1320   : > { %18229 = vmatprep.subr.bf16.mxu0 %v18984_v3 }
0x1323   : > { %18231 = vmatpush3.bf16.msra.mxu0 %v20265_v1  ;;  %v14731_v1 = vld [vmem:[%s21265_s2 + $0x50] sm:$0xff] }
0x1324   : > { %18232 = vmatprep.subr.bf16.mxu0 %v18984_v3  ;;  %v7501_v26 = vand.u32 4294901760, %v14731_v1 }
0x1326   : > { %v7589_v8 = vsub.f32 %v14731_v1, %v7501_v26  ;;  %v7991_v1 = vrot.slane %v20421_v43, %v19376_v57 }
0x1327   : > { %18234 = vmatpush3.bf16.msra.mxu0 %v20280_v5 }
0x1328   : > { %18247 = vmatprep.subr.bf16.mxu0 %v18984_v3  ;;  %v7590_v30 = vand.u32 4294901760, %v7589_v8 }
0x132a   : > { %16829 = vmatmul.mubr.f32.vlgmr.msra.gmra.mrb[30].mxu0 %v19172_v44  ;;  %v7591_v52 = vsub.f32 %v7589_v8, %v7590_v30 }
0x132b   : > { %16921 = vmatprep.mubr.msk.f32.mxu0 %vm18985_vm0, %v18986_v9 }
0x132c   : > { %v7592_v13 = vand.u32 4294901760, %v7591_v52 }
0x135a   : > { %v7457_v4 = vpop.xlane.xlu1 %7456 }
0x135b   : > { %v7458_v21 = vmul.f32 0.03125, %v7457_v4 }
0x135d   : > { %v7459_v15 = vsub.f32 %v20219_v10, %v7458_v21  ;;  %v14732_v10 = vld [vmem:[%s21265_s2 + $0x58] sm:$0xff] }
0x135e   : > { %v7504_v22 = vand.u32 4294901760, %v14732_v10 }
0x135f   : > { %v7460_v12 = vmul.f32 %v7459_v15, %v7459_v15 }
0x1360   : > { %v7596_v5 = vsub.f32 %v14732_v10, %v7504_v22  ;;  %v20386_v27 = vpack.c.bf16 %v7504_v22, %v7501_v26  ;;  %v20438_v26 = vld [vmem:[%s21271_s8 + $0x4] sm:$0x3] }
0x1361   : > { %v7461_v18 = vsel %vm362_vm1, %v7460_v12, 0.0  ;;  %v7490_v22 = vrot.slane %v20438_v26, %v19376_v57 }
0x1362   : > { %7462 = vadd.xlane.f32.xlu0 %v7461_v18  ;;  %18132 = vmatpush3.bf16.msra.mxu1 %v20386_v27  ;;  %v7597_v50 = vand.u32 4294901760, %v7596_v5  ;;  %v18143_v40 = vpack.c.bf16 %v7596_v5, %v7589_v8 }
0x1363   : > { %18133 = vmatprep.subr.bf16.mxu1 %v18984_v3 }
0x1364   : > { %v7598_v29 = vsub.f32 %v7596_v5, %v7597_v50  ;;  %v18155_v45 = vpack.c.bf16 %v7597_v50, %v7590_v30 }
0x1366   : > { %v7599_v14 = vand.u32 4294901760, %v7598_v29 }
0x1368   : > { %v18137_v53 = vpack.c.bf16 %v7599_v14, %v7592_v13 }
0x13ef   : > { %v7463_v46 = vpop.xlane.xlu0 %7462 }
0x13f0   : > { %v7464_v35 = vmul.f32 0.03125, %v7463_v46 }
0x13f2   : > { %v7465_v59 = vadd.f32 1e-05, %v7464_v35 }
0x13f4   : > { %18899 = vrsqrt.f32 %v7465_v59 }
0x13fe   : > { %v18900_v63 = vpop.eup %18899 }
0x13ff   : > { %v7467_v28 = vmul.f32 %v18900_v63, %v7459_v15  ;;  %v8525_v15 = vpop.f32.mrb[30].mxu0 }
0x1400   : > { %v16830_v16 = vpop.f32.mrb[31].mxu0  ;;  %v18639_v24 = vadd.f32 %v8525_v15, %v7991_v1 }
0x1401   : > { %v7472_v19 = vmul.f32 %v7471_v2, %v7467_v28 }
0x1402   : > { %v8533_v25 = vsel %vm362_vm1, %v18639_v24, 0 }
0x1403   : > { %v20396_v58 = vadd.f32 %v7476_v38, %v7472_v19  ;;  %v8536_v10 = vand.u32 4294901760, %v8533_v25 }
0x1405   : > { %v7492_v20 = vsel %vm362_vm1, %v20396_v58, 0  ;;  %v8613_v42 = vsub.f32 %v8533_v25, %v8536_v10 }
0x1406   : > { %v7563_v0 = vand.u32 4294901760, %v7492_v20 }
0x1407   : > { %v8614_v32 = vand.u32 4294901760, %v8613_v42 }
0x1408   : > { %v7564_v4 = vsub.f32 %v7492_v20, %v7563_v0 }
0x1409   : > { %v8615_v62 = vsub.f32 %v8613_v42, %v8614_v32 }
0x140a   : > { %v7565_v21 = vand.u32 4294901760, %v7564_v4 }
0x140b   : > { %v8616_v30 = vand.u32 4294901760, %v8615_v62 }
0x140c   : > { %v7566_v12 = vsub.f32 %v7564_v4, %v7565_v21 }
0x140e   : > { %v7567_v18 = vand.u32 4294901760, %v7566_v12 }
0x1410   : > { %16660 = vmatmul.mubr.f32.vlgmr.msra.gmra.mrb[40].mxu1 %v7567_v18 }
0x1411   : > { %18135 = vmatpush3.bf16.msra.mxu1 %v18134_v51  ;;  %16670 = vmatprep.mubr.msk.f32.mxu1 %vm18985_vm0, %v18986_v9 }
0x1412   : > { %18136 = vmatprep.subr.bf16.mxu1 %v18984_v3 }
0x1415   : > { %18138 = vmatpush3.bf16.msra.mxu1 %v18137_v53 }
0x1416   : > { %18139 = vmatprep.subr.bf16.mxu1 %v18984_v3 }
0x1418   : > { %16671 = vmatmul.mubr.f32.vlgmr.msra.gmra.mrb[40].mxu1 %v7563_v0 }
0x1419   : > { %18141 = vmatpush3.bf16.msra.mxu1 %v18140_v17  ;;  %16681 = vmatprep.mubr.msk.f32.mxu1 %vm18985_vm0, %v18986_v9 }
0x141a   : > { %18142 = vmatprep.subr.bf16.mxu1 %v18984_v3 }
0x141d   : > { %18144 = vmatpush3.bf16.msra.mxu1 %v18143_v40 }
0x141e   : > { %18145 = vmatprep.subr.bf16.mxu1 %v18984_v3 }
0x1420   : > { %16682 = vmatmul.mubr.f32.vlgmr.msra.gmra.mrb[40].mxu1 %v7564_v4 }
0x1421   : > { %18147 = vmatpush3.bf16.msra.mxu1 %v20383_v31  ;;  %16692 = vmatprep.mubr.msk.f32.mxu1 %vm18985_vm0, %v18986_v9 }
0x1422   : > { %18148 = vmatprep.subr.bf16.mxu1 %v18984_v3 }
0x1425   : > { %18150 = vmatpush3.bf16.msra.mxu1 %v20386_v27 }
0x1426   : > { %18151 = vmatprep.subr.bf16.mxu1 %v18984_v3 }
0x1428   : > { %16693 = vmatmul.mubr.f32.vlgmr.msra.gmra.mrb[40].mxu1 %v7565_v21 }
0x1429   : > { %18153 = vmatpush3.bf16.msra.mxu1 %v18152_v49  ;;  %16703 = vmatprep.mubr.msk.f32.mxu1 %vm18985_vm0, %v18986_v9  ;;  %v14741_v49 = vld [vmem:[%s21267_s4 + $0x40] sm:$0xff] }
0x142a   : > { %18154 = vmatprep.subr.bf16.mxu1 %v18984_v3  ;;  %v9458_v46 = vand.u32 4294901760, %v14741_v49 }
0x142c   : > { %v20472_v59 = vsub.f32 %v14741_v49, %v9458_v46 }
0x142d   : > { %18156 = vmatpush3.bf16.msra.mxu1 %v18155_v45  ;;  %v14742_v45 = vld [vmem:[%s21267_s4 + $0x48] sm:$0xff] }
0x142e   : > { %18157 = vmatprep.subr.bf16.mxu1 %v18984_v3  ;;  %v9461_v35 = vand.u32 4294901760, %v14742_v45 }
0x1430   : > { %16704 = vmatmul.mubr.f32.vlgmr.msra.gmra.mrb[40].mxu1 %v7563_v0  ;;  %v20474_v61 = vsub.f32 %v14742_v45, %v9461_v35 }
0x1431   : > { %18159 = vmatpush3.bf16.msra.mxu1 %v20383_v31  ;;  %16714 = vmatprep.mubr.msk.f32.mxu1 %vm18985_vm0, %v18986_v9 }
0x1432   : > { %18160 = vmatprep.subr.bf16.mxu1 %v18984_v3  ;;  %v18248_v2 = vpack.c.bf16 %v20474_v61, %v20472_v59 }
0x1434   : > { %18249 = vmatpush3.bf16.msra.mxu0 %v18248_v2 }
0x1435   : > { %18162 = vmatpush3.bf16.msra.mxu1 %v20386_v27  ;;  %18250 = vmatprep.subr.bf16.mxu0 %v18984_v3 }
0x1436   : > { %16831 = vmatprep.subr.mxu1 %v18986_v9 }
0x1438   : > { %16715 = vmatmul.mubr.f32.vlgmr.msra.gmra.mrb[40].mxu1 %v7563_v0 }
0x1439   : > { %16833 = vmatprep.mubr.msk.f32.mxu1 %vm18985_vm0, %v18986_v9 }
0x143e   : > { %16832 = vmatpush3.xpose.msra.mxu1 %v8536_v10 }
0x143f   : > { %16836 = vmatprep.subr.mxu1 %v18986_v9 }
0x150b   : > { %v7975_v31 = vpop.f32.mrb[40].mxu1 }
0x150c   : > { %v18638_v60 = vadd.f32 %v7975_v31, %v7490_v22  ;;  %v16716_v8 = vpop.f32.mrb[41].mxu1  ;;  %v14744_v22 = vld [vmem:[%s21267_s4 + $0x58] sm:$0xff] }
0x150e   : > { %v8530_v5 = vsel %vm362_vm1, %v18638_v60, 0 }
0x150f   : > { %v8601_v27 = vand.u32 4294901760, %v8530_v5 }
0x1511   : > { %v8602_v37 = vsub.f32 %v8530_v5, %v8601_v27 }
0x1513   : > { %v8603_v33 = vand.u32 4294901760, %v8602_v37 }
0x1515   : > { %v8604_v41 = vsub.f32 %v8602_v37, %v8603_v33 }
0x1517   : > { %v8605_v48 = vand.u32 4294901760, %v8604_v41 }
0x1519   : > { %16834 = vmatmul.mubr.f32.vlgmr.msra.gmra.mrb[42].mxu1 %v8605_v48 }
0x151a   : > { %16837 = vmatpush3.xpose.msra.mxu1 %v8616_v30  ;;  %16838 = vmatprep.mubr.msk.f32.mxu1 %vm18985_vm0, %v18986_v9 }
0x151b   : > { %16841 = vmatprep.subr.mxu1 %v18986_v9 }
0x1521   : > { %16839 = vmatmul.mubr.f32.vlgmr.msra.gmra.mrb[42].mxu1 %v8601_v27 }
0x1522   : > { %16842 = vmatpush3.xpose.msra.mxu1 %v8613_v42  ;;  %16843 = vmatprep.mubr.msk.f32.mxu1 %vm18985_vm0, %v18986_v9  ;;  %v9467_v42 = vand.u32 4294901760, %v14744_v22 }
0x1523   : > { %16846 = vmatprep.subr.mxu1 %v18986_v9 }
0x1524   : > { %v9559_v8 = vsub.f32 %v14744_v22, %v9467_v42 }
0x1529   : > { %16844 = vmatmul.mubr.f32.vlgmr.msra.gmra.mrb[42].mxu1 %v8602_v37 }
0x152a   : > { %16847 = vmatpush3.xpose.msra.mxu1 %v8536_v10  ;;  %16848 = vmatprep.mubr.msk.f32.mxu1 %vm18985_vm0, %v18986_v9 }
0x152b   : > { %16851 = vmatprep.subr.mxu1 %v18986_v9 }
0x1531   : > { %16849 = vmatmul.mubr.f32.vlgmr.msra.gmra.mrb[42].mxu1 %v8603_v33  ;;  %v9560_v33 = vand.u32 4294901760, %v9559_v8 }
0x1532   : > { %16852 = vmatpush3.xpose.msra.mxu1 %v8614_v32  ;;  %16853 = vmatprep.mubr.msk.f32.mxu1 %vm18985_vm0, %v18986_v9 }
0x1533   : > { %16856 = vmatprep.subr.mxu1 %v18986_v9  ;;  %v9561_v48 = vsub.f32 %v9559_v8, %v9560_v33 }
0x1539   : > { %16854 = vmatmul.mubr.f32.vlgmr.msra.gmra.mrb[42].mxu1 %v8601_v27 }
0x153a   : > { %16857 = vmatpush3.xpose.msra.mxu1 %v8536_v10  ;;  %16858 = vmatprep.mubr.msk.f32.mxu1 %vm18985_vm0, %v18986_v9  ;;  %v14743_v10 = vld [vmem:[%s21267_s4 + $0x50] sm:$0xff] }
0x153b   : > { %16861 = vmatprep.subr.mxu1 %v18986_v9  ;;  %v9464_v31 = vand.u32 4294901760, %v14743_v10 }
0x153d   : > { %v18239_v32 = vpack.c.bf16 %v9467_v42, %v9464_v31 }
0x1541   : > { %16859 = vmatmul.mubr.f32.vlgmr.msra.gmra.mrb[42].mxu1 %v8601_v27  ;;  %v18236_v27 = vpack.c.bf16 %v9461_v35, %v9458_v46 }
0x1542   : > { %16863 = vmatprep.mubr.msk.f32.mxu1 %vm18985_vm0, %v18986_v9 }
0x1614   : > { %v8977_v50 = vpop.f32.mrb[42].mxu1 }
0x1615   : > { %v8981_v51 = vsel %vm351_vm3, -1e+30, %v8977_v50  ;;  %v16860_v52 = vpop.f32.mrb[43].mxu1  ;;  %v9562_v50 = vand.u32 4294901760, %v9561_v48  ;;  %v14745_v48 = vld [vmem:[%s21268_s5 + $0x40] sm:$0xff] }
0x1616   : > { %v8982_v29 = vsel %vm1857_vm4, %v8981_v51, -inf  ;;  %v9539_v52 = vand.u32 4294901760, %v20472_v59 }
0x1617   : > { %8983 = vmax.xlane.f32.xlu1 %v8982_v29  ;;  %v9546_v29 = vand.u32 4294901760, %v20474_v61 }
0x1619   : > { %v18260_v45 = vpack.c.bf16 %v9546_v29, %v9539_v52 }
0x16a4   : > { %v8984_v13 = vpop.xlane.xlu1 %8983 }
0x16a5   : > { %v8985_v14 = vsub.f32 %v8981_v51, %v8984_v13 }
0x16a7   : > { %v8986_v53 = vmul.f32 1.442695, %v8985_v14 }
0x16a9   : > { %18901 = vpow2.f32 %v8986_v53 }
0x16b3   : > { %v18902_v17 = vpop.eup %18901 }
0x16b4   : > { %v8988_v40 = vsel %vm1857_vm4, %v18902_v17, 0.0 }
0x16b5   : > { %8989 = vadd.xlane.f32.xlu1 %v8988_v40  ;;  %v9547_v40 = vsub.f32 %v20474_v61, %v9546_v29 }
0x16b7   : > { %v9548_v2 = vand.u32 4294901760, %v9547_v40 }
0x16c6   : > { %8993 = vrot.lane.b32.xlu1 %v18638_v60, %s18987_s16  ;;  %v9552_v60 = vsub.f32 %v14743_v10, %v9464_v31 }
0x16c8   : > { %v18251_v5 = vpack.c.bf16 %v9559_v8, %v9552_v60  ;;  %v9553_v37 = vand.u32 4294901760, %v9552_v60 }
0x16ca   : > { %18252 = vmatpush3.bf16.msra.mxu0 %v18251_v5  ;;  %v18263_v62 = vpack.c.bf16 %v9560_v33, %v9553_v37  ;;  %v9554_v41 = vsub.f32 %v9552_v60, %v9553_v37 }
0x16cb   : > { %18259 = vmatprep.subr.bf16.mxu0 %v18984_v3 }
0x16cc   : > { %v9555_v30 = vand.u32 4294901760, %v9554_v41 }
0x16ce   : > { %v18245_v51 = vpack.c.bf16 %v9562_v50, %v9555_v30  ;;  %v14746_v30 = vld [vmem:[%s21268_s5 + $0x48] sm:$0xff]  ;;  %v9979_v50 = vand.u32 4294901760, %v14745_v48 }
0x1742   : > { %v8990_v63 = vpop.xlane.xlu1 %8989 }
0x1743   : > { %18903 = vrcp.f32 %v8990_v63 }
0x1746   : > { %v8994_v28 = vpop.permute.xlu1 %8993 }
0x1747   : > { %v9000_v38 = vand.u32 4294901760, %v8994_v28 }
0x1749   : > { %16862 = vmatpush3.msra.mxu1 %v9000_v38  ;;  %v9077_v0 = vsub.f32 %v8994_v28, %v9000_v38 }
0x174a   : > { %16866 = vmatprep.subr.mxu1 %v18986_v9 }
0x174b   : > { %v9078_v12 = vand.u32 4294901760, %v9077_v0 }
0x174d   : > { %v18904_v19 = vpop.eup %18903  ;;  %v9079_v16 = vsub.f32 %v9077_v0, %v9078_v12 }
0x174e   : > { %v8992_v20 = vmul.f32 %v18904_v19, %v18902_v17  ;;  %v9540_v17 = vsub.f32 %v20472_v59, %v9539_v52  ;;  %v14748_v52 = vld [vmem:[%s21268_s5 + $0x58] sm:$0xff] }
0x174f   : > { %v9080_v25 = vand.u32 4294901760, %v9079_v16 }
0x1750   : > { %v8997_v4 = vsel %vm1857_vm4, %v8992_v20, 0  ;;  %v9541_v35 = vand.u32 4294901760, %v9540_v17 }
0x1751   : > { %v9065_v21 = vand.u32 4294901760, %v8997_v4 }
0x1753   : > { %v9066_v18 = vsub.f32 %v8997_v4, %v9065_v21 }
0x1755   : > { %v9067_v15 = vand.u32 4294901760, %v9066_v18 }
0x1757   : > { %v9068_v1 = vsub.f32 %v9066_v18, %v9067_v15 }
0x1759   : > { %v9069_v24 = vand.u32 4294901760, %v9068_v1 }
0x175b   : > { %16864 = vmatmul.mubr.f32.vlgmr.msra.gmra.mrb[44].mxu1 %v9069_v24 }
0x175c   : > { %16867 = vmatpush3.msra.mxu1 %v9080_v25  ;;  %16868 = vmatprep.mubr.msk.f32.mxu1 %vm18985_vm0, %v18986_v9 }
0x175d   : > { %16871 = vmatprep.subr.mxu1 %v18986_v9 }
0x1763   : > { %16869 = vmatmul.mubr.f32.vlgmr.msra.gmra.mrb[44].mxu1 %v9065_v21 }
0x1764   : > { %16872 = vmatpush3.msra.mxu1 %v9077_v0  ;;  %16873 = vmatprep.mubr.msk.f32.mxu1 %vm18985_vm0, %v18986_v9 }
0x1765   : > { %16876 = vmatprep.subr.mxu1 %v18986_v9 }
0x176b   : > { %16874 = vmatmul.mubr.f32.vlgmr.msra.gmra.mrb[44].mxu1 %v9066_v18 }
0x176c   : > { %16877 = vmatpush3.msra.mxu1 %v9000_v38  ;;  %16878 = vmatprep.mubr.msk.f32.mxu1 %vm18985_vm0, %v18986_v9 }
0x176d   : > { %16881 = vmatprep.subr.mxu1 %v18986_v9 }
0x1773   : > { %16879 = vmatmul.mubr.f32.vlgmr.msra.gmra.mrb[44].mxu1 %v9067_v15 }
0x1774   : > { %16882 = vmatpush3.msra.mxu1 %v9078_v12  ;;  %16883 = vmatprep.mubr.msk.f32.mxu1 %vm18985_vm0, %v18986_v9 }
0x1775   : > { %16886 = vmatprep.subr.mxu1 %v18986_v9 }
0x177b   : > { %16884 = vmatmul.mubr.f32.vlgmr.msra.gmra.mrb[44].mxu1 %v9065_v21 }
0x177c   : > { %16887 = vmatpush3.msra.mxu1 %v9000_v38  ;;  %16888 = vmatprep.mubr.msk.f32.mxu1 %vm18985_vm0, %v18986_v9  ;;  %v18242_v38 = vpack.c.bf16 %v9548_v2, %v9541_v35 }
0x177d   : > { %18235 = vmatprep.subr.bf16.mxu1 %v18984_v3 }
0x1783   : > { %16889 = vmatmul.mubr.f32.vlgmr.msra.gmra.mrb[44].mxu1 %v9065_v21  ;;  %v9453_v21 = vrot.slane %v20421_v43, %v19519_v11 }
0x1784   : > { %16899 = vmatprep.mubr.msk.f32.mxu1 %vm18985_vm0, %v18986_v9  ;;  %18237 = vmatpush3.bf16.msra.mxu1 %v18236_v27 }
0x1785   : > { %18238 = vmatprep.subr.bf16.mxu1 %v18984_v3 }
0x1788   : > { %18240 = vmatpush3.bf16.msra.mxu1 %v18239_v32 }
0x1789   : > { %18241 = vmatprep.subr.bf16.mxu1 %v18984_v3 }
0x1856   : > { %v9441_v13 = vpop.f32.mrb[44].mxu1 }
0x1857   : > { %v9455_v14 = vsel %vm362_vm1, %v9441_v13, 0  ;;  %v16890_v53 = vpop.f32.mrb[45].mxu1  ;;  %v9988_v13 = vand.u32 4294901760, %v14748_v52 }
0x1858   : > { %v9526_v49 = vand.u32 4294901760, %v9455_v14  ;;  %v10059_v53 = vsub.f32 %v14745_v48, %v9979_v50 }
0x185a   : > { %v9527_v46 = vsub.f32 %v9455_v14, %v9526_v49 }
0x185c   : > { %v9528_v63 = vand.u32 4294901760, %v9527_v46  ;;  %16922 = vmatmul.mubr.f32.vlgmr.msra.gmra.mrb[32].mxu0 %v9527_v46 }
0x185d   : > { %18261 = vmatpush3.bf16.msra.mxu0 %v18260_v45  ;;  %16943 = vmatprep.mubr.msk.f32.mxu0 %vm18985_vm0, %v18986_v9 }
0x185e   : > { %v9529_v28 = vsub.f32 %v9527_v46, %v9528_v63  ;;  %18262 = vmatprep.subr.bf16.mxu0 %v18984_v3  ;;  %v10060_v46 = vand.u32 4294901760, %v10059_v53 }
0x1860   : > { %v9530_v19 = vand.u32 4294901760, %v9529_v28  ;;  %v10061_v2 = vsub.f32 %v10059_v53, %v10060_v46 }
0x1861   : > { %18264 = vmatpush3.bf16.msra.mxu0 %v18263_v62 }
0x1862   : > { %16900 = vmatmul.mubr.f32.vlgmr.msra.gmra.mrb[46].mxu1 %v9530_v19  ;;  %18271 = vmatprep.subr.bf16.mxu0 %v18984_v3  ;;  %v10062_v28 = vand.u32 4294901760, %v10061_v2 }
0x1863   : > { %18243 = vmatpush3.bf16.msra.mxu1 %v18242_v38  ;;  %16910 = vmatprep.mubr.msk.f32.mxu1 %vm18985_vm0, %v18986_v9 }
0x1864   : > { %16944 = vmatmul.mubr.f32.vlgmr.msra.gmra.mrb[34].mxu0 %v9526_v49  ;;  %18244 = vmatprep.subr.bf16.mxu1 %v18984_v3 }
0x1865   : > { %16965 = vmatprep.mubr.msk.f32.mxu0 %vm18985_vm0, %v18986_v9 }
0x1867   : > { %18246 = vmatpush3.bf16.msra.mxu1 %v18245_v51  ;;  %v9982_v51 = vand.u32 4294901760, %v14746_v30 }
0x1868   : > { %18253 = vmatprep.subr.bf16.mxu1 %v18984_v3 }
0x1869   : > { %v20549_v14 = vpack.c.bf16 %v9982_v51, %v9979_v50  ;;  %v10066_v17 = vsub.f32 %v14746_v30, %v9982_v51 }
0x186a   : > { %16911 = vmatmul.mubr.f32.vlgmr.msra.gmra.mrb[48].mxu1 %v9526_v49 }
0x186b   : > { %18255 = vmatpush3.bf16.msra.mxu1 %v18236_v27  ;;  %16932 = vmatprep.mubr.msk.f32.mxu1 %vm18985_vm0, %v18986_v9  ;;  %v10067_v35 = vand.u32 4294901760, %v10066_v17 }
0x186c   : > { %18256 = vmatprep.subr.bf16.mxu1 %v18984_v3  ;;  %18273 = vmatpush3.bf16.msra.mxu0 %v20549_v14 }
0x186d   : > { %18274 = vmatprep.subr.bf16.mxu0 %v18984_v3 }
0x186f   : > { %18258 = vmatpush3.bf16.msra.mxu1 %v18239_v32 }
0x1870   : > { %18265 = vmatprep.subr.bf16.mxu1 %v18984_v3 }
0x1872   : > { %16933 = vmatmul.mubr.f32.vlgmr.msra.gmra.mrb[50].mxu1 %v9528_v63  ;;  %v10068_v63 = vsub.f32 %v10066_v17, %v10067_v35 }
0x1873   : > { %18267 = vmatpush3.bf16.msra.mxu1 %v18236_v27  ;;  %16954 = vmatprep.mubr.msk.f32.mxu1 %vm18985_vm0, %v18986_v9 }
0x1874   : > { %18268 = vmatprep.subr.bf16.mxu1 %v18984_v3  ;;  %v10069_v38 = vand.u32 4294901760, %v10068_v63  ;;  %v14755_v63 = vld [vmem:[%s21269_s6 + $0xb0] sm:$0xff] }
0x1877   : > { %18270 = vmatpush3.bf16.msra.mxu1 %v18239_v32 }
0x1878   : > { %18307 = vmatprep.subr.bf16.mxu1 %v18984_v3 }
0x187a   : > { %16955 = vmatmul.mubr.f32.vlgmr.msra.gmra.mrb[52].mxu1 %v9526_v49  ;;  %v10080_v49 = vsub.f32 %v14748_v52, %v9988_v13 }
0x187b   : > { %17039 = vmatprep.mubr.msk.f32.mxu1 %vm18985_vm0, %v18986_v9 }
0x192f   : > { %v9703_v59 = vpop.f32.mrb[32].mxu0 }
0x1930   : > { %v16923_v61 = vpop.f32.mrb[33].mxu0 }
0x1931   : > { %v18278_v61 = vpack.c.bf16 %v10069_v38, %v10062_v28  ;;  %v14756_v28 = vld [vmem:[%s21269_s6 + $0xb8] sm:$0xff]  ;;  %v10499_v38 = vand.u32 4294901760, %v14755_v63 }
0x1935   : > { %v9532_v20 = vpop.f32.mrb[46].mxu1 }
0x1936   : > { %v16901_v0 = vpop.f32.mrb[47].mxu1  ;;  %v9533_v18 = vadd.f32 %v9532_v20, %v9453_v21 }
0x1937   : > { %v9863_v4 = vpop.f32.mrb[34].mxu0 }
0x1938   : > { %v16945_v12 = vpop.f32.mrb[35].mxu0 }
0x193d   : > { %v9623_v15 = vpop.f32.mrb[48].mxu1 }
0x193e   : > { %v9624_v16 = vadd.f32 %v9623_v15, %v9533_v18  ;;  %v16912_v1 = vpop.f32.mrb[49].mxu1  ;;  %v18284_v18 = vpack.c.bf16 %v10066_v17, %v10059_v53 }
0x1940   : > { %v9704_v24 = vadd.f32 %v9703_v59, %v9624_v16  ;;  %v10081_v59 = vand.u32 4294901760, %v10080_v49  ;;  %v18296_v16 = vpack.c.bf16 %v10067_v35, %v10060_v46 }
0x1942   : > { %v10082_v0 = vsub.f32 %v10080_v49, %v10081_v59 }
0x1944   : > { %v10083_v21 = vand.u32 4294901760, %v10082_v0 }
0x1945   : > { %v9780_v25 = vpop.f32.mrb[50].mxu1 }
0x1946   : > { %v9781_v10 = vadd.f32 %v9780_v25, %v9704_v24  ;;  %v16934_v22 = vpop.f32.mrb[51].mxu1  ;;  %v14749_v24 = vld [vmem:[%s21269_s6 + $0x80] sm:$0xff]  ;;  %v14750_v25 = vld [vmem:[%s21269_s6 + $0x88] sm:$0xff] }
0x1947   : > { %v10484_v22 = vand.u32 4294901760, %v14750_v25 }
0x1948   : > { %v9864_v31 = vadd.f32 %v9863_v4, %v9781_v10  ;;  %v10481_v10 = vand.u32 4294901760, %v14749_v24 }
0x194d   : > { %v9938_v42 = vpop.f32.mrb[52].mxu1 }
0x194e   : > { %v9939_v60 = vadd.f32 %v9938_v42, %v9864_v31  ;;  %v16956_v8 = vpop.f32.mrb[53].mxu1  ;;  %v20563_v31 = vpack.c.bf16 %v10484_v22, %v10481_v10  ;;  %v20565_v42 = vsub.f32 %v14749_v24, %v10481_v10 }
0x1950   : > { %v9942_v5 = vadd.f32 %v9939_v60, %v20396_v58  ;;  %v14747_v58 = vld [vmem:[%s21268_s5 + $0x50] sm:$0xff]  ;;  %v20567_v60 = vsub.f32 %v14750_v25, %v10484_v22  ;;  %18309 = vmatpush3.bf16.msra.mxu1 %v20563_v31 }
0x1951   : > { %v9985_v29 = vand.u32 4294901760, %v14747_v58  ;;  %18310 = vmatprep.subr.bf16.mxu1 %v18984_v3 }
0x1952   : > { %v9943_v27 = vsel %vm362_vm1, %v9942_v5, 0.0 }
0x1953   : > { %9944 = vadd.xlane.f32.xlu1 %v9943_v27  ;;  %v10073_v40 = vsub.f32 %v14747_v58, %v9985_v29  ;;  %v20552_v45 = vpack.c.bf16 %v9988_v13, %v9985_v29 }
0x1955   : > { %18276 = vmatpush3.bf16.msra.mxu0 %v20552_v45  ;;  %v10074_v19 = vand.u32 4294901760, %v10073_v40  ;;  %v18287_v15 = vpack.c.bf16 %v10080_v49, %v10073_v40  ;;  %v14753_v49 = vld [vmem:[%s21269_s6 + $0xa0] sm:$0xff] }
0x1956   : > { %18277 = vmatprep.subr.bf16.mxu0 %v18984_v3  ;;  %v10493_v46 = vand.u32 4294901760, %v14753_v49 }
0x1957   : > { %v10075_v20 = vsub.f32 %v10073_v40, %v10074_v19  ;;  %v18299_v1 = vpack.c.bf16 %v10081_v59, %v10074_v19  ;;  %v10502_v19 = vand.u32 4294901760, %v14756_v28 }
0x1958   : > { %v20643_v0 = vsub.f32 %v14753_v49, %v10493_v46 }
0x1959   : > { %v10076_v4 = vand.u32 4294901760, %v10075_v20  ;;  %v20637_v59 = vpack.c.bf16 %v10502_v19, %v10499_v38 }
0x195b   : > { %v18281_v12 = vpack.c.bf16 %v10083_v21, %v10076_v4  ;;  %v20648_v21 = vsub.f32 %v14755_v63, %v10499_v38 }
0x19e0   : > { %v9945_v32 = vpop.xlane.xlu1 %9944 }
0x19e1   : > { %v9946_v37 = vmul.f32 0.03125, %v9945_v32  ;;  %v9959_v32 = vrot.slane %v20421_v43, %v19561_v47 }
0x19e3   : > { %v9947_v33 = vsub.f32 %v9942_v5, %v9946_v37 }
0x19e5   : > { %v9948_v62 = vmul.f32 %v9947_v33, %v9947_v33 }
0x19e7   : > { %v9949_v41 = vsel %vm362_vm1, %v9948_v62, 0.0 }
0x19e8   : > { %9950 = vadd.xlane.f32.xlu0 %v9949_v41  ;;  %v9964_v41 = vrot.slane %v20421_v43, %v19564_v55 }
0x1a75   : > { %v9951_v8 = vpop.xlane.xlu0 %9950 }
0x1a76   : > { %v9952_v5 = vmul.f32 0.03125, %v9951_v8 }
0x1a78   : > { %v9953_v27 = vadd.f32 1e-05, %v9952_v5 }
0x1a7a   : > { %18905 = vrsqrt.f32 %v9953_v27 }
0x1a84   : > { %v18906_v37 = vpop.eup %18905 }
0x1a85   : > { %v9955_v62 = vmul.f32 %v18906_v37, %v9947_v33  ;;  %v14751_v33 = vld [vmem:[%s21269_s6 + $0x90] sm:$0xff] }
0x1a86   : > { %v10487_v53 = vand.u32 4294901760, %v14751_v33 }
0x1a87   : > { %v9960_v48 = vmul.f32 %v9959_v32, %v9955_v62  ;;  %v10594_v62 = vand.u32 4294901760, %v20643_v0 }
0x1a89   : > { %v20575_v30 = vadd.f32 %v9964_v41, %v9960_v48 }
0x1a8b   : > { %v9976_v58 = vsel %vm362_vm1, %v20575_v30, 0 }
0x1a8c   : > { %v10047_v50 = vand.u32 4294901760, %v9976_v58 }
0x1a8e   : > { %v10048_v51 = vsub.f32 %v9976_v58, %v10047_v50  ;;  %v10595_v58 = vsub.f32 %v20643_v0, %v10594_v62 }
0x1a90   : > { %v10049_v52 = vand.u32 4294901760, %v10048_v51 }
0x1a92   : > { %v10050_v29 = vsub.f32 %v10048_v51, %v10049_v52 }
0x1a94   : > { %v10051_v13 = vand.u32 4294901760, %v10050_v29  ;;  %v10608_v29 = vand.u32 4294901760, %v20648_v21 }
0x1a96   : > { %16966 = vmatmul.mubr.f32.vlgmr.msra.gmra.mrb[36].mxu0 %v10051_v13 }
0x1a97   : > { %18279 = vmatpush3.bf16.msra.mxu0 %v18278_v61  ;;  %16976 = vmatprep.mubr.msk.f32.mxu0 %vm18985_vm0, %v18986_v9  ;;  %v20639_v61 = vsub.f32 %v14751_v33, %v10487_v53 }
0x1a98   : > { %18280 = vmatprep.subr.bf16.mxu0 %v18984_v3 }
0x1a99   : > { %v10580_v10 = vand.u32 4294901760, %v20639_v61 }
0x1a9b   : > { %18282 = vmatpush3.bf16.msra.mxu0 %v18281_v12  ;;  %v20650_v12 = vsub.f32 %v14756_v28, %v10502_v19  ;;  %v10581_v5 = vsub.f32 %v20639_v61, %v10580_v10 }
0x1a9c   : > { %18283 = vmatprep.subr.bf16.mxu0 %v18984_v3 }
0x1a9d   : > { %v10582_v32 = vand.u32 4294901760, %v10581_v5  ;;  %v10615_v13 = vand.u32 4294901760, %v20650_v12  ;;  %v18341_v28 = vpack.c.bf16 %v20650_v12, %v20648_v21 }
0x1a9e   : > { %16977 = vmatmul.mubr.f32.vlgmr.msra.gmra.mrb[36].mxu0 %v10047_v50 }
0x1a9f   : > { %18285 = vmatpush3.bf16.msra.mxu0 %v18284_v18  ;;  %16987 = vmatprep.mubr.msk.f32.mxu0 %vm18985_vm0, %v18986_v9  ;;  %v10566_v18 = vand.u32 4294901760, %v20565_v42 }
0x1aa0   : > { %18286 = vmatprep.subr.bf16.mxu0 %v18984_v3 }
0x1aa3   : > { %18288 = vmatpush3.bf16.msra.mxu0 %v18287_v15  ;;  %v10573_v15 = vand.u32 4294901760, %v20567_v60 }
0x1aa4   : > { %18289 = vmatprep.subr.bf16.mxu0 %v18984_v3 }
0x1aa5   : > { %v18356_v38 = vpack.c.bf16 %v10573_v15, %v10566_v18 }
0x1aa6   : > { %16988 = vmatmul.mubr.f32.vlgmr.msra.gmra.mrb[36].mxu0 %v10048_v51  ;;  %v10596_v51 = vand.u32 4294901760, %v10595_v58 }
0x1aa7   : > { %18291 = vmatpush3.bf16.msra.mxu0 %v20549_v14  ;;  %16998 = vmatprep.mubr.msk.f32.mxu0 %vm18985_vm0, %v18986_v9 }
0x1aa8   : > { %18292 = vmatprep.subr.bf16.mxu0 %v18984_v3 }
0x1aab   : > { %18294 = vmatpush3.bf16.msra.mxu0 %v20552_v45 }
0x1aac   : > { %18295 = vmatprep.subr.bf16.mxu0 %v18984_v3 }
0x1aae   : > { %16999 = vmatmul.mubr.f32.vlgmr.msra.gmra.mrb[36].mxu0 %v10049_v52 }
0x1aaf   : > { %18297 = vmatpush3.bf16.msra.mxu0 %v18296_v16  ;;  %17009 = vmatprep.mubr.msk.f32.mxu0 %vm18985_vm0, %v18986_v9  ;;  %v10567_v16 = vsub.f32 %v20565_v42, %v10566_v18 }
0x1ab0   : > { %18298 = vmatprep.subr.bf16.mxu0 %v18984_v3 }
0x1ab1   : > { %v10568_v24 = vand.u32 4294901760, %v10567_v16 }
0x1ab3   : > { %18300 = vmatpush3.bf16.msra.mxu0 %v18299_v1  ;;  %v10574_v1 = vsub.f32 %v20567_v60, %v10573_v15 }
0x1ab4   : > { %18301 = vmatprep.subr.bf16.mxu0 %v18984_v3 }
0x1ab5   : > { %v10575_v25 = vand.u32 4294901760, %v10574_v1  ;;  %v18365_v1 = vpack.c.bf16 %v10615_v13, %v10608_v29 }
0x1ab6   : > { %17010 = vmatmul.mubr.f32.vlgmr.msra.gmra.mrb[36].mxu0 %v10047_v50 }
0x1ab7   : > { %18303 = vmatpush3.bf16.msra.mxu0 %v20549_v14  ;;  %17020 = vmatprep.mubr.msk.f32.mxu0 %vm18985_vm0, %v18986_v9  ;;  %v14752_v14 = vld [vmem:[%s21269_s6 + $0x98] sm:$0xff]  ;;  %v18320_v8 = vpack.c.bf16 %v10575_v25, %v10568_v24  ;;  %v9974_v24 = vrot.slane %v20438_v26, %v19519_v11 }
0x1ab8   : > { %18304 = vmatprep.subr.bf16.mxu0 %v18984_v3  ;;  %v10490_v17 = vand.u32 4294901760, %v14752_v14 }
0x1aba   : > { %v20613_v40 = vpack.c.bf16 %v10490_v17, %v10487_v53  ;;  %v20641_v20 = vsub.f32 %v14752_v14, %v10490_v17  ;;  %v10609_v14 = vsub.f32 %v20648_v21, %v10608_v29  ;;  %v10616_v53 = vsub.f32 %v20650_v12, %v10615_v13  ;;  %v14763_v29 = vld [vmem:[%s21266_s3 + $0xc0] sm:$0xff]  ;;  %v14764_v13 = vld [vmem:[%s21266_s3 + $0xc8] sm:$0xff] }
0x1abb   : > { %18306 = vmatpush3.bf16.msra.mxu0 %v20552_v45  ;;  %v14754_v45 = vld [vmem:[%s21269_s6 + $0xa8] sm:$0xff] }
0x1abc   : > { %18343 = vmatprep.subr.bf16.mxu0 %v18984_v3  ;;  %18312 = vmatpush3.bf16.msra.mxu1 %v20613_v40  ;;  %v10496_v35 = vand.u32 4294901760, %v14754_v45  ;;  %v10587_v22 = vand.u32 4294901760, %v20641_v20  ;;  %v10610_v17 = vand.u32 4294901760, %v10609_v14  ;;  %v10617_v49 = vand.u32 4294901760, %v10616_v53 }
0x1abd   : > { %18313 = vmatprep.subr.bf16.mxu1 %v18984_v3  ;;  %v11556_v14 = vand.u32 4294901760, %v14763_v29  ;;  %v11559_v53 = vand.u32 4294901760, %v14764_v13 }
0x1abe   : > { %17021 = vmatmul.mubr.f32.vlgmr.msra.gmra.mrb[36].mxu0 %v10047_v50  ;;  %v20625_v2 = vpack.c.bf16 %v10496_v35, %v10493_v46  ;;  %v20645_v4 = vsub.f32 %v14754_v45, %v10496_v35  ;;  %v10588_v27 = vsub.f32 %v20641_v20, %v10587_v22  ;;  %v18329_v45 = vpack.c.bf16 %v10617_v49, %v10610_v17  ;;  %v14767_v49 = vld [vmem:[%s21266_s3 + $0xe0] sm:$0xff] }
0x1abf   : > { %18345 = vmatpush3.bf16.msra.mxu0 %v20563_v31  ;;  %17096 = vmatprep.mubr.msk.f32.mxu0 %vm18985_vm0, %v18986_v9  ;;  %v18332_v46 = vpack.c.bf16 %v20567_v60, %v20565_v42  ;;  %v18335_v35 = vpack.c.bf16 %v20641_v20, %v20639_v61  ;;  %v18359_v19 = vpack.c.bf16 %v10587_v22, %v10580_v10 }
0x1ac0   : > { %18346 = vmatprep.subr.bf16.mxu0 %v18984_v3  ;;  %18315 = vmatpush3.bf16.msra.mxu1 %v20625_v2  ;;  %v10589_v37 = vand.u32 4294901760, %v10588_v27  ;;  %v10601_v41 = vand.u32 4294901760, %v20645_v4  ;;  %v18338_v63 = vpack.c.bf16 %v20645_v4, %v20643_v0 }
0x1ac1   : > { %18316 = vmatprep.subr.bf16.mxu1 %v18984_v3 }
0x1ac2   : > { %v18323_v48 = vpack.c.bf16 %v10589_v37, %v10582_v32  ;;  %v10602_v50 = vsub.f32 %v20645_v4, %v10601_v41  ;;  %v18362_v16 = vpack.c.bf16 %v10601_v41, %v10594_v62 }
0x1ac3   : > { %18348 = vmatpush3.bf16.msra.mxu0 %v20613_v40 }
0x1ac4   : > { %18349 = vmatprep.subr.bf16.mxu0 %v18984_v3  ;;  %18318 = vmatpush3.bf16.msra.mxu1 %v20637_v59  ;;  %v10603_v52 = vand.u32 4294901760, %v10602_v50 }
0x1ac5   : > { %18319 = vmatprep.subr.bf16.mxu1 %v18984_v3 }
0x1ac6   : > { %v18326_v33 = vpack.c.bf16 %v10603_v52, %v10596_v51 }
0x1ac7   : > { %18351 = vmatpush3.bf16.msra.mxu0 %v20625_v2 }
0x1ac8   : > { %18352 = vmatprep.subr.bf16.mxu0 %v18984_v3 }
0x1acb   : > { %18354 = vmatpush3.bf16.msra.mxu0 %v20637_v59 }
0x1acc   : > { %18367 = vmatprep.subr.bf16.mxu0 %v18984_v3 }
0x1b91   : > { %v10459_v25 = vpop.f32.mrb[36].mxu0 }
0x1b92   : > { %v18640_v5 = vadd.f32 %v10459_v25, %v9974_v24  ;;  %v17022_v27 = vpop.f32.mrb[37].mxu0  ;;  %v14769_v25 = vld [vmem:[%s21266_s3 + $0xf0] sm:$0xff] }
0x1b94   : > { %v10463_v42 = vmax.f32 %v18640_v5, 0.0  ;;  %v14770_v5 = vld [vmem:[%s21266_s3 + $0xf8] sm:$0xff] }
0x1b96   : > { %v10478_v60 = vsel %vm863_vm2, %v10463_v42, 0 }
0x1b97   : > { %v10553_v61 = vand.u32 4294901760, %v10478_v60 }
0x1b99   : > { %v10554_v20 = vsub.f32 %v10478_v60, %v10553_v61 }
0x1b9b   : > { %v10555_v32 = vand.u32 4294901760, %v10554_v20 }
0x1b9d   : > { %17097 = vmatmul.mubr.f32.vlgmr.msra.gmra.mrb[38].mxu0 %v10555_v32  ;;  %v10556_v0 = vsub.f32 %v10554_v20, %v10555_v32  ;;  %v11577_v32 = vand.u32 4294901760, %v14770_v5 }
0x1b9e   : > { %18369 = vmatpush3.bf16.msra.mxu0 %v20563_v31  ;;  %17134 = vmatprep.mubr.msk.f32.mxu0 %vm18985_vm0, %v18986_v9 }
0x1b9f   : > { %18370 = vmatprep.subr.bf16.mxu0 %v18984_v3  ;;  %v10557_v4 = vand.u32 4294901760, %v10556_v0 }
0x1ba1   : > { %17040 = vmatmul.mubr.f32.vlgmr.msra.gmra.mrb[54].mxu1 %v10557_v4 }
0x1ba2   : > { %18321 = vmatpush3.bf16.msra.mxu1 %v18320_v8  ;;  %18372 = vmatpush3.bf16.msra.mxu0 %v20613_v40 }
0x1ba3   : > { %18322 = vmatprep.subr.bf16.mxu1 %v18984_v3  ;;  %18373 = vmatprep.subr.bf16.mxu0 %v18984_v3 }
0x1ba4   : > { %17058 = vmatprep.mubr.msk.f32.mxu1 %vm18985_vm0, %v18986_v9 }
0x1ba6   : > { %18324 = vmatpush3.bf16.msra.mxu1 %v18323_v48  ;;  %18375 = vmatpush3.bf16.msra.mxu0 %v20625_v2 }
0x1ba7   : > { %18325 = vmatprep.subr.bf16.mxu1 %v18984_v3  ;;  %18376 = vmatprep.subr.bf16.mxu0 %v18984_v3 }
0x1baa   : > { %18327 = vmatpush3.bf16.msra.mxu1 %v18326_v33  ;;  %18378 = vmatpush3.bf16.msra.mxu0 %v20637_v59  ;;  %v10476_v59 = vrot.slane %v20421_v43, %v19710_v39  ;;  %v14765_v33 = vld [vmem:[%s21266_s3 + $0xd0] sm:$0xff] }
0x1bab   : > { %18328 = vmatprep.subr.bf16.mxu1 %v18984_v3  ;;  %18415 = vmatprep.subr.bf16.mxu0 %v18984_v3  ;;  %v11562_v17 = vand.u32 4294901760, %v14765_v33 }
0x1bad   : > { %17135 = vmatmul.mubr.f32.vlgmr.msra.gmra.mrb[40].mxu0 %v10553_v61 }
0x1bae   : > { %18330 = vmatpush3.bf16.msra.mxu1 %v18329_v45  ;;  %17219 = vmatprep.mubr.msk.f32.mxu0 %vm18985_vm0, %v18986_v9  ;;  %v14768_v45 = vld [vmem:[%s21266_s3 + $0xe8] sm:$0xff] }
0x1baf   : > { %18331 = vmatprep.subr.bf16.mxu1 %v18984_v3 }
0x1bb1   : > { %17059 = vmatmul.mubr.f32.vlgmr.msra.gmra.mrb[56].mxu1 %v10553_v61 }
0x1bb2   : > { %18333 = vmatpush3.bf16.msra.mxu1 %v18332_v46  ;;  %17077 = vmatprep.mubr.msk.f32.mxu1 %vm18985_vm0, %v18986_v9 }
0x1bb3   : > { %18334 = vmatprep.subr.bf16.mxu1 %v18984_v3 }
0x1bb6   : > { %18336 = vmatpush3.bf16.msra.mxu1 %v18335_v35  ;;  %v20739_v35 = vpack.c.bf16 %v11559_v53, %v11556_v14 }
0x1bb7   : > { %18337 = vmatprep.subr.bf16.mxu1 %v18984_v3 }
0x1bb8   : > { %18417 = vmatpush3.bf16.msra.mxu0 %v20739_v35 }
0x1bb9   : > { %18418 = vmatprep.subr.bf16.mxu0 %v18984_v3 }
0x1bba   : > { %18339 = vmatpush3.bf16.msra.mxu1 %v18338_v63  ;;  %v20741_v63 = vsub.f32 %v14763_v29, %v11556_v14 }
0x1bbb   : > { %18340 = vmatprep.subr.bf16.mxu1 %v18984_v3 }
0x1bbc   : > { %v11641_v27 = vand.u32 4294901760, %v20741_v63 }
0x1bbe   : > { %18342 = vmatpush3.bf16.msra.mxu1 %v18341_v28  ;;  %v20743_v28 = vsub.f32 %v14764_v13, %v11559_v53 }
0x1bbf   : > { %18355 = vmatprep.subr.bf16.mxu1 %v18984_v3 }
0x1bc0   : > { %v11648_v42 = vand.u32 4294901760, %v20743_v28 }
0x1bc1   : > { %17078 = vmatmul.mubr.f32.vlgmr.msra.gmra.mrb[58].mxu1 %v10554_v20  ;;  %v11574_v20 = vand.u32 4294901760, %v14769_v25 }
0x1bc2   : > { %18357 = vmatpush3.bf16.msra.mxu1 %v18356_v38  ;;  %17115 = vmatprep.mubr.msk.f32.mxu1 %vm18985_vm0, %v18986_v9  ;;  %v20745_v38 = vsub.f32 %v14765_v33, %v11562_v17 }
0x1bc3   : > { %18358 = vmatprep.subr.bf16.mxu1 %v18984_v3 }
0x1bc4   : > { %v11655_v0 = vand.u32 4294901760, %v20745_v38 }
0x1bc6   : > { %18360 = vmatpush3.bf16.msra.mxu1 %v18359_v19  ;;  %v11568_v19 = vand.u32 4294901760, %v14767_v49 }
0x1bc7   : > { %18361 = vmatprep.subr.bf16.mxu1 %v18984_v3 }
0x1bc8   : > { %v20761_v60 = vsub.f32 %v14767_v49, %v11568_v19  ;;  %v18440_v49 = vpack.c.bf16 %v20743_v28, %v20741_v63 }
0x1bca   : > { %18363 = vmatpush3.bf16.msra.mxu1 %v18362_v16  ;;  %v11571_v16 = vand.u32 4294901760, %v14768_v45 }
0x1bcb   : > { %18364 = vmatprep.subr.bf16.mxu1 %v18984_v3 }
0x1bcc   : > { %v20767_v4 = vsub.f32 %v14768_v45, %v11571_v16 }
0x1bce   : > { %18366 = vmatpush3.bf16.msra.mxu1 %v18365_v1 }
0x1bcf   : > { %18379 = vmatprep.subr.bf16.mxu1 %v18984_v3 }
0x1bd1   : > { %17116 = vmatmul.mubr.f32.vlgmr.msra.gmra.mrb[60].mxu1 %v10553_v61  ;;  %v20763_v61 = vpack.c.bf16 %v11571_v16, %v11568_v19 }
0x1bd2   : > { %17145 = vmatprep.mubr.msk.f32.mxu1 %vm18985_vm0, %v18986_v9 }
0x1c70   : > { %v10839_v26 = vpop.f32.mrb[38].mxu0 }
0x1c71   : > { %v17098_v31 = vpop.f32.mrb[39].mxu0 }
0x1c72   : > { %v11649_v31 = vsub.f32 %v20743_v28, %v11648_v42 }
0x1c74   : > { %v10559_v40 = vpop.f32.mrb[54].mxu1 }
0x1c75   : > { %v17041_v2 = vpop.f32.mrb[55].mxu1  ;;  %v10560_v18 = vadd.f32 %v10559_v40, %v10476_v59  ;;  %v20778_v59 = vpack.c.bf16 %v11577_v32, %v11574_v20 }
0x1c76   : > { %v11669_v2 = vand.u32 4294901760, %v20761_v60 }
0x1c80   : > { %v11013_v21 = vpop.f32.mrb[40].mxu0 }
0x1c81   : > { %v17136_v12 = vpop.f32.mrb[41].mxu0 }
0x1c82   : > { %v20782_v12 = vsub.f32 %v14770_v5, %v11577_v32  ;;  %v14760_v5 = vld [vmem:[%s21265_s2 + $0x68] sm:$0xff] }
0x1c84   : > { %v10670_v15 = vpop.f32.mrb[56].mxu1 }
0x1c85   : > { %v10671_v10 = vadd.f32 %v10670_v15, %v10560_v18  ;;  %v17060_v22 = vpop.f32.mrb[57].mxu1  ;;  %v11656_v18 = vsub.f32 %v20745_v38, %v11655_v0 }
0x1c94   : > { %v10758_v8 = vpop.f32.mrb[58].mxu1 }
0x1c95   : > { %v10759_v37 = vadd.f32 %v10758_v8, %v10671_v10  ;;  %v17079_v62 = vpop.f32.mrb[59].mxu1  ;;  %v11650_v10 = vand.u32 4294901760, %v11649_v31  ;;  %v11676_v8 = vand.u32 4294901760, %v20767_v4 }
0x1c97   : > { %v10840_v41 = vadd.f32 %v10839_v26, %v10759_v37  ;;  %v11642_v26 = vsub.f32 %v20741_v63, %v11641_v27  ;;  %v11670_v37 = vsub.f32 %v20761_v60, %v11669_v2  ;;  %v18470_v63 = vpack.c.bf16 %v11676_v8, %v11669_v2 }
0x1c99   : > { %v11643_v15 = vand.u32 4294901760, %v11642_v26 }
0x1ca4   : > { %v10934_v48 = vpop.f32.mrb[60].mxu1 }
0x1ca5   : > { %v10935_v58 = vadd.f32 %v10934_v48, %v10840_v41  ;;  %v17117_v50 = vpop.f32.mrb[61].mxu1  ;;  %v11690_v41 = vand.u32 4294901760, %v20782_v12  ;;  %v18428_v48 = vpack.c.bf16 %v11650_v10, %v11643_v15 }
0x1ca7   : > { %v11014_v51 = vadd.f32 %v11013_v21, %v10935_v58  ;;  %v20780_v21 = vsub.f32 %v14769_v25, %v11574_v20  ;;  %v11657_v58 = vand.u32 4294901760, %v11656_v18  ;;  %v11691_v14 = vsub.f32 %v20782_v12, %v11690_v41  ;;  %v14759_v25 = vld [vmem:[%s21265_s2 + $0x60] sm:$0xff] }
0x1ca9   : > { %v20717_v52 = vadd.f32 %v11014_v51, %v20575_v30  ;;  %v14766_v30 = vld [vmem:[%s21266_s3 + $0xd8] sm:$0xff]  ;;  %v11683_v62 = vand.u32 4294901760, %v20780_v21  ;;  %v11677_v51 = vsub.f32 %v20767_v4, %v11676_v8  ;;  %v18449_v19 = vpack.c.bf16 %v20782_v12, %v20780_v21 }
0x1caa   : > { %v11565_v46 = vand.u32 4294901760, %v14766_v30 }
0x1cab   : > { %v11018_v43 = vsel %vm362_vm1, %v20717_v52, 0.0  ;;  %v11678_v13 = vand.u32 4294901760, %v11677_v51  ;;  %v11684_v33 = vsub.f32 %v20780_v21, %v11683_v62  ;;  %v18473_v28 = vpack.c.bf16 %v11690_v41, %v11683_v62 }
0x1cac   : > { %11019 = vadd.xlane.f32.xlu0 %v11018_v43  ;;  %v20748_v1 = vpack.c.bf16 %v11565_v46, %v11562_v17  ;;  %v20750_v24 = vsub.f32 %v14766_v30, %v11565_v46  ;;  %v11671_v43 = vand.u32 4294901760, %v11670_v37  ;;  %v11692_v17 = vand.u32 4294901760, %v11691_v14  ;;  %v18919_v14 = vld [vmem:[%s21270_s7 + $0x10] sm:$0x7f] }
0x1cad   : > { %v11685_v30 = vand.u32 4294901760, %v11684_v33  ;;  %v18446_v46 = vpack.c.bf16 %v20767_v4, %v20761_v60 }
0x1cae   : > { %18420 = vmatpush3.bf16.msra.mxu0 %v20748_v1  ;;  %v11662_v40 = vand.u32 4294901760, %v20750_v24  ;;  %v18434_v53 = vpack.c.bf16 %v11678_v13, %v11671_v43  ;;  %v18443_v45 = vpack.c.bf16 %v20750_v24, %v20745_v38 }
0x1caf   : > { %18421 = vmatprep.subr.bf16.mxu0 %v18984_v3 }
0x1cb0   : > { %v11663_v22 = vsub.f32 %v20750_v24, %v11662_v40  ;;  %v18467_v16 = vpack.c.bf16 %v11662_v40, %v11655_v0 }
0x1cb2   : > { %18423 = vmatpush3.bf16.msra.mxu0 %v20763_v61  ;;  %v11664_v50 = vand.u32 4294901760, %v11663_v22 }
0x1cb3   : > { %18424 = vmatprep.subr.bf16.mxu0 %v18984_v3 }
0x1cb4   : > { %v18431_v29 = vpack.c.bf16 %v11664_v50, %v11657_v58 }
0x1cb6   : > { %18426 = vmatpush3.bf16.msra.mxu0 %v20778_v59 }
0x1cb7   : > { %18427 = vmatprep.subr.bf16.mxu0 %v18984_v3 }
0x1cb9   : > { %17220 = vmatmul.mubr.f32.vlgmr.msra.gmra.mrb[42].mxu0 %v19259_v36  ;;  %v18437_v36 = vpack.c.bf16 %v11692_v17, %v11685_v30 }
0x1cba   : > { %18429 = vmatpush3.bf16.msra.mxu0 %v18428_v48  ;;  %17238 = vmatprep.mubr.msk.f32.mxu0 %vm18985_vm0, %v18986_v9 }
0x1cbb   : > { %18430 = vmatprep.subr.bf16.mxu0 %v18984_v3 }
0x1cbe   : > { %18432 = vmatpush3.bf16.msra.mxu0 %v18431_v29 }
0x1cbf   : > { %18433 = vmatprep.subr.bf16.mxu0 %v18984_v3 }
0x1cc2   : > { %18435 = vmatpush3.bf16.msra.mxu0 %v18434_v53  ;;  %v11034_v53 = vrot.slane %v18919_v14, %v19888_v7 }
0x1cc3   : > { %18436 = vmatprep.subr.bf16.mxu0 %v18984_v3 }
0x1cc6   : > { %18438 = vmatpush3.bf16.msra.mxu0 %v18437_v36  ;;  %v11039_v36 = vrot.slane %v18919_v14, %v19891_v23 }
0x1cc7   : > { %18439 = vmatprep.subr.bf16.mxu0 %v18984_v3 }
0x1cc9   : > { %17239 = vmatmul.mubr.f32.vlgmr.msra.gmra.mrb[42].mxu0 %v19172_v44 }
0x1cca   : > { %18441 = vmatpush3.bf16.msra.mxu0 %v18440_v49  ;;  %17257 = vmatprep.mubr.msk.f32.mxu0 %vm18985_vm0, %v18986_v9 }
0x1ccb   : > { %18442 = vmatprep.subr.bf16.mxu0 %v18984_v3 }
0x1cce   : > { %18444 = vmatpush3.bf16.msra.mxu0 %v18443_v45 }
0x1ccf   : > { %18445 = vmatprep.subr.bf16.mxu0 %v18984_v3 }
0x1cd2   : > { %18447 = vmatpush3.bf16.msra.mxu0 %v18446_v46 }
0x1cd3   : > { %18448 = vmatprep.subr.bf16.mxu0 %v18984_v3 }
0x1cd6   : > { %18450 = vmatpush3.bf16.msra.mxu0 %v18449_v19 }
0x1cd7   : > { %18451 = vmatprep.subr.bf16.mxu0 %v18984_v3 }
0x1cd9   : > { %17258 = vmatmul.mubr.f32.vlgmr.msra.gmra.mrb[42].mxu0 %v19190_v54  ;;  %v18464_v54 = vpack.c.bf16 %v11648_v42, %v11641_v27  ;;  %v11058_v27 = vand.u32 4294901760, %v14759_v25  ;;  %v11061_v42 = vand.u32 4294901760, %v14760_v5 }
0x1cda   : > { %18453 = vmatpush3.bf16.msra.mxu0 %v20739_v35  ;;  %17276 = vmatprep.mubr.msk.f32.mxu0 %vm18985_vm0, %v18986_v9 }
0x1cdb   : > { %18454 = vmatprep.subr.bf16.mxu0 %v18984_v3  ;;  %v20881_v20 = vpack.c.bf16 %v11061_v42, %v11058_v27  ;;  %v11138_v32 = vsub.f32 %v14759_v25, %v11058_v27  ;;  %v11145_v0 = vsub.f32 %v14760_v5, %v11061_v42 }
0x1cdd   : > { %18381 = vmatpush3.bf16.msra.mxu1 %v20881_v20  ;;  %v11139_v40 = vand.u32 4294901760, %v11138_v32  ;;  %v11146_v2 = vand.u32 4294901760, %v11145_v0  ;;  %v18392_v58 = vpack.c.bf16 %v11145_v0, %v11138_v32 }
0x1cde   : > { %18456 = vmatpush3.bf16.msra.mxu0 %v20748_v1  ;;  %18382 = vmatprep.subr.bf16.mxu1 %v18984_v3 }
0x1cdf   : > { %18457 = vmatprep.subr.bf16.mxu0 %v18984_v3  ;;  %v11147_v21 = vsub.f32 %v11145_v0, %v11146_v2  ;;  %v18404_v51 = vpack.c.bf16 %v11146_v2, %v11139_v40 }
0x1ce1   : > { %v11148_v18 = vand.u32 4294901760, %v11147_v21 }
0x1ce2   : > { %18459 = vmatpush3.bf16.msra.mxu0 %v20763_v61 }
0x1ce3   : > { %18460 = vmatprep.subr.bf16.mxu0 %v18984_v3 }
0x1ce6   : > { %18462 = vmatpush3.bf16.msra.mxu0 %v20778_v59 }
0x1ce7   : > { %18463 = vmatprep.subr.bf16.mxu0 %v18984_v3 }
0x1ce9   : > { %17277 = vmatmul.mubr.f32.vlgmr.msra.gmra.mrb[42].mxu0 %v19221_v6 }
0x1cea   : > { %18465 = vmatpush3.bf16.msra.mxu0 %v18464_v54  ;;  %17295 = vmatprep.mubr.msk.f32.mxu0 %vm18985_vm0, %v18986_v9 }
0x1ceb   : > { %18466 = vmatprep.subr.bf16.mxu0 %v18984_v3 }
0x1cee   : > { %18468 = vmatpush3.bf16.msra.mxu0 %v18467_v16 }
0x1cef   : > { %18469 = vmatprep.subr.bf16.mxu0 %v18984_v3 }
0x1cf2   : > { %18471 = vmatpush3.bf16.msra.mxu0 %v18470_v63 }
0x1cf3   : > { %18472 = vmatprep.subr.bf16.mxu0 %v18984_v3 }
0x1cf6   : > { %18474 = vmatpush3.bf16.msra.mxu0 %v18473_v28 }
0x1cf7   : > { %18475 = vmatprep.subr.bf16.mxu0 %v18984_v3 }
0x1cf9   : > { %17296 = vmatmul.mubr.f32.vlgmr.msra.gmra.mrb[42].mxu0 %v19172_v44 }
0x1cfa   : > { %18477 = vmatpush3.bf16.msra.mxu0 %v20739_v35  ;;  %17314 = vmatprep.mubr.msk.f32.mxu0 %vm18985_vm0, %v18986_v9 }
0x1cfb   : > { %18478 = vmatprep.subr.bf16.mxu0 %v18984_v3 }
0x1cfe   : > { %18480 = vmatpush3.bf16.msra.mxu0 %v20748_v1 }
0x1cff   : > { %18481 = vmatprep.subr.bf16.mxu0 %v18984_v3 }
0x1d02   : > { %18483 = vmatpush3.bf16.msra.mxu0 %v20763_v61 }
0x1d03   : > { %18484 = vmatprep.subr.bf16.mxu0 %v18984_v3 }
0x1d06   : > { %18486 = vmatpush3.bf16.msra.mxu0 %v20778_v59  ;;  %v11140_v59 = vsub.f32 %v11138_v32, %v11139_v40 }
0x1d07   : > { %18499 = vmatprep.subr.bf16.mxu0 %v18984_v3 }
0x1d08   : > { %v11141_v12 = vand.u32 4294901760, %v11140_v59 }
0x1d09   : > { %17315 = vmatmul.mubr.f32.vlgmr.msra.gmra.mrb[42].mxu0 %v19172_v44  ;;  %v14761_v44 = vld [vmem:[%s21265_s2 + $0x70] sm:$0xff] }
0x1d0a   : > { %17407 = vmatprep.mubr.msk.f32.mxu0 %vm18985_vm0, %v18986_v9  ;;  %v11064_v60 = vand.u32 4294901760, %v14761_v44  ;;  %v18386_v22 = vpack.c.bf16 %v11148_v18, %v11141_v12 }
0x1d0c   : > { %v11152_v4 = vsub.f32 %v14761_v44, %v11064_v60  ;;  %v20936_v44 = vld [vmem:[%s21271_s8 + $0x6] sm:$0x3] }
0x1d0d   : > { %v11053_v27 = vrot.slane %v20936_v44, %v19376_v57 }
0x1d0e   : > { %v11153_v15 = vand.u32 4294901760, %v11152_v4 }
0x1d10   : > { %v11154_v8 = vsub.f32 %v11152_v4, %v11153_v15 }
0x1d12   : > { %v11155_v62 = vand.u32 4294901760, %v11154_v8 }
0x1d39   : > { %v11020_v6 = vpop.xlane.xlu0 %11019 }
0x1d3a   : > { %v11021_v35 = vmul.f32 0.03125, %v11020_v6 }
0x1d3c   : > { %v11022_v38 = vsub.f32 %v20717_v52, %v11021_v35  ;;  %v14762_v52 = vld [vmem:[%s21265_s2 + $0x78] sm:$0xff] }
0x1d3d   : > { %v11067_v61 = vand.u32 4294901760, %v14762_v52 }
0x1d3e   : > { %v11023_v1 = vmul.f32 %v11022_v38, %v11022_v38 }
0x1d3f   : > { %v11159_v26 = vsub.f32 %v14762_v52, %v11067_v61  ;;  %v20884_v31 = vpack.c.bf16 %v11067_v61, %v11064_v60 }
0x1d40   : > { %v11024_v24 = vsel %vm362_vm1, %v11023_v1, 0.0 }
0x1d41   : > { %11025 = vadd.xlane.f32.xlu0 %v11024_v24  ;;  %18384 = vmatpush3.bf16.msra.mxu1 %v20884_v31  ;;  %v11160_v10 = vand.u32 4294901760, %v11159_v26  ;;  %v18395_v50 = vpack.c.bf16 %v11159_v26, %v11152_v4 }
0x1d42   : > { %18385 = vmatprep.subr.bf16.mxu1 %v18984_v3 }
0x1d43   : > { %v11161_v37 = vsub.f32 %v11159_v26, %v11160_v10  ;;  %v18407_v43 = vpack.c.bf16 %v11160_v10, %v11153_v15 }
0x1d45   : > { %v11162_v41 = vand.u32 4294901760, %v11161_v37 }
0x1d47   : > { %v18389_v48 = vpack.c.bf16 %v11162_v41, %v11155_v62  ;;  %v14771_v62 = vld [vmem:[%s21267_s4 + $0x60] sm:$0xff]  ;;  %v13024_v41 = vand.u32 4294901760, %v14772_v56 }
0x1d48   : > { %v13021_v34 = vand.u32 4294901760, %v14771_v62 }
0x1dce   : > { %v11026_v29 = vpop.xlane.xlu0 %11025 }
0x1dcf   : > { %v11027_v13 = vmul.f32 0.03125, %v11026_v29 }
0x1dd1   : > { %v11028_v33 = vadd.f32 1e-05, %v11027_v13 }
0x1dd3   : > { %18907 = vrsqrt.f32 %v11028_v33 }
0x1ddc   : > { %v12088_v6 = vpop.f32.mrb[42].mxu0 }
0x1ddd   : > { %v18908_v30 = vpop.eup %18907  ;;  %v17316_v35 = vpop.f32.mrb[43].mxu0 }
0x1dde   : > { %v11030_v17 = vmul.f32 %v18908_v30, %v11022_v38  ;;  %v20919_v38 = vld [vmem:[%s21270_s7 + $0x18] sm:$0x7f] }
0x1ddf   : > { %v11554_v1 = vrot.slane %v20919_v38, %v19376_v57 }
0x1de0   : > { %v11035_v49 = vmul.f32 %v11034_v53, %v11030_v17 }
0x1de1   : > { %v18642_v24 = vadd.f32 %v12088_v6, %v11554_v1 }
0x1de2   : > { %v20894_v45 = vadd.f32 %v11039_v36, %v11035_v49 }
0x1de3   : > { %v12096_v25 = vsel %vm362_vm1, %v18642_v24, 0 }
0x1de4   : > { %v11055_v46 = vsel %vm362_vm1, %v20894_v45, 0  ;;  %v12099_v5 = vand.u32 4294901760, %v12096_v25 }
0x1de5   : > { %v11126_v19 = vand.u32 4294901760, %v11055_v46 }
0x1de6   : > { %v12176_v52 = vsub.f32 %v12096_v25, %v12099_v5 }
0x1de7   : > { %v11127_v54 = vsub.f32 %v11055_v46, %v11126_v19 }
0x1de8   : > { %v12177_v0 = vand.u32 4294901760, %v12176_v52 }
0x1de9   : > { %v11128_v16 = vand.u32 4294901760, %v11127_v54 }
0x1deb   : > { %v11129_v63 = vsub.f32 %v11127_v54, %v11128_v16 }
0x1ded   : > { %v11130_v28 = vand.u32 4294901760, %v11129_v63  ;;  %v14773_v63 = vld [vmem:[%s21267_s4 + $0x70] sm:$0xff] }
0x1dee   : > { %v13027_v6 = vand.u32 4294901760, %v14773_v63 }
0x1def   : > { %17146 = vmatmul.mubr.f32.vlgmr.msra.gmra.mrb[62].mxu1 %v11130_v28  ;;  %v14774_v28 = vld [vmem:[%s21267_s4 + $0x78] sm:$0xff] }
0x1df0   : > { %18387 = vmatpush3.bf16.msra.mxu1 %v18386_v22  ;;  %17156 = vmatprep.mubr.msk.f32.mxu1 %vm18985_vm0, %v18986_v9  ;;  %v13030_v35 = vand.u32 4294901760, %v14774_v28  ;;  %v13115_v1 = vsub.f32 %v14773_v63, %v13027_v6 }
0x1df1   : > { %18388 = vmatprep.subr.bf16.mxu1 %v18984_v3 }
0x1df2   : > { %v13122_v24 = vsub.f32 %v14774_v28, %v13030_v35 }
0x1df4   : > { %18390 = vmatpush3.bf16.msra.mxu1 %v18389_v48  ;;  %v20970_v48 = vsub.f32 %v14771_v62, %v13021_v34  ;;  %v18503_v25 = vpack.c.bf16 %v13122_v24, %v13115_v1 }
0x1df5   : > { %18391 = vmatprep.subr.bf16.mxu1 %v18984_v3 }
0x1df7   : > { %17157 = vmatmul.mubr.f32.vlgmr.msra.gmra.mrb[62].mxu1 %v11126_v19 }
0x1df8   : > { %18393 = vmatpush3.bf16.msra.mxu1 %v18392_v58  ;;  %17167 = vmatprep.mubr.msk.f32.mxu1 %vm18985_vm0, %v18986_v9  ;;  %v20972_v58 = vsub.f32 %v14772_v56, %v13024_v41 }
0x1df9   : > { %18394 = vmatprep.subr.bf16.mxu1 %v18984_v3 }
0x1dfc   : > { %18396 = vmatpush3.bf16.msra.mxu1 %v18395_v50  ;;  %v18500_v50 = vpack.c.bf16 %v20972_v58, %v20970_v48 }
0x1dfd   : > { %18397 = vmatprep.subr.bf16.mxu1 %v18984_v3 }
0x1dfe   : > { %18501 = vmatpush3.bf16.msra.mxu0 %v18500_v50 }
0x1dff   : > { %17168 = vmatmul.mubr.f32.vlgmr.msra.gmra.mrb[62].mxu1 %v11127_v54  ;;  %18502 = vmatprep.subr.bf16.mxu0 %v18984_v3 }
0x1e00   : > { %18399 = vmatpush3.bf16.msra.mxu1 %v20881_v20  ;;  %17178 = vmatprep.mubr.msk.f32.mxu1 %vm18985_vm0, %v18986_v9 }
0x1e01   : > { %18400 = vmatprep.subr.bf16.mxu1 %v18984_v3 }
0x1e02   : > { %18504 = vmatpush3.bf16.msra.mxu0 %v18503_v25  ;;  %v14775_v25 = vld [vmem:[%s21268_s5 + $0x60] sm:$0xff] }
0x1e03   : > { %18511 = vmatprep.subr.bf16.mxu0 %v18984_v3 }
0x1e04   : > { %18402 = vmatpush3.bf16.msra.mxu1 %v20884_v31 }
0x1e05   : > { %18403 = vmatprep.subr.bf16.mxu1 %v18984_v3 }
0x1e07   : > { %17179 = vmatmul.mubr.f32.vlgmr.msra.gmra.mrb[62].mxu1 %v11128_v16 }
0x1e08   : > { %18405 = vmatpush3.bf16.msra.mxu1 %v18404_v51  ;;  %17189 = vmatprep.mubr.msk.f32.mxu1 %vm18985_vm0, %v18986_v9 }
0x1e09   : > { %18406 = vmatprep.subr.bf16.mxu1 %v18984_v3 }
0x1e0c   : > { %18408 = vmatpush3.bf16.msra.mxu1 %v18407_v43 }
0x1e0d   : > { %18409 = vmatprep.subr.bf16.mxu1 %v18984_v3 }
0x1e0f   : > { %17190 = vmatmul.mubr.f32.vlgmr.msra.gmra.mrb[62].mxu1 %v11126_v19 }
0x1e10   : > { %18411 = vmatpush3.bf16.msra.mxu1 %v20881_v20  ;;  %17200 = vmatprep.mubr.msk.f32.mxu1 %vm18985_vm0, %v18986_v9 }
0x1e11   : > { %18412 = vmatprep.subr.bf16.mxu1 %v18984_v3 }
0x1e14   : > { %18414 = vmatpush3.bf16.msra.mxu1 %v20884_v31  ;;  %v12178_v31 = vsub.f32 %v12176_v52, %v12177_v0 }
0x1e15   : > { %17317 = vmatprep.subr.mxu1 %v18986_v9 }
0x1e16   : > { %v12179_v59 = vand.u32 4294901760, %v12178_v31  ;;  %v13109_v31 = vand.u32 4294901760, %v20972_v58 }
0x1e17   : > { %17201 = vmatmul.mubr.f32.vlgmr.msra.gmra.mrb[62].mxu1 %v11126_v19 }
0x1e18   : > { %17319 = vmatprep.mubr.msk.f32.mxu1 %vm18985_vm0, %v18986_v9 }
0x1e1d   : > { %17318 = vmatpush3.xpose.msra.mxu1 %v12099_v5 }
0x1e1e   : > { %17322 = vmatprep.subr.mxu1 %v18986_v9 }
0x1eea   : > { %v11538_v42 = vpop.f32.mrb[62].mxu1 }
0x1eeb   : > { %v18641_v60 = vadd.f32 %v11538_v42, %v11053_v27  ;;  %v17202_v61 = vpop.f32.mrb[63].mxu1  ;;  %v18491_v27 = vpack.c.bf16 %v13030_v35, %v13027_v6  ;;  %v13116_v42 = vand.u32 4294901760, %v13115_v1 }
0x1eed   : > { %v12093_v20 = vsel %vm362_vm1, %v18641_v60, 0  ;;  %v13117_v61 = vsub.f32 %v13115_v1, %v13116_v42 }
0x1eee   : > { %v12164_v32 = vand.u32 4294901760, %v12093_v20 }
0x1ef0   : > { %v12165_v4 = vsub.f32 %v12093_v20, %v12164_v32 }
0x1ef2   : > { %v12166_v26 = vand.u32 4294901760, %v12165_v4 }
0x1ef4   : > { %v12167_v40 = vsub.f32 %v12165_v4, %v12166_v26 }
0x1ef6   : > { %v12168_v2 = vand.u32 4294901760, %v12167_v40 }
0x1ef8   : > { %17320 = vmatmul.mubr.f32.vlgmr.msra.gmra.mrb[64].mxu1 %v12168_v2 }
0x1ef9   : > { %17323 = vmatpush3.xpose.msra.mxu1 %v12179_v59  ;;  %17324 = vmatprep.mubr.msk.f32.mxu1 %vm18985_vm0, %v18986_v9 }
0x1efa   : > { %17327 = vmatprep.subr.mxu1 %v18986_v9 }
0x1f00   : > { %17325 = vmatmul.mubr.f32.vlgmr.msra.gmra.mrb[64].mxu1 %v12164_v32 }
0x1f01   : > { %17328 = vmatpush3.xpose.msra.mxu1 %v12176_v52  ;;  %17329 = vmatprep.mubr.msk.f32.mxu1 %vm18985_vm0, %v18986_v9  ;;  %v13123_v52 = vand.u32 4294901760, %v13122_v24 }
0x1f02   : > { %17332 = vmatprep.subr.mxu1 %v18986_v9 }
0x1f03   : > { %v13124_v20 = vsub.f32 %v13122_v24, %v13123_v52 }
0x1f08   : > { %17330 = vmatmul.mubr.f32.vlgmr.msra.gmra.mrb[64].mxu1 %v12165_v4 }
0x1f09   : > { %17333 = vmatpush3.xpose.msra.mxu1 %v12099_v5  ;;  %17334 = vmatprep.mubr.msk.f32.mxu1 %vm18985_vm0, %v18986_v9 }
0x1f0a   : > { %17337 = vmatprep.subr.mxu1 %v18986_v9 }
0x1f10   : > { %17335 = vmatmul.mubr.f32.vlgmr.msra.gmra.mrb[64].mxu1 %v12166_v26  ;;  %v13102_v26 = vand.u32 4294901760, %v20970_v48 }
0x1f11   : > { %17338 = vmatpush3.xpose.msra.mxu1 %v12177_v0  ;;  %17339 = vmatprep.mubr.msk.f32.mxu1 %vm18985_vm0, %v18986_v9  ;;  %v13125_v0 = vand.u32 4294901760, %v13124_v20 }
0x1f12   : > { %17342 = vmatprep.subr.mxu1 %v18986_v9 }
0x1f18   : > { %17340 = vmatmul.mubr.f32.vlgmr.msra.gmra.mrb[64].mxu1 %v12164_v32 }
0x1f19   : > { %17343 = vmatpush3.xpose.msra.mxu1 %v12099_v5  ;;  %17344 = vmatprep.mubr.msk.f32.mxu1 %vm18985_vm0, %v18986_v9  ;;  %v18488_v5 = vpack.c.bf16 %v13024_v41, %v13021_v34 }
0x1f1a   : > { %17347 = vmatprep.subr.mxu1 %v18986_v9 }
0x1f20   : > { %17345 = vmatmul.mubr.f32.vlgmr.msra.gmra.mrb[64].mxu1 %v12164_v32  ;;  %v13118_v32 = vand.u32 4294901760, %v13117_v61 }
0x1f21   : > { %17349 = vmatprep.mubr.msk.f32.mxu1 %vm18985_vm0, %v18986_v9 }
0x1f22   : > { %v18497_v4 = vpack.c.bf16 %v13125_v0, %v13118_v32 }
0x1ff3   : > { %v12540_v57 = vpop.f32.mrb[64].mxu1 }
0x1ff4   : > { %v12544_v21 = vsel %vm351_vm3, -1e+30, %v12540_v57  ;;  %v17346_v12 = vpop.f32.mrb[65].mxu1  ;;  %v13103_v57 = vsub.f32 %v20970_v48, %v13102_v26 }
0x1ff5   : > { %v12545_v18 = vsel %vm1857_vm4, %v12544_v21, -inf }
0x1ff6   : > { %12546 = vmax.xlane.f32.xlu0 %v12545_v18  ;;  %v18512_v18 = vpack.c.bf16 %v13109_v31, %v13102_v26 }
0x2083   : > { %v12547_v15 = vpop.xlane.xlu0 %12546 }
0x2084   : > { %v12548_v10 = vsub.f32 %v12544_v21, %v12547_v15  ;;  %v13110_v21 = vsub.f32 %v20972_v58, %v13109_v31 }
0x2086   : > { %v12549_v22 = vmul.f32 1.442695, %v12548_v10  ;;  %v13104_v10 = vand.u32 4294901760, %v13103_v57 }
0x2088   : > { %18909 = vpow2.f32 %v12549_v22  ;;  %v13111_v22 = vand.u32 4294901760, %v13110_v21 }
0x208a   : > { %v18494_v62 = vpack.c.bf16 %v13111_v22, %v13104_v10 }
0x2092   : > { %v18910_v8 = vpop.eup %18909 }
0x2093   : > { %v12551_v37 = vsel %vm1857_vm4, %v18910_v8, 0.0 }
0x2094   : > { %12552 = vadd.xlane.f32.xlu0 %v12551_v37 }
0x20aa   : > { %12556 = vrot.lane.b32.xlu0 %v18641_v60, %s18987_s16  ;;  %v18515_v60 = vpack.c.bf16 %v13123_v52, %v13116_v42  ;;  %v14778_v52 = vld [vmem:[%s21268_s5 + $0x78] sm:$0xff]  ;;  %s14606_s16 = scalar_lea.sflag [#allocation3], %s334_s28 }
0x20ab   : > { %v13551_v61 = vand.u32 4294901760, %v14778_v52 }
0x20ad   : > { %v13643_v26 = vsub.f32 %v14778_v52, %v13551_v61 }
0x2121   : > { %v12553_v51 = vpop.xlane.xlu0 %12552 }
0x2122   : > { %18911 = vrcp.f32 %v12553_v51  ;;  %v13016_v51 = vrot.slane %v20919_v38, %v19519_v11 }
0x2125   : > { %v12557_v43 = vpop.permute.xlu0 %12556 }
0x2126   : > { %v12563_v29 = vand.u32 4294901760, %v12557_v43 }
0x2128   : > { %17348 = vmatpush3.msra.mxu1 %v12563_v29  ;;  %v12640_v14 = vsub.f32 %v12557_v43, %v12563_v29 }
0x2129   : > { %17352 = vmatprep.subr.mxu1 %v18986_v9 }
0x212a   : > { %v12641_v17 = vand.u32 4294901760, %v12640_v14 }
0x212c   : > { %v18912_v13 = vpop.eup %18911  ;;  %v12642_v46 = vsub.f32 %v12640_v14, %v12641_v17 }
0x212d   : > { %v12555_v33 = vmul.f32 %v18912_v13, %v18910_v8 }
0x212e   : > { %v12643_v16 = vand.u32 4294901760, %v12642_v46 }
0x212f   : > { %v12560_v53 = vsel %vm1857_vm4, %v12555_v33, 0 }
0x2130   : > { %v12628_v30 = vand.u32 4294901760, %v12560_v53 }
0x2132   : > { %v12629_v36 = vsub.f32 %v12560_v53, %v12628_v30 }
0x2134   : > { %v12630_v49 = vand.u32 4294901760, %v12629_v36 }
0x2136   : > { %v12631_v19 = vsub.f32 %v12629_v36, %v12630_v49 }
0x2138   : > { %v12632_v54 = vand.u32 4294901760, %v12631_v19 }
0x213a   : > { %17350 = vmatmul.mubr.f32.vlgmr.msra.gmra.mrb[66].mxu1 %v12632_v54 }
0x213b   : > { %17353 = vmatpush3.msra.mxu1 %v12643_v16  ;;  %17354 = vmatprep.mubr.msk.f32.mxu1 %vm18985_vm0, %v18986_v9 }
0x213c   : > { %17357 = vmatprep.subr.mxu1 %v18986_v9 }
0x2142   : > { %17355 = vmatmul.mubr.f32.vlgmr.msra.gmra.mrb[66].mxu1 %v12628_v30 }
0x2143   : > { %17358 = vmatpush3.msra.mxu1 %v12640_v14  ;;  %17359 = vmatprep.mubr.msk.f32.mxu1 %vm18985_vm0, %v18986_v9 }
0x2144   : > { %17362 = vmatprep.subr.mxu1 %v18986_v9 }
0x214a   : > { %17360 = vmatmul.mubr.f32.vlgmr.msra.gmra.mrb[66].mxu1 %v12629_v36 }
0x214b   : > { %17363 = vmatpush3.msra.mxu1 %v12563_v29  ;;  %17364 = vmatprep.mubr.msk.f32.mxu1 %vm18985_vm0, %v18986_v9 }
0x214c   : > { %17367 = vmatprep.subr.mxu1 %v18986_v9 }
0x2152   : > { %17365 = vmatmul.mubr.f32.vlgmr.msra.gmra.mrb[66].mxu1 %v12630_v49 }
0x2153   : > { %17368 = vmatpush3.msra.mxu1 %v12641_v17  ;;  %17369 = vmatprep.mubr.msk.f32.mxu1 %vm18985_vm0, %v18986_v9 }
0x2154   : > { %17372 = vmatprep.subr.mxu1 %v18986_v9 }
0x215a   : > { %17370 = vmatmul.mubr.f32.vlgmr.msra.gmra.mrb[66].mxu1 %v12628_v30 }
0x215b   : > { %17373 = vmatpush3.msra.mxu1 %v12563_v29  ;;  %17374 = vmatprep.mubr.msk.f32.mxu1 %vm18985_vm0, %v18986_v9 }
0x215c   : > { %18487 = vmatprep.subr.bf16.mxu1 %v18984_v3 }
0x2162   : > { %17375 = vmatmul.mubr.f32.vlgmr.msra.gmra.mrb[66].mxu1 %v12628_v30 }
0x2163   : > { %17385 = vmatprep.mubr.msk.f32.mxu1 %vm18985_vm0, %v18986_v9  ;;  %18489 = vmatpush3.bf16.msra.mxu1 %v18488_v5 }
0x2164   : > { %18490 = vmatprep.subr.bf16.mxu1 %v18984_v3 }
0x2167   : > { %18492 = vmatpush3.bf16.msra.mxu1 %v18491_v27 }
0x2168   : > { %18493 = vmatprep.subr.bf16.mxu1 %v18984_v3 }
0x2235   : > { %v13004_v40 = vpop.f32.mrb[66].mxu1 }
0x2236   : > { %v13018_v2 = vsel %vm362_vm1, %v13004_v40, 0  ;;  %v17376_v59 = vpop.f32.mrb[67].mxu1 }
0x2237   : > { %v13089_v12 = vand.u32 4294901760, %v13018_v2 }
0x2239   : > { %v13090_v15 = vsub.f32 %v13018_v2, %v13089_v12 }
0x223b   : > { %v13091_v8 = vand.u32 4294901760, %v13090_v15  ;;  %17408 = vmatmul.mubr.f32.vlgmr.msra.gmra.mrb[44].mxu0 %v13090_v15 }
0x223c   : > { %18513 = vmatpush3.bf16.msra.mxu0 %v18512_v18  ;;  %17429 = vmatprep.mubr.msk.f32.mxu0 %vm18985_vm0, %v18986_v9 }
0x223d   : > { %v13092_v37 = vsub.f32 %v13090_v15, %v13091_v8  ;;  %18514 = vmatprep.subr.bf16.mxu0 %v18984_v3  ;;  %v13644_v15 = vand.u32 4294901760, %v13643_v26 }
0x223f   : > { %v13093_v56 = vand.u32 4294901760, %v13092_v37 }
0x2240   : > { %18516 = vmatpush3.bf16.msra.mxu0 %v18515_v60 }
0x2241   : > { %17386 = vmatmul.mubr.f32.vlgmr.msra.gmra.mrb[68].mxu1 %v13093_v56  ;;  %18523 = vmatprep.subr.bf16.mxu0 %v18984_v3 }
0x2242   : > { %18495 = vmatpush3.bf16.msra.mxu1 %v18494_v62  ;;  %17396 = vmatprep.mubr.msk.f32.mxu1 %vm18985_vm0, %v18986_v9 }
0x2243   : > { %17430 = vmatmul.mubr.f32.vlgmr.msra.gmra.mrb[46].mxu0 %v13089_v12  ;;  %18496 = vmatprep.subr.bf16.mxu1 %v18984_v3 }
0x2244   : > { %17451 = vmatprep.mubr.msk.f32.mxu0 %vm18985_vm0, %v18986_v9 }
0x2246   : > { %18498 = vmatpush3.bf16.msra.mxu1 %v18497_v4 }
0x2247   : > { %18505 = vmatprep.subr.bf16.mxu1 %v18984_v3 }
0x2249   : > { %17397 = vmatmul.mubr.f32.vlgmr.msra.gmra.mrb[70].mxu1 %v13089_v12 }
0x224a   : > { %18507 = vmatpush3.bf16.msra.mxu1 %v18488_v5  ;;  %17418 = vmatprep.mubr.msk.f32.mxu1 %vm18985_vm0, %v18986_v9 }
0x224b   : > { %18508 = vmatprep.subr.bf16.mxu1 %v18984_v3 }
0x224e   : > { %18510 = vmatpush3.bf16.msra.mxu1 %v18491_v27 }
0x224f   : > { %18517 = vmatprep.subr.bf16.mxu1 %v18984_v3 }
0x2251   : > { %17419 = vmatmul.mubr.f32.vlgmr.msra.gmra.mrb[72].mxu1 %v13091_v8  ;;  %v13645_v8 = vsub.f32 %v13643_v26, %v13644_v15 }
0x2252   : > { %18519 = vmatpush3.bf16.msra.mxu1 %v18488_v5  ;;  %17440 = vmatprep.mubr.msk.f32.mxu1 %vm18985_vm0, %v18986_v9  ;;  %v14776_v5 = vld [vmem:[%s21268_s5 + $0x68] sm:$0xff] }
0x2253   : > { %18520 = vmatprep.subr.bf16.mxu1 %v18984_v3  ;;  %v13545_v42 = vand.u32 4294901760, %v14776_v5  ;;  %v13646_v62 = vand.u32 4294901760, %v13645_v8 }
0x2255   : > { %v13629_v0 = vsub.f32 %v14776_v5, %v13545_v42 }
0x2256   : > { %18522 = vmatpush3.bf16.msra.mxu1 %v18491_v27  ;;  %v13542_v27 = vand.u32 4294901760, %v14775_v25 }
0x2257   : > { %18559 = vmatprep.subr.bf16.mxu1 %v18984_v3  ;;  %v13630_v2 = vand.u32 4294901760, %v13629_v0 }
0x2258   : > { %v21047_v20 = vpack.c.bf16 %v13545_v42, %v13542_v27  ;;  %v13622_v32 = vsub.f32 %v14775_v25, %v13542_v27  ;;  %v14783_v27 = vld [vmem:[%s21269_s6 + $0xe0] sm:$0xff]  ;;  %v14784_v42 = vld [vmem:[%s21269_s6 + $0xe8] sm:$0xff] }
0x2259   : > { %17441 = vmatmul.mubr.f32.vlgmr.msra.gmra.mrb[74].mxu1 %v13089_v12  ;;  %v13631_v57 = vsub.f32 %v13629_v0, %v13630_v2  ;;  %v14056_v52 = vand.u32 4294901760, %v14783_v27 }
0x225a   : > { %17525 = vmatprep.mubr.msk.f32.mxu1 %vm18985_vm0, %v18986_v9  ;;  %18525 = vmatpush3.bf16.msra.mxu0 %v21047_v20  ;;  %v13623_v40 = vand.u32 4294901760, %v13622_v32 }
0x225b   : > { %18526 = vmatprep.subr.bf16.mxu0 %v18984_v3  ;;  %v13632_v12 = vand.u32 4294901760, %v13631_v57 }
0x225c   : > { %v13624_v59 = vsub.f32 %v13622_v32, %v13623_v40 }
0x225e   : > { %v13625_v21 = vand.u32 4294901760, %v13624_v59 }
0x2260   : > { %v18530_v10 = vpack.c.bf16 %v13632_v12, %v13625_v21 }
0x230e   : > { %v13266_v34 = vpop.f32.mrb[44].mxu0 }
0x230f   : > { %v17409_v41 = vpop.f32.mrb[45].mxu0 }
0x2314   : > { %v13095_v48 = vpop.f32.mrb[68].mxu1 }
0x2315   : > { %v17387_v58 = vpop.f32.mrb[69].mxu1  ;;  %v13096_v29 = vadd.f32 %v13095_v48, %v13016_v51  ;;  %v18548_v48 = vpack.c.bf16 %v13630_v2, %v13623_v40  ;;  %v14780_v51 = vld [vmem:[%s21269_s6 + $0xc8] sm:$0xff]  ;;  %v21141_v2 = vsub.f32 %v14783_v27, %v14056_v52 }
0x2316   : > { %v13426_v50 = vpop.f32.mrb[46].mxu0 }
0x2317   : > { %v17431_v43 = vpop.f32.mrb[47].mxu0 }
0x231c   : > { %v13186_v13 = vpop.f32.mrb[70].mxu1 }
0x231d   : > { %v13187_v33 = vadd.f32 %v13186_v13, %v13096_v29  ;;  %v17398_v14 = vpop.f32.mrb[71].mxu1  ;;  %v14047_v29 = vand.u32 4294901760, %v14780_v51 }
0x231f   : > { %v13267_v53 = vadd.f32 %v13266_v34, %v13187_v33  ;;  %v18536_v34 = vpack.c.bf16 %v13629_v0, %v13622_v32  ;;  %v21065_v14 = vsub.f32 %v14780_v51, %v14047_v29  ;;  %v14786_v32 = vld [vmem:[%s21269_s6 + $0xf8] sm:$0xff] }
0x2324   : > { %v13343_v30 = vpop.f32.mrb[72].mxu1 }
0x2325   : > { %v13344_v17 = vadd.f32 %v13343_v30, %v13267_v53  ;;  %v17420_v36 = vpop.f32.mrb[73].mxu1 }
0x2326   : > { %v13522_v36 = vrot.slane %v20919_v38, %v19561_v47  ;;  %v14781_v47 = vld [vmem:[%s21269_s6 + $0xd0] sm:$0xff] }
0x2327   : > { %v13427_v49 = vadd.f32 %v13426_v50, %v13344_v17  ;;  %v14779_v50 = vld [vmem:[%s21269_s6 + $0xc0] sm:$0xff] }
0x2328   : > { %v14044_v43 = vand.u32 4294901760, %v14779_v50 }
0x232a   : > { %v21061_v13 = vpack.c.bf16 %v14047_v29, %v14044_v43  ;;  %v21063_v33 = vsub.f32 %v14779_v50, %v14044_v43  ;;  %v14157_v50 = vand.u32 4294901760, %v21141_v2 }
0x232c   : > { %v13501_v46 = vpop.f32.mrb[74].mxu1  ;;  %18561 = vmatpush3.bf16.msra.mxu1 %v21061_v13  ;;  %v14129_v12 = vand.u32 4294901760, %v21063_v33  ;;  %v14158_v29 = vsub.f32 %v21141_v2, %v14157_v50 }
0x232d   : > { %v13502_v19 = vadd.f32 %v13501_v46, %v13427_v49  ;;  %v17442_v54 = vpop.f32.mrb[75].mxu1  ;;  %18562 = vmatprep.subr.bf16.mxu1 %v18984_v3 }
0x232f   : > { %v13505_v16 = vadd.f32 %v13502_v19, %v20894_v45  ;;  %v14777_v45 = vld [vmem:[%s21268_s5 + $0x70] sm:$0xff]  ;;  %v13527_v19 = vrot.slane %v20919_v38, %v19564_v55  ;;  %v14782_v55 = vld [vmem:[%s21269_s6 + $0xd8] sm:$0xff] }
0x2330   : > { %v13548_v60 = vand.u32 4294901760, %v14777_v45  ;;  %v14053_v5 = vand.u32 4294901760, %v14782_v55 }
0x2331   : > { %v13506_v63 = vsel %vm362_vm1, %v13505_v16, 0.0 }
0x2332   : > { %13507 = vadd.xlane.f32.xlu1 %v13506_v63  ;;  %v13636_v4 = vsub.f32 %v14777_v45, %v13548_v60  ;;  %v21050_v31 = vpack.c.bf16 %v13551_v61, %v13548_v60  ;;  %v14059_v60 = vand.u32 4294901760, %v14784_v42  ;;  %v21139_v40 = vsub.f32 %v14782_v55, %v14053_v5 }
0x2334   : > { %18528 = vmatpush3.bf16.msra.mxu0 %v21050_v31  ;;  %v13637_v18 = vand.u32 4294901760, %v13636_v4  ;;  %v18539_v41 = vpack.c.bf16 %v13643_v26, %v13636_v4  ;;  %v21123_v61 = vpack.c.bf16 %v14059_v60, %v14056_v52  ;;  %v21143_v59 = vsub.f32 %v14784_v42, %v14059_v60 }
0x2335   : > { %18529 = vmatprep.subr.bf16.mxu0 %v18984_v3  ;;  %v13537_v42 = vrot.slane %v20936_v44, %v19519_v11 }
0x2336   : > { %v13638_v22 = vsub.f32 %v13636_v4, %v13637_v18  ;;  %v18551_v58 = vpack.c.bf16 %v13644_v15, %v13637_v18  ;;  %v14065_v4 = vand.u32 4294901760, %v14786_v32  ;;  %v14136_v18 = vand.u32 4294901760, %v21065_v14 }
0x2337   : > { %v14130_v15 = vsub.f32 %v21063_v33, %v14129_v12  ;;  %v14164_v51 = vand.u32 4294901760, %v21143_v59 }
0x2338   : > { %v13639_v37 = vand.u32 4294901760, %v13638_v22  ;;  %v21148_v21 = vsub.f32 %v14786_v32, %v14065_v4  ;;  %v18608_v55 = vpack.c.bf16 %v14136_v18, %v14129_v12 }
0x2339   : > { %v14131_v22 = vand.u32 4294901760, %v14130_v15 }
0x233a   : > { %v18533_v56 = vpack.c.bf16 %v13646_v62, %v13639_v37  ;;  %v14150_v62 = vand.u32 4294901760, %v21139_v40 }
0x23bf   : > { %v13508_v28 = vpop.xlane.xlu1 %13507 }
0x23c0   : > { %v13509_v6 = vmul.f32 0.03125, %v13508_v28 }
0x23c2   : > { %v13510_v35 = vsub.f32 %v13505_v16, %v13509_v6 }
0x23c4   : > { %v13511_v1 = vmul.f32 %v13510_v35, %v13510_v35 }
0x23c6   : > { %v13512_v24 = vsel %vm362_vm1, %v13511_v1, 0.0 }
0x23c7   : > { %13513 = vadd.xlane.f32.xlu1 %v13512_v24 }
0x2454   : > { %v13514_v53 = vpop.xlane.xlu1 %13513 }
0x2455   : > { %v13515_v30 = vmul.f32 0.03125, %v13514_v53  ;;  %v14165_v53 = vsub.f32 %v21143_v59, %v14164_v51 }
0x2457   : > { %v13516_v17 = vadd.f32 1e-05, %v13515_v30  ;;  %v14159_v30 = vand.u32 4294901760, %v14158_v29 }
0x2459   : > { %18913 = vrsqrt.f32 %v13516_v17  ;;  %v14166_v17 = vand.u32 4294901760, %v14165_v53 }
0x2463   : > { %v18914_v49 = vpop.eup %18913 }
0x2464   : > { %v13518_v46 = vmul.f32 %v18914_v49, %v13510_v35  ;;  %v14050_v35 = vand.u32 4294901760, %v14781_v47  ;;  %v14178_v49 = vand.u32 4294901760, %v21148_v21 }
0x2466   : > { %v13523_v54 = vmul.f32 %v13522_v36, %v13518_v46  ;;  %v21111_v45 = vpack.c.bf16 %v14053_v5, %v14050_v35  ;;  %v18578_v46 = vpack.c.bf16 %v14166_v17, %v14159_v30  ;;  %v18614_v5 = vpack.c.bf16 %v14164_v51, %v14157_v50 }
0x2467   : > { %v14602_v30 = vrot.slane %v20919_v38, %v19891_v23 }
0x2468   : > { %v21073_v16 = vadd.f32 %v13527_v19, %v13523_v54  ;;  %18564 = vmatpush3.bf16.msra.mxu1 %v21111_v45  ;;  %v14179_v54 = vsub.f32 %v21148_v21, %v14178_v49 }
0x2469   : > { %18565 = vmatprep.subr.bf16.mxu1 %v18984_v3 }
0x246a   : > { %v13539_v63 = vsel %vm362_vm1, %v21073_v16, 0 }
0x246b   : > { %v13610_v28 = vand.u32 4294901760, %v13539_v63 }
0x246c   : > { %18567 = vmatpush3.bf16.msra.mxu1 %v21123_v61 }
0x246d   : > { %v13611_v6 = vsub.f32 %v13539_v63, %v13610_v28  ;;  %18568 = vmatprep.subr.bf16.mxu1 %v18984_v3 }
0x246f   : > { %v13612_v1 = vand.u32 4294901760, %v13611_v6 }
0x2471   : > { %v13613_v24 = vsub.f32 %v13611_v6, %v13612_v1 }
0x2473   : > { %v13614_v25 = vand.u32 4294901760, %v13613_v24 }
0x2475   : > { %17452 = vmatmul.mubr.f32.vlgmr.msra.gmra.mrb[48].mxu0 %v13614_v25  ;;  %v18590_v25 = vpack.c.bf16 %v21143_v59, %v21141_v2 }
0x2476   : > { %18531 = vmatpush3.bf16.msra.mxu0 %v18530_v10  ;;  %17462 = vmatprep.mubr.msk.f32.mxu0 %vm18985_vm0, %v18986_v9  ;;  %v14137_v10 = vsub.f32 %v21065_v14, %v14136_v18 }
0x2477   : > { %18532 = vmatprep.subr.bf16.mxu0 %v18984_v3 }
0x2478   : > { %v14138_v8 = vand.u32 4294901760, %v14137_v10 }
0x247a   : > { %18534 = vmatpush3.bf16.msra.mxu0 %v18533_v56  ;;  %v18572_v56 = vpack.c.bf16 %v14138_v8, %v14131_v22 }
0x247b   : > { %18535 = vmatprep.subr.bf16.mxu0 %v18984_v3 }
0x247d   : > { %17463 = vmatmul.mubr.f32.vlgmr.msra.gmra.mrb[48].mxu0 %v13610_v28 }
0x247e   : > { %18537 = vmatpush3.bf16.msra.mxu0 %v18536_v34  ;;  %17473 = vmatprep.mubr.msk.f32.mxu0 %vm18985_vm0, %v18986_v9 }
0x247f   : > { %18538 = vmatprep.subr.bf16.mxu0 %v18984_v3 }
0x2482   : > { %18540 = vmatpush3.bf16.msra.mxu0 %v18539_v41  ;;  %v14151_v41 = vsub.f32 %v21139_v40, %v14150_v62 }
0x2483   : > { %18541 = vmatprep.subr.bf16.mxu0 %v18984_v3 }
0x2485   : > { %17474 = vmatmul.mubr.f32.vlgmr.msra.gmra.mrb[48].mxu0 %v13611_v6 }
0x2486   : > { %18543 = vmatpush3.bf16.msra.mxu0 %v21047_v20  ;;  %17484 = vmatprep.mubr.msk.f32.mxu0 %vm18985_vm0, %v18986_v9 }
0x2487   : > { %18544 = vmatprep.subr.bf16.mxu0 %v18984_v3 }
0x248a   : > { %18546 = vmatpush3.bf16.msra.mxu0 %v21050_v31 }
0x248b   : > { %18547 = vmatprep.subr.bf16.mxu0 %v18984_v3 }
0x248d   : > { %17485 = vmatmul.mubr.f32.vlgmr.msra.gmra.mrb[48].mxu0 %v13612_v1  ;;  %v18584_v1 = vpack.c.bf16 %v21065_v14, %v21063_v33 }
0x248e   : > { %18549 = vmatpush3.bf16.msra.mxu0 %v18548_v48  ;;  %17495 = vmatprep.mubr.msk.f32.mxu0 %vm18985_vm0, %v18986_v9 }
0x248f   : > { %18550 = vmatprep.subr.bf16.mxu0 %v18984_v3 }
0x2492   : > { %18552 = vmatpush3.bf16.msra.mxu0 %v18551_v58  ;;  %v14152_v58 = vand.u32 4294901760, %v14151_v41 }
0x2493   : > { %18553 = vmatprep.subr.bf16.mxu0 %v18984_v3 }
0x2495   : > { %17496 = vmatmul.mubr.f32.vlgmr.msra.gmra.mrb[48].mxu0 %v13610_v28 }
0x2496   : > { %18555 = vmatpush3.bf16.msra.mxu0 %v21047_v20  ;;  %17506 = vmatprep.mubr.msk.f32.mxu0 %vm18985_vm0, %v18986_v9  ;;  %v14785_v20 = vld [vmem:[%s21269_s6 + $0xf0] sm:$0xff] }
0x2497   : > { %18556 = vmatprep.subr.bf16.mxu0 %v18984_v3  ;;  %v14062_v0 = vand.u32 4294901760, %v14785_v20 }
0x2499   : > { %v21135_v26 = vpack.c.bf16 %v14065_v4, %v14062_v0  ;;  %v21146_v57 = vsub.f32 %v14785_v20, %v14062_v0 }
0x249a   : > { %18558 = vmatpush3.bf16.msra.mxu0 %v21050_v31  ;;  %v21137_v31 = vsub.f32 %v14781_v47, %v14050_v35 }
0x249b   : > { %18595 = vmatprep.subr.bf16.mxu0 %v18984_v3  ;;  %18570 = vmatpush3.bf16.msra.mxu1 %v21135_v26  ;;  %v14171_v36 = vand.u32 4294901760, %v21146_v57  ;;  %v18593_v47 = vpack.c.bf16 %v21148_v21, %v21146_v57 }
0x249c   : > { %18571 = vmatprep.subr.bf16.mxu1 %v18984_v3  ;;  %v14143_v37 = vand.u32 4294901760, %v21137_v31  ;;  %v18587_v24 = vpack.c.bf16 %v21139_v40, %v21137_v31 }
0x249d   : > { %17507 = vmatmul.mubr.f32.vlgmr.msra.gmra.mrb[48].mxu0 %v13610_v28  ;;  %v14172_v19 = vsub.f32 %v21146_v57, %v14171_v36  ;;  %v14180_v28 = vand.u32 4294901760, %v14179_v54  ;;  %v18617_v27 = vpack.c.bf16 %v14178_v49, %v14171_v36 }
0x249e   : > { %18597 = vmatpush3.bf16.msra.mxu0 %v21061_v13  ;;  %17582 = vmatprep.mubr.msk.f32.mxu0 %vm18985_vm0, %v18986_v9  ;;  %v14144_v34 = vsub.f32 %v21137_v31, %v14143_v37  ;;  %v18611_v35 = vpack.c.bf16 %v14150_v62, %v14143_v37 }
0x249f   : > { %18598 = vmatprep.subr.bf16.mxu0 %v18984_v3  ;;  %v14173_v63 = vand.u32 4294901760, %v14172_v19 }
0x24a0   : > { %v14145_v48 = vand.u32 4294901760, %v14144_v34 }
0x24a1   : > { %v18581_v6 = vpack.c.bf16 %v14180_v28, %v14173_v63 }
0x24a2   : > { %18600 = vmatpush3.bf16.msra.mxu0 %v21111_v45  ;;  %v18575_v43 = vpack.c.bf16 %v14152_v58, %v14145_v48 }
0x24a3   : > { %18601 = vmatprep.subr.bf16.mxu0 %v18984_v3 }
0x24a6   : > { %18603 = vmatpush3.bf16.msra.mxu0 %v21123_v61 }
0x24a7   : > { %18604 = vmatprep.subr.bf16.mxu0 %v18984_v3 }
0x24aa   : > { %18606 = vmatpush3.bf16.msra.mxu0 %v21135_v26 }
0x24ab   : > { %18619 = vmatprep.subr.bf16.mxu0 %v18984_v3 }
0x2570   : > { %v14022_v52 = vpop.f32.mrb[48].mxu0 }
0x2571   : > { %v18643_v60 = vadd.f32 %v14022_v52, %v13537_v42  ;;  %v17508_v20 = vpop.f32.mrb[49].mxu0 }
0x2573   : > { %v14026_v33 = vmax.f32 %v18643_v60, 0.0 }
0x2575   : > { %v14041_v14 = vsel %vm863_vm2, %v14026_v33, 0 }
0x2576   : > { %v14116_v32 = vand.u32 4294901760, %v14041_v14 }
0x2578   : > { %v14117_v0 = vsub.f32 %v14041_v14, %v14116_v32 }
0x257a   : > { %v14118_v4 = vand.u32 4294901760, %v14117_v0 }
0x257c   : > { %17583 = vmatmul.mubr.f32.vlgmr.msra.gmra.mrb[50].mxu0 %v14118_v4  ;;  %v14119_v31 = vsub.f32 %v14117_v0, %v14118_v4 }
0x257d   : > { %18621 = vmatpush3.bf16.msra.mxu0 %v21061_v13  ;;  %17620 = vmatprep.mubr.msk.f32.mxu0 %vm18985_vm0, %v18986_v9 }
0x257e   : > { %18622 = vmatprep.subr.bf16.mxu0 %v18984_v3  ;;  %v14120_v40 = vand.u32 4294901760, %v14119_v31 }
0x2580   : > { %17526 = vmatmul.mubr.f32.vlgmr.msra.gmra.mrb[76].mxu1 %v14120_v40 }
0x2581   : > { %18573 = vmatpush3.bf16.msra.mxu1 %v18572_v56  ;;  %18624 = vmatpush3.bf16.msra.mxu0 %v21111_v45 }
0x2582   : > { %18574 = vmatprep.subr.bf16.mxu1 %v18984_v3  ;;  %18625 = vmatprep.subr.bf16.mxu0 %v18984_v3 }
0x2583   : > { %17544 = vmatprep.mubr.msk.f32.mxu1 %vm18985_vm0, %v18986_v9 }
0x2585   : > { %18576 = vmatpush3.bf16.msra.mxu1 %v18575_v43  ;;  %18627 = vmatpush3.bf16.msra.mxu0 %v21123_v61  ;;  %v14039_v61 = vrot.slane %v20919_v38, %v19710_v39 }
0x2586   : > { %18577 = vmatprep.subr.bf16.mxu1 %v18984_v3  ;;  %18628 = vmatprep.subr.bf16.mxu0 %v18984_v3 }
0x2589   : > { %18579 = vmatpush3.bf16.msra.mxu1 %v18578_v46  ;;  %18630 = vmatpush3.bf16.msra.mxu0 %v21135_v26 }
0x258a   : > { %18580 = vmatprep.subr.bf16.mxu1 %v18984_v3 }
0x258c   : > { %17621 = vmatmul.mubr.f32.vlgmr.msra.gmra.mrb[52].mxu0 %v14116_v32 }
0x258d   : > { %18582 = vmatpush3.bf16.msra.mxu1 %v18581_v6 }
0x258e   : > { %18583 = vmatprep.subr.bf16.mxu1 %v18984_v3 }
0x2590   : > { %17545 = vmatmul.mubr.f32.vlgmr.msra.gmra.mrb[78].mxu1 %v14116_v32 }
0x2591   : > { %18585 = vmatpush3.bf16.msra.mxu1 %v18584_v1  ;;  %17563 = vmatprep.mubr.msk.f32.mxu1 %vm18985_vm0, %v18986_v9 }
0x2592   : > { %18586 = vmatprep.subr.bf16.mxu1 %v18984_v3 }
0x2595   : > { %18588 = vmatpush3.bf16.msra.mxu1 %v18587_v24 }
0x2596   : > { %18589 = vmatprep.subr.bf16.mxu1 %v18984_v3 }
0x2599   : > { %18591 = vmatpush3.bf16.msra.mxu1 %v18590_v25 }
0x259a   : > { %18592 = vmatprep.subr.bf16.mxu1 %v18984_v3 }
0x259d   : > { %18594 = vmatpush3.bf16.msra.mxu1 %v18593_v47 }
0x259e   : > { %18607 = vmatprep.subr.bf16.mxu1 %v18984_v3 }
0x25a0   : > { %17564 = vmatmul.mubr.f32.vlgmr.msra.gmra.mrb[80].mxu1 %v14117_v0 }
0x25a1   : > { %18609 = vmatpush3.bf16.msra.mxu1 %v18608_v55  ;;  %17601 = vmatprep.mubr.msk.f32.mxu1 %vm18985_vm0, %v18986_v9 }
0x25a2   : > { %18610 = vmatprep.subr.bf16.mxu1 %v18984_v3 }
0x25a5   : > { %18612 = vmatpush3.bf16.msra.mxu1 %v18611_v35 }
0x25a6   : > { %18613 = vmatprep.subr.bf16.mxu1 %v18984_v3 }
0x25a9   : > { %18615 = vmatpush3.bf16.msra.mxu1 %v18614_v5 }
0x25aa   : > { %18616 = vmatprep.subr.bf16.mxu1 %v18984_v3 }
0x25ad   : > { %18618 = vmatpush3.bf16.msra.mxu1 %v18617_v27 }
0x25b0   : > { %17602 = vmatmul.mubr.f32.vlgmr.msra.gmra.mrb[82].mxu1 %v14116_v32 }
0x264f   : > { %v14402_v11 = vpop.f32.mrb[50].mxu0 }
0x2650   : > { %v17584_v44 = vpop.f32.mrb[51].mxu0 }
0x2653   : > { %v14122_v13 = vpop.f32.mrb[76].mxu1 }
0x2654   : > { %v17527_v45 = vpop.f32.mrb[77].mxu1  ;;  %v14123_v9 = vadd.f32 %v14122_v13, %v14039_v61 }
0x265f   : > { %v14576_v26 = vpop.f32.mrb[52].mxu0 }
0x2660   : > { %v17622_v2 = vpop.f32.mrb[53].mxu0 }
0x2663   : > { %v14233_v59 = vpop.f32.mrb[78].mxu1 }
0x2664   : > { %v14234_v57 = vadd.f32 %v14233_v59, %v14123_v9  ;;  %v17546_v21 = vpop.f32.mrb[79].mxu1 }
0x2673   : > { %v14321_v12 = vpop.f32.mrb[80].mxu1 }
0x2674   : > { %v14322_v18 = vadd.f32 %v14321_v12, %v14234_v57  ;;  %v17565_v15 = vpop.f32.mrb[81].mxu1 }
0x2676   : > { %v14403_v10 = vadd.f32 %v14402_v11, %v14322_v18 }
0x2683   : > { %v14497_v3 = vpop.f32.mrb[82].mxu1 }
0x2684   : > { %v14498_v22 = vadd.f32 %v14497_v3, %v14403_v10  ;;  %v17603_v8 = vpop.f32.mrb[83].mxu1 }
0x2686   : > { %v14577_v37 = vadd.f32 %v14576_v26, %v14498_v22 }
0x2688   : > { %v14580_v62 = vadd.f32 %v14577_v37, %v21073_v16  ;;  %v14597_v16 = vrot.slane %v20919_v38, %v19888_v7 }
0x268a   : > { %v14581_v56 = vsel %vm362_vm1, %v14580_v62, 0.0 }
0x268b   : > { %14582 = vadd.xlane.f32.xlu1 %v14581_v56 }
0x2718   : > { %v14583_v39 = vpop.xlane.xlu1 %14582 }
0x2719   : > { %v14584_v34 = vmul.f32 0.03125, %v14583_v39 }
0x271b   : > { %v14585_v41 = vsub.f32 %v14580_v62, %v14584_v34 }
0x271d   : > { %v14586_v48 = vmul.f32 %v14585_v41, %v14585_v41 }
0x271f   : > { %v14587_v58 = vsel %vm362_vm1, %v14586_v48, 0.0 }
0x2720   : > { %14588 = vadd.xlane.f32.xlu0 %v14587_v58 }
0x27ad   : > { %v14589_v50 = vpop.xlane.xlu0 %14588 }
0x27ae   : > { %v14590_v51 = vmul.f32 0.03125, %v14589_v50 }
0x27b0   : > { %v14591_v43 = vadd.f32 1e-05, %v14590_v51 }
0x27b2   : > { %18915 = vrsqrt.f32 %v14591_v43 }
0x27bc   : > { %v18916_v29 = vpop.eup %18915 }
0x27bd   : > { %v14593_v53 = vmul.f32 %v18916_v29, %v14585_v41 }
0x27bf   : > { %v14598_v17 = vmul.f32 %v14597_v16, %v14593_v53 }
0x27c1   : > { %v14603_v36 = vadd.f32 %v14602_v30, %v14598_v17 }
0x27c3   : > { %14604 = vst.msk [vmem:[%s336_s17] sm:$0xff] %vm362_vm1, %v14603_v36 }
0x27c4   : > { %18933 = shalt.err (!%p18930_p3)
}
0x27c5   : > { %s18934_s28 = scalar_lea.hbm %s21220_s24, 128  ;;  %s18938_s17 = scalar_lea.hbm %s21272_s9, 256 }
0x27c6   : > { %p18935_p4 = scmp.ne.s32.totalorder %s21220_s24, %s18934_s28  ;;  %p18939_p9 = scmp.lt.u32.totalorder %s21220_s24, %s21272_s9 }
0x27c7   : > { %p18940_p10 = scmp.lt.u32.totalorder %s18938_s17, %s18934_s28  ;;  %p18942_p12 = scmp.lt.u32.totalorder %s18934_s28, %s21220_s24 }
0x27c8   : > { %p18936_p7 = pnand %p18935_p4, %p19077_p5 }
0x27c9   : > { %p18941_p11 = por %p18940_p10, %p18939_p9 }
0x27ca   : > { %p18937_p8 = pneg %p18936_p7 }
0x27cb   : > { %p18943_p13 = por %p18942_p12, %p18941_p11 }
0x27cd   : > { %p18944_p0 = pnand %p18943_p13, %p18937_p8 }
0x27cf   : > { %18947 = shalt.err (!%p18944_p0)
}
0x27d0   : > { %18842 = dma.vmem_to_hbm [thread:$0]  (%p19077_p5), %s21222_s21, 128, %s21220_s24, %s14606_s16  }
0x27d1 PF: > { %p18848_p1 = scmp.ge.s32.totalorder %s18982_s12, 2  ;;  %s14631_s25 = sand.u32 1, %s18970_s30  }
0x27d2   : > { %s14632_s13 = scalar_lea.sflag [#allocation3], %s14631_s25 }
0x27d3   : > { %p18845_p2 = pnand %p18848_p1, %p19081_p6 }
0x27d5   : > { %18965 = dma.done.wait (!%p18845_p2), %s14632_s13, 128  }
0x27d6   : > { %18967 = vsyncadd (!%p18845_p2), %s14632_s13, 4294967168  ;;  %p19_p3 = scmp.ge.s32.totalorder %s19064_s15, 4   ;;  %s21275_s30 = smov %s18974_s10 }
0x27d7   : > { %s21276_s10 = smov %s18978_s11  ;;  %s21277_s11 = smov %s19075_s18 }
0x27d8   : > { %s21278_s12 = smov %s19064_s15  ;;  %21 = sbr.rel (!%p19_p3) target bundleno = 3 (0x3), region = 115 }
0x27df   :  { %14637 = vsyncpa [#allocation3], 1 }
0x27e0   :  { %14639 = vsyncpa [#allocation3 + $0x1], 1 }

</bundles_post_ra>
